<compile_context>
chip_gen: v5e
topology: v5e:2x2
jax: 0.10.0
libtpu: 0.0.40
codegen_flags: <defaults>
</compile_context>

<pallas_src>
import functools

import jax
import jax.numpy as jnp
from jax.experimental import pallas as pl
from jax.experimental.pallas import tpu as pltpu

LEAKY_SLOPE = 0.01  # nn.LeakyReLU / F.leaky_relu default
BN_EPS = 1e-5


def _leaky(v):
    return jnp.where(v > 0, v, LEAKY_SLOPE * v)


def fold_bn(bn):
    """Eval-mode BatchNorm -> per-channel (scale, shift)."""
    s = bn["gamma"] / jnp.sqrt(bn["var"] + BN_EPS)
    t = bn["beta"] - bn["mean"] * s
    return s, t


# ----------------------------------------------------------------------------
# The fused mega-kernel (everything VMEM-resident)
# ----------------------------------------------------------------------------
def _mega_kernel(
    xk_ref, wvec_ref,
    w1_ref, b1_ref, s1_ref, t1_ref,
    w2_ref, b2_ref, s2_ref, t2_ref,
    w3_ref, b3_ref, s3_ref, t3_ref,
    rep_ref, fcw_ref, fcb_ref,
    wct_ref, wcb_ref, bc_ref, sc_ref, tc_ref,
    sel_ref, wh_ref, bh_ref, wo_ref, bo_ref,
    o_ref, *, B, A, T,
):
    f32 = jnp.float32
    bf16 = jnp.bfloat16
    M = B * A          # rows are (b, a) pairs: m = b*A + a
    T1 = T - 2
    T2 = T - 4

    # ---- conv1 (3,1) + LeakyReLU + BN1 : shifted-slice matmuls -------------
    xk = xk_ref[...]                                           # (T*M, C) bf16
    z0 = jnp.dot(xk, w1_ref[0], preferred_element_type=f32)
    z1 = jnp.dot(xk, w1_ref[1], preferred_element_type=f32)
    z2 = jnp.dot(xk, w1_ref[2], preferred_element_type=f32)
    y1 = (z0[0:T1 * M, :] + z1[M:(T1 + 1) * M, :]
          + z2[2 * M:(T1 + 2) * M, :] + b1_ref[...])
    y1 = (_leaky(y1) * s1_ref[...] + t1_ref[...]).astype(bf16)   # (T1*M, 32)

    # ---- conv2 (3,1) + LeakyReLU + BN2 --------------------------------------
    z0 = jnp.dot(y1, w2_ref[0], preferred_element_type=f32)
    z1 = jnp.dot(y1, w2_ref[1], preferred_element_type=f32)
    z2 = jnp.dot(y1, w2_ref[2], preferred_element_type=f32)
    y2 = (z0[0:T2 * M, :] + z1[M:(T2 + 1) * M, :]
          + z2[2 * M:(T2 + 2) * M, :] + b2_ref[...])
    y2 = (_leaky(y2) * s2_ref[...] + t2_ref[...]).astype(bf16)   # (T2*M, 64)

    # ---- conv3 (T-4,1) + LeakyReLU + BN3 : per-tap accumulated dots ---------
    acc = jnp.zeros((M, 128), f32)
    for t in range(T2):
        acc = acc + jnp.dot(y2[t * M:(t + 1) * M, :], w3_ref[t],
                            preferred_element_type=f32)
    y3 = (_leaky(acc + b3_ref[...]) * s3_ref[...] + t3_ref[...]).astype(bf16)  # (M, 128)

    # ---- fc_weight folded into conv1d_common (+ LeakyReLU + BN_common) ------
    # w_exp[m, :] = weight[b_m, :]  (row expansion via a tiny selection matmul)
    w_exp = jnp.dot(rep_ref[...], wvec_ref[...], preferred_element_type=f32)   # (M, A)
    fcv = jnp.sum(w_exp * fcw_ref[...], axis=1, keepdims=True) + fcb_ref[...]  # (M, 1)
    z_pre = (jnp.dot(y3, wct_ref[...], preferred_element_type=f32)
             + fcv * wcb_ref[...] + bc_ref[...])                               # (M, 64)
    z = (_leaky(z_pre) * sc_ref[...] + tc_ref[...]).astype(bf16)

    # ---- fused policy/value hidden layer -------------------------------------
    # x_flat[b, c*A + a] = z[b*A + a, c]; head weights pre-permuted to
    # (A, 64, 256) so  h = sum_a (rows of asset a) @ W_h[a].  Row selection is
    # done with tiny 0/1 MXU matmuls to avoid in-kernel reshapes.
    h = jnp.zeros((B, 256), f32)
    for a in range(A):
        za = jnp.dot(sel_ref[a], z, preferred_element_type=f32).astype(bf16)   # (B, 64)
        h = h + jnp.dot(za, wh_ref[a], preferred_element_type=f32)
    h = _leaky(h + bh_ref[...]).astype(bf16)                                   # (B, 256)

    # ---- fused block-diagonal output layer (lane-dense 128-wide store) -------
    out = jnp.dot(h, wo_ref[...], preferred_element_type=f32) + bo_ref[...]    # (B, 128)
    o_ref[...] = out


# ----------------------------------------------------------------------------
# One-time weight repacking (off the hot path)
# ----------------------------------------------------------------------------
def prepare_params(params, *, T, A, B):
    bf16 = jnp.bfloat16
    f32 = jnp.float32
    M = B * A
    T2 = T - 4

    def row(v):
        return jnp.asarray(v, f32).reshape(1, -1)

    s1, t1 = fold_bn(params["bn1"])
    s2, t2 = fold_bn(params["bn2"])
    s3, t3 = fold_bn(params["bn3"])
    sc, tc = fold_bn(params["bn_common"])

    # conv taps -> (kh, Cin, Cout), bf16
    w1 = jnp.transpose(params["conv1_w"][:, :, :, 0], (2, 1, 0)).astype(bf16)
    w2 = jnp.transpose(params["conv2_w"][:, :, :, 0], (2, 1, 0)).astype(bf16)
    w3 = jnp.transpose(params["conv3_w"][:, :, :, 0], (2, 1, 0)).astype(bf16)
    assert w3.shape[0] == T2

    # conv1d_common split: conv-channel block + the fc-weight (129th) row
    wc_top = params["c1d_w"][:, :128, 0].T.astype(bf16)         # (128, 64)
    wc_bot = row(params["c1d_w"][:, 128, 0])                    # (1, 64)

    # fc_weight (Linear(A, A)) in per-row (b, a) tiled form
    rep = (jnp.arange(M)[:, None] // A == jnp.arange(B)[None, :]).astype(f32)  # (M, B)
    fcw_t = jnp.tile(params["fc_w"], (B, 1)).astype(f32)        # (M, A): row m = fc_w[a_m]
    fcb_t = jnp.tile(params["fc_b"], B).reshape(M, 1).astype(f32)

    # selection matrices: sel[a, b, m] = 1 iff m == b*A + a
    m_idx = jnp.arange(M)[None, None, :]
    tgt = jnp.arange(B)[None, :, None] * A + jnp.arange(A)[:, None, None]
    sel = (m_idx == tgt).astype(bf16)                           # (A, B, M)

    # fused policy+value hidden layer, permuted to (A, 64, 256)
    wh_full = jnp.concatenate([params["p1_w"], params["v1_w"]], axis=0)  # (256, 64A)
    wh3 = jnp.transpose(wh_full.T.reshape(64, A, 256), (1, 0, 2)).astype(bf16)
    bh = row(jnp.concatenate([params["p1_b"], params["v1_b"]]))

    # fused block-diagonal output layer, zero-padded to 128 lanes
    wo = jnp.zeros((256, 128), f32)
    wo = wo.at[:128, :A + 1].set(params["p2_w"].T)
    wo = wo.at[128:, A + 1].set(params["v2_w"][0])
    bo = jnp.zeros((128,), f32)
    bo = bo.at[:A + 1].set(params["p2_b"]).at[A + 1].set(params["v2_b"][0])

    return {
        "w1": w1, "b1": row(params["conv1_b"]), "s1": row(s1), "t1": row(t1),
        "w2": w2, "b2": row(params["conv2_b"]), "s2": row(s2), "t2": row(t2),
        "w3": w3, "b3": row(params["conv3_b"]), "s3": row(s3), "t3": row(t3),
        "rep": rep, "fcw_t": fcw_t, "fcb_t": fcb_t,
        "wc_top": wc_top, "wc_bot": wc_bot, "bc1d": row(params["c1d_b"]),
        "sc": row(sc), "tc": row(tc),
        "sel": sel, "wh3": wh3, "bh": bh,
        "wo": wo.astype(bf16), "bo": bo.reshape(1, 128),
    }


# ----------------------------------------------------------------------------
# Forward (single pallas_call + trivial layout plumbing)
# ----------------------------------------------------------------------------
def forward(prep, price_tensor, weight):
    B, T, A, C = price_tensor.shape
    M = B * A

    # layout plumbing only: (B,T,A,C) -> (T*B*A, C) so the time convolutions
    # become shifted row-slices inside the kernel.
    xk = jnp.transpose(price_tensor, (1, 0, 2, 3)).reshape(T * M, C).astype(jnp.bfloat16)

    args = (
        xk, weight.astype(jnp.float32),
        prep["w1"], prep["b1"], prep["s1"], prep["t1"],
        prep["w2"], prep["b2"], prep["s2"], prep["t2"],
        prep["w3"], prep["b3"], prep["s3"], prep["t3"],
        prep["rep"], prep["fcw_t"], prep["fcb_t"],
        prep["wc_top"], prep["wc_bot"], prep["bc1d"], prep["sc"], prep["tc"],
        prep["sel"], prep["wh3"], prep["bh"], prep["wo"], prep["bo"],
    )
    out = pl.pallas_call(
        functools.partial(_mega_kernel, B=B, A=A, T=T),
        out_shape=jax.ShapeDtypeStruct((B, 128), jnp.float32),
        in_specs=[pl.BlockSpec(memory_space=pltpu.MemorySpace.VMEM)] * len(args),
        out_specs=pl.BlockSpec(memory_space=pltpu.MemorySpace.VMEM),
    )(*args)

    action_mean = out[:, :A + 1]
    value = out[:, A + 1:A + 2]
    return action_mean, value


# ----------------------------------------------------------------------------
# Plain-JAX f32 reference (for a loose numerical sanity check)
# ----------------------------------------------------------------------------
def reference_forward(params, price_tensor, weight):
    x = jnp.transpose(price_tensor, (0, 3, 1, 2)).astype(jnp.float32)  # (B,C,T,A)
    B = x.shape[0]

    def conv_block(x, w, b, bn):
        kh = w.shape[2]
        Hout = x.shape[2] - kh + 1
        acc = jnp.zeros((x.shape[0], w.shape[0], Hout, x.shape[3]), jnp.float32)
        for r in range(kh):
            acc = acc + jnp.einsum("bcta,oc->bota", x[:, :, r:r + Hout, :], w[:, :, r, 0])
        acc = acc + b[None, :, None, None]
        s, t = fold_bn(bn)
        return _leaky(acc) * s[None, :, None, None] + t[None, :, None, None]

    x = conv_block(x, params["conv1_w"], params["conv1_b"], params["bn1"])
    x = conv_block(x, params["conv2_w"], params["conv2_b"], params["bn2"])
    x = conv_block(x, params["conv3_w"], params["conv3_b"], params["bn3"])
    x = jnp.squeeze(x, axis=2)                                   # (B, 128, A)

    w_fc = weight @ params["fc_w"].T + params["fc_b"]            # (B, A)
    x = jnp.concatenate([x, w_fc[:, None, :]], axis=1)           # (B, 129, A)

    z = jnp.einsum("bia,oi->boa", x, params["c1d_w"][:, :, 0]) + params["c1d_b"][None, :, None]
    s, t = fold_bn(params["bn_common"])
    z = _leaky(z) * s[None, :, None] + t[None, :, None]          # (B, 64, A)

    x_flat = z.reshape(B, -1)
    hp = _leaky(x_flat @ params["p1_w"].T + params["p1_b"])
    action_mean = hp @ params["p2_w"].T + params["p2_b"]
    hv = _leaky(x_flat @ params["v1_w"].T + params["v1_b"])
    value = hv @ params["v2_w"].T + params["v2_b"]
    return action_mean, value


# ----------------------------------------------------------------------------
# Deterministic synthetic parameters (PyTorch layout)
# ----------------------------------------------------------------------------
def init_params(key, T, A, C):
    nf = [32, 64, 128]
    ks = jax.random.split(key, 32)
    ki = iter(ks)

    def dense(k, fan_in, fan_out):
        return 0.1 * jax.random.normal(k, (fan_out, fan_in), jnp.float32)

    def bn(k, c):
        k1, k2, k3 = jax.random.split(k, 3)
        return {
            "gamma": 1.0 + 0.1 * jax.random.normal(k1, (c,), jnp.float32),
            "beta": 0.1 * jax.random.normal(k2, (c,), jnp.float32),
            "mean": 0.1 * jax.random.normal(k3, (c,), jnp.float32),
            "var": jnp.ones((c,), jnp.float32),
        }

    p = {}
    p["conv1_w"] = 0.1 * jax.random.normal(next(ki), (nf[0], C, 3, 1), jnp.float32)
    p["conv1_b"] = 0.1 * jax.random.normal(next(ki), (nf[0],), jnp.float32)
    p["bn1"] = bn(next(ki), nf[0])
    p["conv2_w"] = 0.1 * jax.random.normal(next(ki), (nf[1], nf[0], 3, 1), jnp.float32)
    p["conv2_b"] = 0.1 * jax.random.normal(next(ki), (nf[1],), jnp.float32)
    p["bn2"] = bn(next(ki), nf[1])
    p["conv3_w"] = 0.1 * jax.random.normal(next(ki), (nf[2], nf[1], T - 4, 1), jnp.float32)
    p["conv3_b"] = 0.1 * jax.random.normal(next(ki), (nf[2],), jnp.float32)
    p["bn3"] = bn(next(ki), nf[2])
    p["fc_w"] = dense(next(ki), A, A)
    p["fc_b"] = 0.1 * jax.random.normal(next(ki), (A,), jnp.float32)
    p["c1d_w"] = 0.1 * jax.random.normal(next(ki), (64, nf[2] + 1, 1), jnp.float32)
    p["c1d_b"] = 0.1 * jax.random.normal(next(ki), (64,), jnp.float32)
    p["bn_common"] = bn(next(ki), 64)
    p["p1_w"] = dense(next(ki), 64 * A, 128)
    p["p1_b"] = 0.1 * jax.random.normal(next(ki), (128,), jnp.float32)
    p["p2_w"] = dense(next(ki), 128, A + 1)
    p["p2_b"] = 0.1 * jax.random.normal(next(ki), (A + 1,), jnp.float32)
    p["v1_w"] = dense(next(ki), 64 * A, 128)
    p["v1_b"] = 0.1 * jax.random.normal(next(ki), (128,), jnp.float32)
    p["v2_w"] = dense(next(ki), 128, 1)
    p["v2_b"] = 0.1 * jax.random.normal(next(ki), (1,), jnp.float32)
    return p


# ----------------------------------------------------------------------------
if __name__ == "__main__":
    B, T, A, C = 2, 16, 8, 4   # batch, time window, num_assets, price features

    key = jax.random.PRNGKey(0)
    kp, kx, kw = jax.random.split(key, 3)
    params = init_params(kp, T, A, C)

    price_tensor = jax.random.normal(kx, (B, T, A, C), jnp.float32)
    weight = jax.nn.softmax(jax.random.normal(kw, (B, A), jnp.float32), axis=-1)

    prep = prepare_params(params, T=T, A=A, B=B)   # one-time weight repack
    fwd = jax.jit(forward)

    action_mean, value = fwd(prep, price_tensor, weight)
    jax.block_until_ready((action_mean, value))

    assert action_mean.shape == (B, A + 1), action_mean.shape
    assert value.shape == (B, 1), value.shape

    # Loose sanity check vs. plain-JAX f32 reference (kernel uses bf16 MXU inputs).
    am_ref, v_ref = reference_forward(params, price_tensor, weight)
    err = max(float(jnp.max(jnp.abs(action_mean - am_ref))),
              float(jnp.max(jnp.abs(value - v_ref))))
    ref_max = max(float(jnp.max(jnp.abs(am_ref))), float(jnp.max(jnp.abs(v_ref))))
    assert err <= 1e-1 + 5e-2 * ref_max, (err, ref_max)

    print("KERNEL_OK")
</pallas_src>

<mosaic_0001>
module attributes {stable_mosaic.version = 11 : i64} {
  func.func @_mega_kernel(%arg0: memref<256x4xbf16, #tpu.memory_space<vmem>>, %arg1: memref<2x8xf32, #tpu.memory_space<vmem>>, %arg2: memref<3x4x32xbf16, #tpu.memory_space<vmem>>, %arg3: memref<1x32xf32, #tpu.memory_space<vmem>>, %arg4: memref<1x32xf32, #tpu.memory_space<vmem>>, %arg5: memref<1x32xf32, #tpu.memory_space<vmem>>, %arg6: memref<3x32x64xbf16, #tpu.memory_space<vmem>>, %arg7: memref<1x64xf32, #tpu.memory_space<vmem>>, %arg8: memref<1x64xf32, #tpu.memory_space<vmem>>, %arg9: memref<1x64xf32, #tpu.memory_space<vmem>>, %arg10: memref<12x64x128xbf16, #tpu.memory_space<vmem>>, %arg11: memref<1x128xf32, #tpu.memory_space<vmem>>, %arg12: memref<1x128xf32, #tpu.memory_space<vmem>>, %arg13: memref<1x128xf32, #tpu.memory_space<vmem>>, %arg14: memref<16x2xf32, #tpu.memory_space<vmem>>, %arg15: memref<16x8xf32, #tpu.memory_space<vmem>>, %arg16: memref<16x1xf32, #tpu.memory_space<vmem>>, %arg17: memref<128x64xbf16, #tpu.memory_space<vmem>>, %arg18: memref<1x64xf32, #tpu.memory_space<vmem>>, %arg19: memref<1x64xf32, #tpu.memory_space<vmem>>, %arg20: memref<1x64xf32, #tpu.memory_space<vmem>>, %arg21: memref<1x64xf32, #tpu.memory_space<vmem>>, %arg22: memref<8x2x16xbf16, #tpu.memory_space<vmem>>, %arg23: memref<8x64x256xbf16, #tpu.memory_space<vmem>>, %arg24: memref<1x256xf32, #tpu.memory_space<vmem>>, %arg25: memref<256x128xbf16, #tpu.memory_space<vmem>>, %arg26: memref<1x128xf32, #tpu.memory_space<vmem>>, %arg27: memref<2x128xf32, #tpu.memory_space<vmem>>) attributes {dimension_semantics = [], scalar_prefetch = 0 : i64, scratch_operands = 0 : i64, tpu.core_type = #tpu.core_type<tc>} {
    %c0 = arith.constant 0 : index
    %c0_0 = arith.constant 0 : index
    %0 = vector.load %arg0[%c0, %c0_0] : memref<256x4xbf16, #tpu.memory_space<vmem>>, vector<256x4xbf16>
    %c0_1 = arith.constant 0 : index
    %c0_2 = arith.constant 0 : index
    %c0_3 = arith.constant 0 : index
    %1 = vector.load %arg2[%c0_1, %c0_2, %c0_3] : memref<3x4x32xbf16, #tpu.memory_space<vmem>>, vector<1x4x32xbf16>
    %2 = vector.shape_cast %1 : vector<1x4x32xbf16> to vector<4x32xbf16>
    %cst = arith.constant dense<0.000000e+00> : vector<256x32xf32>
    %3 = tpu.matmul %0, %2, %cst {dimension_numbers = #tpu.dot_dimension_numbers<[1], [0], [0], [1], [0, 0, 1, 1], [], []>} : vector<256x4xbf16>, vector<4x32xbf16>, vector<256x32xf32> -> vector<256x32xf32>
    %c1 = arith.constant 1 : index
    %c0_4 = arith.constant 0 : index
    %c0_5 = arith.constant 0 : index
    %4 = vector.load %arg2[%c1, %c0_4, %c0_5] : memref<3x4x32xbf16, #tpu.memory_space<vmem>>, vector<1x4x32xbf16>
    %5 = vector.shape_cast %4 : vector<1x4x32xbf16> to vector<4x32xbf16>
    %cst_6 = arith.constant dense<0.000000e+00> : vector<256x32xf32>
    %6 = tpu.matmul %0, %5, %cst_6 {dimension_numbers = #tpu.dot_dimension_numbers<[1], [0], [0], [1], [0, 0, 1, 1], [], []>} : vector<256x4xbf16>, vector<4x32xbf16>, vector<256x32xf32> -> vector<256x32xf32>
    %c2 = arith.constant 2 : index
    %c0_7 = arith.constant 0 : index
    %c0_8 = arith.constant 0 : index
    %7 = vector.load %arg2[%c2, %c0_7, %c0_8] : memref<3x4x32xbf16, #tpu.memory_space<vmem>>, vector<1x4x32xbf16>
    %8 = vector.shape_cast %7 : vector<1x4x32xbf16> to vector<4x32xbf16>
    %cst_9 = arith.constant dense<0.000000e+00> : vector<256x32xf32>
    %9 = tpu.matmul %0, %8, %cst_9 {dimension_numbers = #tpu.dot_dimension_numbers<[1], [0], [0], [1], [0, 0, 1, 1], [], []>} : vector<256x4xbf16>, vector<4x32xbf16>, vector<256x32xf32> -> vector<256x32xf32>
    %10 = vector.extract_strided_slice %3 {offsets = [0, 0], sizes = [224, 32], strides = [1, 1]} : vector<256x32xf32> to vector<224x32xf32>
    %11 = vector.extract_strided_slice %6 {offsets = [16, 0], sizes = [224, 32], strides = [1, 1]} : vector<256x32xf32> to vector<224x32xf32>
    %12 = arith.addf %10, %11 : vector<224x32xf32>
    %13 = vector.extract_strided_slice %9 {offsets = [32, 0], sizes = [224, 32], strides = [1, 1]} : vector<256x32xf32> to vector<224x32xf32>
    %14 = arith.addf %12, %13 : vector<224x32xf32>
    %c0_10 = arith.constant 0 : index
    %c0_11 = arith.constant 0 : index
    %15 = vector.load %arg3[%c0_10, %c0_11] : memref<1x32xf32, #tpu.memory_space<vmem>>, vector<1x32xf32>
    %16 = vector.broadcast %15 : vector<1x32xf32> to vector<224x32xf32>
    %17 = arith.addf %14, %16 : vector<224x32xf32>
    %cst_12 = arith.constant 0.000000e+00 : f32
    %18 = vector.broadcast %cst_12 : f32 to vector<224x32xf32>
    %19 = arith.cmpf ogt, %17, %18 : vector<224x32xf32>
    %cst_13 = arith.constant 0.00999999977 : f32
    %20 = vector.broadcast %cst_13 : f32 to vector<224x32xf32>
    %21 = arith.mulf %20, %17 : vector<224x32xf32>
    %22 = arith.select %19, %17, %21 : vector<224x32xi1>, vector<224x32xf32>
    %c0_14 = arith.constant 0 : index
    %c0_15 = arith.constant 0 : index
    %23 = vector.load %arg4[%c0_14, %c0_15] : memref<1x32xf32, #tpu.memory_space<vmem>>, vector<1x32xf32>
    %24 = vector.broadcast %23 : vector<1x32xf32> to vector<224x32xf32>
    %25 = arith.mulf %22, %24 : vector<224x32xf32>
    %c0_16 = arith.constant 0 : index
    %c0_17 = arith.constant 0 : index
    %26 = vector.load %arg5[%c0_16, %c0_17] : memref<1x32xf32, #tpu.memory_space<vmem>>, vector<1x32xf32>
    %27 = vector.broadcast %26 : vector<1x32xf32> to vector<224x32xf32>
    %28 = arith.addf %25, %27 : vector<224x32xf32>
    %29 = arith.truncf %28 : vector<224x32xf32> to vector<224x32xbf16>
    %c0_18 = arith.constant 0 : index
    %c0_19 = arith.constant 0 : index
    %c0_20 = arith.constant 0 : index
    %30 = vector.load %arg6[%c0_18, %c0_19, %c0_20] : memref<3x32x64xbf16, #tpu.memory_space<vmem>>, vector<1x32x64xbf16>
    %31 = vector.shape_cast %30 : vector<1x32x64xbf16> to vector<32x64xbf16>
    %cst_21 = arith.constant dense<0.000000e+00> : vector<224x64xf32>
    %32 = tpu.matmul %29, %31, %cst_21 {dimension_numbers = #tpu.dot_dimension_numbers<[1], [0], [0], [1], [0, 0, 1, 1], [], []>} : vector<224x32xbf16>, vector<32x64xbf16>, vector<224x64xf32> -> vector<224x64xf32>
    %c1_22 = arith.constant 1 : index
    %c0_23 = arith.constant 0 : index
    %c0_24 = arith.constant 0 : index
    %33 = vector.load %arg6[%c1_22, %c0_23, %c0_24] : memref<3x32x64xbf16, #tpu.memory_space<vmem>>, vector<1x32x64xbf16>
    %34 = vector.shape_cast %33 : vector<1x32x64xbf16> to vector<32x64xbf16>
    %cst_25 = arith.constant dense<0.000000e+00> : vector<224x64xf32>
    %35 = tpu.matmul %29, %34, %cst_25 {dimension_numbers = #tpu.dot_dimension_numbers<[1], [0], [0], [1], [0, 0, 1, 1], [], []>} : vector<224x32xbf16>, vector<32x64xbf16>, vector<224x64xf32> -> vector<224x64xf32>
    %c2_26 = arith.constant 2 : index
    %c0_27 = arith.constant 0 : index
    %c0_28 = arith.constant 0 : index
    %36 = vector.load %arg6[%c2_26, %c0_27, %c0_28] : memref<3x32x64xbf16, #tpu.memory_space<vmem>>, vector<1x32x64xbf16>
    %37 = vector.shape_cast %36 : vector<1x32x64xbf16> to vector<32x64xbf16>
    %cst_29 = arith.constant dense<0.000000e+00> : vector<224x64xf32>
    %38 = tpu.matmul %29, %37, %cst_29 {dimension_numbers = #tpu.dot_dimension_numbers<[1], [0], [0], [1], [0, 0, 1, 1], [], []>} : vector<224x32xbf16>, vector<32x64xbf16>, vector<224x64xf32> -> vector<224x64xf32>
    %39 = vector.extract_strided_slice %32 {offsets = [0, 0], sizes = [192, 64], strides = [1, 1]} : vector<224x64xf32> to vector<192x64xf32>
    %40 = vector.extract_strided_slice %35 {offsets = [16, 0], sizes = [192, 64], strides = [1, 1]} : vector<224x64xf32> to vector<192x64xf32>
    %41 = arith.addf %39, %40 : vector<192x64xf32>
    %42 = vector.extract_strided_slice %38 {offsets = [32, 0], sizes = [192, 64], strides = [1, 1]} : vector<224x64xf32> to vector<192x64xf32>
    %43 = arith.addf %41, %42 : vector<192x64xf32>
    %c0_30 = arith.constant 0 : index
    %c0_31 = arith.constant 0 : index
    %44 = vector.load %arg7[%c0_30, %c0_31] : memref<1x64xf32, #tpu.memory_space<vmem>>, vector<1x64xf32>
    %45 = vector.broadcast %44 : vector<1x64xf32> to vector<192x64xf32>
    %46 = arith.addf %43, %45 : vector<192x64xf32>
    %cst_32 = arith.constant 0.000000e+00 : f32
    %47 = vector.broadcast %cst_32 : f32 to vector<192x64xf32>
    %48 = arith.cmpf ogt, %46, %47 : vector<192x64xf32>
    %cst_33 = arith.constant 0.00999999977 : f32
    %49 = vector.broadcast %cst_33 : f32 to vector<192x64xf32>
    %50 = arith.mulf %49, %46 : vector<192x64xf32>
    %51 = arith.select %48, %46, %50 : vector<192x64xi1>, vector<192x64xf32>
    %c0_34 = arith.constant 0 : index
    %c0_35 = arith.constant 0 : index
    %52 = vector.load %arg8[%c0_34, %c0_35] : memref<1x64xf32, #tpu.memory_space<vmem>>, vector<1x64xf32>
    %53 = vector.broadcast %52 : vector<1x64xf32> to vector<192x64xf32>
    %54 = arith.mulf %51, %53 : vector<192x64xf32>
    %c0_36 = arith.constant 0 : index
    %c0_37 = arith.constant 0 : index
    %55 = vector.load %arg9[%c0_36, %c0_37] : memref<1x64xf32, #tpu.memory_space<vmem>>, vector<1x64xf32>
    %56 = vector.broadcast %55 : vector<1x64xf32> to vector<192x64xf32>
    %57 = arith.addf %54, %56 : vector<192x64xf32>
    %58 = arith.truncf %57 : vector<192x64xf32> to vector<192x64xbf16>
    %cst_38 = arith.constant 0.000000e+00 : f32
    %59 = vector.broadcast %cst_38 : f32 to vector<16x128xf32>
    %60 = vector.extract_strided_slice %58 {offsets = [0, 0], sizes = [16, 64], strides = [1, 1]} : vector<192x64xbf16> to vector<16x64xbf16>
    %c0_39 = arith.constant 0 : index
    %c0_40 = arith.constant 0 : index
    %c0_41 = arith.constant 0 : index
    %61 = vector.load %arg10[%c0_39, %c0_40, %c0_41] : memref<12x64x128xbf16, #tpu.memory_space<vmem>>, vector<1x64x128xbf16>
    %62 = vector.shape_cast %61 : vector<1x64x128xbf16> to vector<64x128xbf16>
    %cst_42 = arith.constant dense<0.000000e+00> : vector<16x128xf32>
    %63 = tpu.matmul %60, %62, %cst_42 {dimension_numbers = #tpu.dot_dimension_numbers<[1], [0], [0], [1], [0, 0, 1, 1], [], []>} : vector<16x64xbf16>, vector<64x128xbf16>, vector<16x128xf32> -> vector<16x128xf32>
    %64 = arith.addf %59, %63 : vector<16x128xf32>
    %65 = vector.extract_strided_slice %58 {offsets = [16, 0], sizes = [16, 64], strides = [1, 1]} : vector<192x64xbf16> to vector<16x64xbf16>
    %c1_43 = arith.constant 1 : index
    %c0_44 = arith.constant 0 : index
    %c0_45 = arith.constant 0 : index
    %66 = vector.load %arg10[%c1_43, %c0_44, %c0_45] : memref<12x64x128xbf16, #tpu.memory_space<vmem>>, vector<1x64x128xbf16>
    %67 = vector.shape_cast %66 : vector<1x64x128xbf16> to vector<64x128xbf16>
    %cst_46 = arith.constant dense<0.000000e+00> : vector<16x128xf32>
    %68 = tpu.matmul %65, %67, %cst_46 {dimension_numbers = #tpu.dot_dimension_numbers<[1], [0], [0], [1], [0, 0, 1, 1], [], []>} : vector<16x64xbf16>, vector<64x128xbf16>, vector<16x128xf32> -> vector<16x128xf32>
    %69 = arith.addf %64, %68 : vector<16x128xf32>
    %70 = vector.extract_strided_slice %58 {offsets = [32, 0], sizes = [16, 64], strides = [1, 1]} : vector<192x64xbf16> to vector<16x64xbf16>
    %c2_47 = arith.constant 2 : index
    %c0_48 = arith.constant 0 : index
    %c0_49 = arith.constant 0 : index
    %71 = vector.load %arg10[%c2_47, %c0_48, %c0_49] : memref<12x64x128xbf16, #tpu.memory_space<vmem>>, vector<1x64x128xbf16>
    %72 = vector.shape_cast %71 : vector<1x64x128xbf16> to vector<64x128xbf16>
    %cst_50 = arith.constant dense<0.000000e+00> : vector<16x128xf32>
    %73 = tpu.matmul %70, %72, %cst_50 {dimension_numbers = #tpu.dot_dimension_numbers<[1], [0], [0], [1], [0, 0, 1, 1], [], []>} : vector<16x64xbf16>, vector<64x128xbf16>, vector<16x128xf32> -> vector<16x128xf32>
    %74 = arith.addf %69, %73 : vector<16x128xf32>
    %75 = vector.extract_strided_slice %58 {offsets = [48, 0], sizes = [16, 64], strides = [1, 1]} : vector<192x64xbf16> to vector<16x64xbf16>
    %c3 = arith.constant 3 : index
    %c0_51 = arith.constant 0 : index
    %c0_52 = arith.constant 0 : index
    %76 = vector.load %arg10[%c3, %c0_51, %c0_52] : memref<12x64x128xbf16, #tpu.memory_space<vmem>>, vector<1x64x128xbf16>
    %77 = vector.shape_cast %76 : vector<1x64x128xbf16> to vector<64x128xbf16>
    %cst_53 = arith.constant dense<0.000000e+00> : vector<16x128xf32>
    %78 = tpu.matmul %75, %77, %cst_53 {dimension_numbers = #tpu.dot_dimension_numbers<[1], [0], [0], [1], [0, 0, 1, 1], [], []>} : vector<16x64xbf16>, vector<64x128xbf16>, vector<16x128xf32> -> vector<16x128xf32>
    %79 = arith.addf %74, %78 : vector<16x128xf32>
    %80 = vector.extract_strided_slice %58 {offsets = [64, 0], sizes = [16, 64], strides = [1, 1]} : vector<192x64xbf16> to vector<16x64xbf16>
    %c4 = arith.constant 4 : index
    %c0_54 = arith.constant 0 : index
    %c0_55 = arith.constant 0 : index
    %81 = vector.load %arg10[%c4, %c0_54, %c0_55] : memref<12x64x128xbf16, #tpu.memory_space<vmem>>, vector<1x64x128xbf16>
    %82 = vector.shape_cast %81 : vector<1x64x128xbf16> to vector<64x128xbf16>
    %cst_56 = arith.constant dense<0.000000e+00> : vector<16x128xf32>
    %83 = tpu.matmul %80, %82, %cst_56 {dimension_numbers = #tpu.dot_dimension_numbers<[1], [0], [0], [1], [0, 0, 1, 1], [], []>} : vector<16x64xbf16>, vector<64x128xbf16>, vector<16x128xf32> -> vector<16x128xf32>
    %84 = arith.addf %79, %83 : vector<16x128xf32>
    %85 = vector.extract_strided_slice %58 {offsets = [80, 0], sizes = [16, 64], strides = [1, 1]} : vector<192x64xbf16> to vector<16x64xbf16>
    %c5 = arith.constant 5 : index
    %c0_57 = arith.constant 0 : index
    %c0_58 = arith.constant 0 : index
    %86 = vector.load %arg10[%c5, %c0_57, %c0_58] : memref<12x64x128xbf16, #tpu.memory_space<vmem>>, vector<1x64x128xbf16>
    %87 = vector.shape_cast %86 : vector<1x64x128xbf16> to vector<64x128xbf16>
    %cst_59 = arith.constant dense<0.000000e+00> : vector<16x128xf32>
    %88 = tpu.matmul %85, %87, %cst_59 {dimension_numbers = #tpu.dot_dimension_numbers<[1], [0], [0], [1], [0, 0, 1, 1], [], []>} : vector<16x64xbf16>, vector<64x128xbf16>, vector<16x128xf32> -> vector<16x128xf32>
    %89 = arith.addf %84, %88 : vector<16x128xf32>
    %90 = vector.extract_strided_slice %58 {offsets = [96, 0], sizes = [16, 64], strides = [1, 1]} : vector<192x64xbf16> to vector<16x64xbf16>
    %c6 = arith.constant 6 : index
    %c0_60 = arith.constant 0 : index
    %c0_61 = arith.constant 0 : index
    %91 = vector.load %arg10[%c6, %c0_60, %c0_61] : memref<12x64x128xbf16, #tpu.memory_space<vmem>>, vector<1x64x128xbf16>
    %92 = vector.shape_cast %91 : vector<1x64x128xbf16> to vector<64x128xbf16>
    %cst_62 = arith.constant dense<0.000000e+00> : vector<16x128xf32>
    %93 = tpu.matmul %90, %92, %cst_62 {dimension_numbers = #tpu.dot_dimension_numbers<[1], [0], [0], [1], [0, 0, 1, 1], [], []>} : vector<16x64xbf16>, vector<64x128xbf16>, vector<16x128xf32> -> vector<16x128xf32>
    %94 = arith.addf %89, %93 : vector<16x128xf32>
    %95 = vector.extract_strided_slice %58 {offsets = [112, 0], sizes = [16, 64], strides = [1, 1]} : vector<192x64xbf16> to vector<16x64xbf16>
    %c7 = arith.constant 7 : index
    %c0_63 = arith.constant 0 : index
    %c0_64 = arith.constant 0 : index
    %96 = vector.load %arg10[%c7, %c0_63, %c0_64] : memref<12x64x128xbf16, #tpu.memory_space<vmem>>, vector<1x64x128xbf16>
    %97 = vector.shape_cast %96 : vector<1x64x128xbf16> to vector<64x128xbf16>
    %cst_65 = arith.constant dense<0.000000e+00> : vector<16x128xf32>
    %98 = tpu.matmul %95, %97, %cst_65 {dimension_numbers = #tpu.dot_dimension_numbers<[1], [0], [0], [1], [0, 0, 1, 1], [], []>} : vector<16x64xbf16>, vector<64x128xbf16>, vector<16x128xf32> -> vector<16x128xf32>
    %99 = arith.addf %94, %98 : vector<16x128xf32>
    %100 = vector.extract_strided_slice %58 {offsets = [128, 0], sizes = [16, 64], strides = [1, 1]} : vector<192x64xbf16> to vector<16x64xbf16>
    %c8 = arith.constant 8 : index
    %c0_66 = arith.constant 0 : index
    %c0_67 = arith.constant 0 : index
    %101 = vector.load %arg10[%c8, %c0_66, %c0_67] : memref<12x64x128xbf16, #tpu.memory_space<vmem>>, vector<1x64x128xbf16>
    %102 = vector.shape_cast %101 : vector<1x64x128xbf16> to vector<64x128xbf16>
    %cst_68 = arith.constant dense<0.000000e+00> : vector<16x128xf32>
    %103 = tpu.matmul %100, %102, %cst_68 {dimension_numbers = #tpu.dot_dimension_numbers<[1], [0], [0], [1], [0, 0, 1, 1], [], []>} : vector<16x64xbf16>, vector<64x128xbf16>, vector<16x128xf32> -> vector<16x128xf32>
    %104 = arith.addf %99, %103 : vector<16x128xf32>
    %105 = vector.extract_strided_slice %58 {offsets = [144, 0], sizes = [16, 64], strides = [1, 1]} : vector<192x64xbf16> to vector<16x64xbf16>
    %c9 = arith.constant 9 : index
    %c0_69 = arith.constant 0 : index
    %c0_70 = arith.constant 0 : index
    %106 = vector.load %arg10[%c9, %c0_69, %c0_70] : memref<12x64x128xbf16, #tpu.memory_space<vmem>>, vector<1x64x128xbf16>
    %107 = vector.shape_cast %106 : vector<1x64x128xbf16> to vector<64x128xbf16>
    %cst_71 = arith.constant dense<0.000000e+00> : vector<16x128xf32>
    %108 = tpu.matmul %105, %107, %cst_71 {dimension_numbers = #tpu.dot_dimension_numbers<[1], [0], [0], [1], [0, 0, 1, 1], [], []>} : vector<16x64xbf16>, vector<64x128xbf16>, vector<16x128xf32> -> vector<16x128xf32>
    %109 = arith.addf %104, %108 : vector<16x128xf32>
    %110 = vector.extract_strided_slice %58 {offsets = [160, 0], sizes = [16, 64], strides = [1, 1]} : vector<192x64xbf16> to vector<16x64xbf16>
    %c10 = arith.constant 10 : index
    %c0_72 = arith.constant 0 : index
    %c0_73 = arith.constant 0 : index
    %111 = vector.load %arg10[%c10, %c0_72, %c0_73] : memref<12x64x128xbf16, #tpu.memory_space<vmem>>, vector<1x64x128xbf16>
    %112 = vector.shape_cast %111 : vector<1x64x128xbf16> to vector<64x128xbf16>
    %cst_74 = arith.constant dense<0.000000e+00> : vector<16x128xf32>
    %113 = tpu.matmul %110, %112, %cst_74 {dimension_numbers = #tpu.dot_dimension_numbers<[1], [0], [0], [1], [0, 0, 1, 1], [], []>} : vector<16x64xbf16>, vector<64x128xbf16>, vector<16x128xf32> -> vector<16x128xf32>
    %114 = arith.addf %109, %113 : vector<16x128xf32>
    %115 = vector.extract_strided_slice %58 {offsets = [176, 0], sizes = [16, 64], strides = [1, 1]} : vector<192x64xbf16> to vector<16x64xbf16>
    %c11 = arith.constant 11 : index
    %c0_75 = arith.constant 0 : index
    %c0_76 = arith.constant 0 : index
    %116 = vector.load %arg10[%c11, %c0_75, %c0_76] : memref<12x64x128xbf16, #tpu.memory_space<vmem>>, vector<1x64x128xbf16>
    %117 = vector.shape_cast %116 : vector<1x64x128xbf16> to vector<64x128xbf16>
    %cst_77 = arith.constant dense<0.000000e+00> : vector<16x128xf32>
    %118 = tpu.matmul %115, %117, %cst_77 {dimension_numbers = #tpu.dot_dimension_numbers<[1], [0], [0], [1], [0, 0, 1, 1], [], []>} : vector<16x64xbf16>, vector<64x128xbf16>, vector<16x128xf32> -> vector<16x128xf32>
    %119 = arith.addf %114, %118 : vector<16x128xf32>
    %c0_78 = arith.constant 0 : index
    %c0_79 = arith.constant 0 : index
    %120 = vector.load %arg11[%c0_78, %c0_79] : memref<1x128xf32, #tpu.memory_space<vmem>>, vector<1x128xf32>
    %121 = vector.broadcast %120 : vector<1x128xf32> to vector<16x128xf32>
    %122 = arith.addf %119, %121 : vector<16x128xf32>
    %cst_80 = arith.constant 0.000000e+00 : f32
    %123 = vector.broadcast %cst_80 : f32 to vector<16x128xf32>
    %124 = arith.cmpf ogt, %122, %123 : vector<16x128xf32>
    %cst_81 = arith.constant 0.00999999977 : f32
    %125 = vector.broadcast %cst_81 : f32 to vector<16x128xf32>
    %126 = arith.mulf %125, %122 : vector<16x128xf32>
    %127 = arith.select %124, %122, %126 : vector<16x128xi1>, vector<16x128xf32>
    %c0_82 = arith.constant 0 : index
    %c0_83 = arith.constant 0 : index
    %128 = vector.load %arg12[%c0_82, %c0_83] : memref<1x128xf32, #tpu.memory_space<vmem>>, vector<1x128xf32>
    %129 = vector.broadcast %128 : vector<1x128xf32> to vector<16x128xf32>
    %130 = arith.mulf %127, %129 : vector<16x128xf32>
    %c0_84 = arith.constant 0 : index
    %c0_85 = arith.constant 0 : index
    %131 = vector.load %arg13[%c0_84, %c0_85] : memref<1x128xf32, #tpu.memory_space<vmem>>, vector<1x128xf32>
    %132 = vector.broadcast %131 : vector<1x128xf32> to vector<16x128xf32>
    %133 = arith.addf %130, %132 : vector<16x128xf32>
    %134 = arith.truncf %133 : vector<16x128xf32> to vector<16x128xbf16>
    %c0_86 = arith.constant 0 : index
    %c0_87 = arith.constant 0 : index
    %135 = vector.load %arg14[%c0_86, %c0_87] : memref<16x2xf32, #tpu.memory_space<vmem>>, vector<16x2xf32>
    %c0_88 = arith.constant 0 : index
    %c0_89 = arith.constant 0 : index
    %136 = vector.load %arg1[%c0_88, %c0_89] : memref<2x8xf32, #tpu.memory_space<vmem>>, vector<2x8xf32>
    %cst_90 = arith.constant dense<0.000000e+00> : vector<16x8xf32>
    %137 = tpu.matmul %135, %136, %cst_90 {dimension_numbers = #tpu.dot_dimension_numbers<[1], [0], [0], [1], [0, 0, 1, 1], [], []>} : vector<16x2xf32>, vector<2x8xf32>, vector<16x8xf32> -> vector<16x8xf32>
    %c0_91 = arith.constant 0 : index
    %c0_92 = arith.constant 0 : index
    %138 = vector.load %arg15[%c0_91, %c0_92] : memref<16x8xf32, #tpu.memory_space<vmem>>, vector<16x8xf32>
    %139 = arith.mulf %137, %138 : vector<16x8xf32>
    %cst_93 = arith.constant dense<0.000000e+00> : vector<16xf32>
    %140 = vector.multi_reduction <add>, %139, %cst_93 [1] : vector<16x8xf32> to vector<16xf32>
    %141 = vector.shape_cast %140 : vector<16xf32> to vector<16x1xf32>
    %c0_94 = arith.constant 0 : index
    %c0_95 = arith.constant 0 : index
    %142 = vector.load %arg16[%c0_94, %c0_95] : memref<16x1xf32, #tpu.memory_space<vmem>>, vector<16x1xf32>
    %143 = arith.addf %141, %142 : vector<16x1xf32>
    %c0_96 = arith.constant 0 : index
    %c0_97 = arith.constant 0 : index
    %144 = vector.load %arg17[%c0_96, %c0_97] : memref<128x64xbf16, #tpu.memory_space<vmem>>, vector<128x64xbf16>
    %cst_98 = arith.constant dense<0.000000e+00> : vector<16x64xf32>
    %145 = tpu.matmul %134, %144, %cst_98 {dimension_numbers = #tpu.dot_dimension_numbers<[1], [0], [0], [1], [0, 0, 1, 1], [], []>} : vector<16x128xbf16>, vector<128x64xbf16>, vector<16x64xf32> -> vector<16x64xf32>
    %c0_99 = arith.constant 0 : index
    %c0_100 = arith.constant 0 : index
    %146 = vector.load %arg18[%c0_99, %c0_100] : memref<1x64xf32, #tpu.memory_space<vmem>>, vector<1x64xf32>
    %147 = vector.broadcast %143 : vector<16x1xf32> to vector<16x64xf32>
    %148 = vector.broadcast %146 : vector<1x64xf32> to vector<16x64xf32>
    %149 = arith.mulf %147, %148 : vector<16x64xf32>
    %150 = arith.addf %145, %149 : vector<16x64xf32>
    %c0_101 = arith.constant 0 : index
    %c0_102 = arith.constant 0 : index
    %151 = vector.load %arg19[%c0_101, %c0_102] : memref<1x64xf32, #tpu.memory_space<vmem>>, vector<1x64xf32>
    %152 = vector.broadcast %151 : vector<1x64xf32> to vector<16x64xf32>
    %153 = arith.addf %150, %152 : vector<16x64xf32>
    %cst_103 = arith.constant 0.000000e+00 : f32
    %154 = vector.broadcast %cst_103 : f32 to vector<16x64xf32>
    %155 = arith.cmpf ogt, %153, %154 : vector<16x64xf32>
    %cst_104 = arith.constant 0.00999999977 : f32
    %156 = vector.broadcast %cst_104 : f32 to vector<16x64xf32>
    %157 = arith.mulf %156, %153 : vector<16x64xf32>
    %158 = arith.select %155, %153, %157 : vector<16x64xi1>, vector<16x64xf32>
    %c0_105 = arith.constant 0 : index
    %c0_106 = arith.constant 0 : index
    %159 = vector.load %arg20[%c0_105, %c0_106] : memref<1x64xf32, #tpu.memory_space<vmem>>, vector<1x64xf32>
    %160 = vector.broadcast %159 : vector<1x64xf32> to vector<16x64xf32>
    %161 = arith.mulf %158, %160 : vector<16x64xf32>
    %c0_107 = arith.constant 0 : index
    %c0_108 = arith.constant 0 : index
    %162 = vector.load %arg21[%c0_107, %c0_108] : memref<1x64xf32, #tpu.memory_space<vmem>>, vector<1x64xf32>
    %163 = vector.broadcast %162 : vector<1x64xf32> to vector<16x64xf32>
    %164 = arith.addf %161, %163 : vector<16x64xf32>
    %165 = arith.truncf %164 : vector<16x64xf32> to vector<16x64xbf16>
    %cst_109 = arith.constant 0.000000e+00 : f32
    %166 = vector.broadcast %cst_109 : f32 to vector<2x256xf32>
    %c0_110 = arith.constant 0 : index
    %c0_111 = arith.constant 0 : index
    %c0_112 = arith.constant 0 : index
    %167 = vector.load %arg22[%c0_110, %c0_111, %c0_112] : memref<8x2x16xbf16, #tpu.memory_space<vmem>>, vector<1x2x16xbf16>
    %168 = vector.shape_cast %167 : vector<1x2x16xbf16> to vector<2x16xbf16>
    %cst_113 = arith.constant dense<0.000000e+00> : vector<2x64xf32>
    %169 = tpu.matmul %168, %165, %cst_113 {dimension_numbers = #tpu.dot_dimension_numbers<[1], [0], [0], [1], [0, 0, 1, 1], [], []>} : vector<2x16xbf16>, vector<16x64xbf16>, vector<2x64xf32> -> vector<2x64xf32>
    %170 = arith.truncf %169 : vector<2x64xf32> to vector<2x64xbf16>
    %c0_114 = arith.constant 0 : index
    %c0_115 = arith.constant 0 : index
    %c0_116 = arith.constant 0 : index
    %171 = vector.load %arg23[%c0_114, %c0_115, %c0_116] : memref<8x64x256xbf16, #tpu.memory_space<vmem>>, vector<1x64x256xbf16>
    %172 = vector.shape_cast %171 : vector<1x64x256xbf16> to vector<64x256xbf16>
    %cst_117 = arith.constant dense<0.000000e+00> : vector<2x256xf32>
    %173 = tpu.matmul %170, %172, %cst_117 {dimension_numbers = #tpu.dot_dimension_numbers<[1], [0], [0], [1], [0, 0, 1, 1], [], []>} : vector<2x64xbf16>, vector<64x256xbf16>, vector<2x256xf32> -> vector<2x256xf32>
    %174 = arith.addf %166, %173 : vector<2x256xf32>
    %c1_118 = arith.constant 1 : index
    %c0_119 = arith.constant 0 : index
    %c0_120 = arith.constant 0 : index
    %175 = vector.load %arg22[%c1_118, %c0_119, %c0_120] : memref<8x2x16xbf16, #tpu.memory_space<vmem>>, vector<1x2x16xbf16>
    %176 = vector.shape_cast %175 : vector<1x2x16xbf16> to vector<2x16xbf16>
    %cst_121 = arith.constant dense<0.000000e+00> : vector<2x64xf32>
    %177 = tpu.matmul %176, %165, %cst_121 {dimension_numbers = #tpu.dot_dimension_numbers<[1], [0], [0], [1], [0, 0, 1, 1], [], []>} : vector<2x16xbf16>, vector<16x64xbf16>, vector<2x64xf32> -> vector<2x64xf32>
    %178 = arith.truncf %177 : vector<2x64xf32> to vector<2x64xbf16>
    %c1_122 = arith.constant 1 : index
    %c0_123 = arith.constant 0 : index
    %c0_124 = arith.constant 0 : index
    %179 = vector.load %arg23[%c1_122, %c0_123, %c0_124] : memref<8x64x256xbf16, #tpu.memory_space<vmem>>, vector<1x64x256xbf16>
    %180 = vector.shape_cast %179 : vector<1x64x256xbf16> to vector<64x256xbf16>
    %cst_125 = arith.constant dense<0.000000e+00> : vector<2x256xf32>
    %181 = tpu.matmul %178, %180, %cst_125 {dimension_numbers = #tpu.dot_dimension_numbers<[1], [0], [0], [1], [0, 0, 1, 1], [], []>} : vector<2x64xbf16>, vector<64x256xbf16>, vector<2x256xf32> -> vector<2x256xf32>
    %182 = arith.addf %174, %181 : vector<2x256xf32>
    %c2_126 = arith.constant 2 : index
    %c0_127 = arith.constant 0 : index
    %c0_128 = arith.constant 0 : index
    %183 = vector.load %arg22[%c2_126, %c0_127, %c0_128] : memref<8x2x16xbf16, #tpu.memory_space<vmem>>, vector<1x2x16xbf16>
    %184 = vector.shape_cast %183 : vector<1x2x16xbf16> to vector<2x16xbf16>
    %cst_129 = arith.constant dense<0.000000e+00> : vector<2x64xf32>
    %185 = tpu.matmul %184, %165, %cst_129 {dimension_numbers = #tpu.dot_dimension_numbers<[1], [0], [0], [1], [0, 0, 1, 1], [], []>} : vector<2x16xbf16>, vector<16x64xbf16>, vector<2x64xf32> -> vector<2x64xf32>
    %186 = arith.truncf %185 : vector<2x64xf32> to vector<2x64xbf16>
    %c2_130 = arith.constant 2 : index
    %c0_131 = arith.constant 0 : index
    %c0_132 = arith.constant 0 : index
    %187 = vector.load %arg23[%c2_130, %c0_131, %c0_132] : memref<8x64x256xbf16, #tpu.memory_space<vmem>>, vector<1x64x256xbf16>
    %188 = vector.shape_cast %187 : vector<1x64x256xbf16> to vector<64x256xbf16>
    %cst_133 = arith.constant dense<0.000000e+00> : vector<2x256xf32>
    %189 = tpu.matmul %186, %188, %cst_133 {dimension_numbers = #tpu.dot_dimension_numbers<[1], [0], [0], [1], [0, 0, 1, 1], [], []>} : vector<2x64xbf16>, vector<64x256xbf16>, vector<2x256xf32> -> vector<2x256xf32>
    %190 = arith.addf %182, %189 : vector<2x256xf32>
    %c3_134 = arith.constant 3 : index
    %c0_135 = arith.constant 0 : index
    %c0_136 = arith.constant 0 : index
    %191 = vector.load %arg22[%c3_134, %c0_135, %c0_136] : memref<8x2x16xbf16, #tpu.memory_space<vmem>>, vector<1x2x16xbf16>
    %192 = vector.shape_cast %191 : vector<1x2x16xbf16> to vector<2x16xbf16>
    %cst_137 = arith.constant dense<0.000000e+00> : vector<2x64xf32>
    %193 = tpu.matmul %192, %165, %cst_137 {dimension_numbers = #tpu.dot_dimension_numbers<[1], [0], [0], [1], [0, 0, 1, 1], [], []>} : vector<2x16xbf16>, vector<16x64xbf16>, vector<2x64xf32> -> vector<2x64xf32>
    %194 = arith.truncf %193 : vector<2x64xf32> to vector<2x64xbf16>
    %c3_138 = arith.constant 3 : index
    %c0_139 = arith.constant 0 : index
    %c0_140 = arith.constant 0 : index
    %195 = vector.load %arg23[%c3_138, %c0_139, %c0_140] : memref<8x64x256xbf16, #tpu.memory_space<vmem>>, vector<1x64x256xbf16>
    %196 = vector.shape_cast %195 : vector<1x64x256xbf16> to vector<64x256xbf16>
    %cst_141 = arith.constant dense<0.000000e+00> : vector<2x256xf32>
    %197 = tpu.matmul %194, %196, %cst_141 {dimension_numbers = #tpu.dot_dimension_numbers<[1], [0], [0], [1], [0, 0, 1, 1], [], []>} : vector<2x64xbf16>, vector<64x256xbf16>, vector<2x256xf32> -> vector<2x256xf32>
    %198 = arith.addf %190, %197 : vector<2x256xf32>
    %c4_142 = arith.constant 4 : index
    %c0_143 = arith.constant 0 : index
    %c0_144 = arith.constant 0 : index
    %199 = vector.load %arg22[%c4_142, %c0_143, %c0_144] : memref<8x2x16xbf16, #tpu.memory_space<vmem>>, vector<1x2x16xbf16>
    %200 = vector.shape_cast %199 : vector<1x2x16xbf16> to vector<2x16xbf16>
    %cst_145 = arith.constant dense<0.000000e+00> : vector<2x64xf32>
    %201 = tpu.matmul %200, %165, %cst_145 {dimension_numbers = #tpu.dot_dimension_numbers<[1], [0], [0], [1], [0, 0, 1, 1], [], []>} : vector<2x16xbf16>, vector<16x64xbf16>, vector<2x64xf32> -> vector<2x64xf32>
    %202 = arith.truncf %201 : vector<2x64xf32> to vector<2x64xbf16>
    %c4_146 = arith.constant 4 : index
    %c0_147 = arith.constant 0 : index
    %c0_148 = arith.constant 0 : index
    %203 = vector.load %arg23[%c4_146, %c0_147, %c0_148] : memref<8x64x256xbf16, #tpu.memory_space<vmem>>, vector<1x64x256xbf16>
    %204 = vector.shape_cast %203 : vector<1x64x256xbf16> to vector<64x256xbf16>
    %cst_149 = arith.constant dense<0.000000e+00> : vector<2x256xf32>
    %205 = tpu.matmul %202, %204, %cst_149 {dimension_numbers = #tpu.dot_dimension_numbers<[1], [0], [0], [1], [0, 0, 1, 1], [], []>} : vector<2x64xbf16>, vector<64x256xbf16>, vector<2x256xf32> -> vector<2x256xf32>
    %206 = arith.addf %198, %205 : vector<2x256xf32>
    %c5_150 = arith.constant 5 : index
    %c0_151 = arith.constant 0 : index
    %c0_152 = arith.constant 0 : index
    %207 = vector.load %arg22[%c5_150, %c0_151, %c0_152] : memref<8x2x16xbf16, #tpu.memory_space<vmem>>, vector<1x2x16xbf16>
    %208 = vector.shape_cast %207 : vector<1x2x16xbf16> to vector<2x16xbf16>
    %cst_153 = arith.constant dense<0.000000e+00> : vector<2x64xf32>
    %209 = tpu.matmul %208, %165, %cst_153 {dimension_numbers = #tpu.dot_dimension_numbers<[1], [0], [0], [1], [0, 0, 1, 1], [], []>} : vector<2x16xbf16>, vector<16x64xbf16>, vector<2x64xf32> -> vector<2x64xf32>
    %210 = arith.truncf %209 : vector<2x64xf32> to vector<2x64xbf16>
    %c5_154 = arith.constant 5 : index
    %c0_155 = arith.constant 0 : index
    %c0_156 = arith.constant 0 : index
    %211 = vector.load %arg23[%c5_154, %c0_155, %c0_156] : memref<8x64x256xbf16, #tpu.memory_space<vmem>>, vector<1x64x256xbf16>
    %212 = vector.shape_cast %211 : vector<1x64x256xbf16> to vector<64x256xbf16>
    %cst_157 = arith.constant dense<0.000000e+00> : vector<2x256xf32>
    %213 = tpu.matmul %210, %212, %cst_157 {dimension_numbers = #tpu.dot_dimension_numbers<[1], [0], [0], [1], [0, 0, 1, 1], [], []>} : vector<2x64xbf16>, vector<64x256xbf16>, vector<2x256xf32> -> vector<2x256xf32>
    %214 = arith.addf %206, %213 : vector<2x256xf32>
    %c6_158 = arith.constant 6 : index
    %c0_159 = arith.constant 0 : index
    %c0_160 = arith.constant 0 : index
    %215 = vector.load %arg22[%c6_158, %c0_159, %c0_160] : memref<8x2x16xbf16, #tpu.memory_space<vmem>>, vector<1x2x16xbf16>
    %216 = vector.shape_cast %215 : vector<1x2x16xbf16> to vector<2x16xbf16>
    %cst_161 = arith.constant dense<0.000000e+00> : vector<2x64xf32>
    %217 = tpu.matmul %216, %165, %cst_161 {dimension_numbers = #tpu.dot_dimension_numbers<[1], [0], [0], [1], [0, 0, 1, 1], [], []>} : vector<2x16xbf16>, vector<16x64xbf16>, vector<2x64xf32> -> vector<2x64xf32>
    %218 = arith.truncf %217 : vector<2x64xf32> to vector<2x64xbf16>
    %c6_162 = arith.constant 6 : index
    %c0_163 = arith.constant 0 : index
    %c0_164 = arith.constant 0 : index
    %219 = vector.load %arg23[%c6_162, %c0_163, %c0_164] : memref<8x64x256xbf16, #tpu.memory_space<vmem>>, vector<1x64x256xbf16>
    %220 = vector.shape_cast %219 : vector<1x64x256xbf16> to vector<64x256xbf16>
    %cst_165 = arith.constant dense<0.000000e+00> : vector<2x256xf32>
    %221 = tpu.matmul %218, %220, %cst_165 {dimension_numbers = #tpu.dot_dimension_numbers<[1], [0], [0], [1], [0, 0, 1, 1], [], []>} : vector<2x64xbf16>, vector<64x256xbf16>, vector<2x256xf32> -> vector<2x256xf32>
    %222 = arith.addf %214, %221 : vector<2x256xf32>
    %c7_166 = arith.constant 7 : index
    %c0_167 = arith.constant 0 : index
    %c0_168 = arith.constant 0 : index
    %223 = vector.load %arg22[%c7_166, %c0_167, %c0_168] : memref<8x2x16xbf16, #tpu.memory_space<vmem>>, vector<1x2x16xbf16>
    %224 = vector.shape_cast %223 : vector<1x2x16xbf16> to vector<2x16xbf16>
    %cst_169 = arith.constant dense<0.000000e+00> : vector<2x64xf32>
    %225 = tpu.matmul %224, %165, %cst_169 {dimension_numbers = #tpu.dot_dimension_numbers<[1], [0], [0], [1], [0, 0, 1, 1], [], []>} : vector<2x16xbf16>, vector<16x64xbf16>, vector<2x64xf32> -> vector<2x64xf32>
    %226 = arith.truncf %225 : vector<2x64xf32> to vector<2x64xbf16>
    %c7_170 = arith.constant 7 : index
    %c0_171 = arith.constant 0 : index
    %c0_172 = arith.constant 0 : index
    %227 = vector.load %arg23[%c7_170, %c0_171, %c0_172] : memref<8x64x256xbf16, #tpu.memory_space<vmem>>, vector<1x64x256xbf16>
    %228 = vector.shape_cast %227 : vector<1x64x256xbf16> to vector<64x256xbf16>
    %cst_173 = arith.constant dense<0.000000e+00> : vector<2x256xf32>
    %229 = tpu.matmul %226, %228, %cst_173 {dimension_numbers = #tpu.dot_dimension_numbers<[1], [0], [0], [1], [0, 0, 1, 1], [], []>} : vector<2x64xbf16>, vector<64x256xbf16>, vector<2x256xf32> -> vector<2x256xf32>
    %230 = arith.addf %222, %229 : vector<2x256xf32>
    %c0_174 = arith.constant 0 : index
    %c0_175 = arith.constant 0 : index
    %231 = vector.load %arg24[%c0_174, %c0_175] : memref<1x256xf32, #tpu.memory_space<vmem>>, vector<1x256xf32>
    %232 = vector.broadcast %231 : vector<1x256xf32> to vector<2x256xf32>
    %233 = arith.addf %230, %232 : vector<2x256xf32>
    %cst_176 = arith.constant 0.000000e+00 : f32
    %234 = vector.broadcast %cst_176 : f32 to vector<2x256xf32>
    %235 = arith.cmpf ogt, %233, %234 : vector<2x256xf32>
    %cst_177 = arith.constant 0.00999999977 : f32
    %236 = vector.broadcast %cst_177 : f32 to vector<2x256xf32>
    %237 = arith.mulf %236, %233 : vector<2x256xf32>
    %238 = arith.select %235, %233, %237 : vector<2x256xi1>, vector<2x256xf32>
    %239 = arith.truncf %238 : vector<2x256xf32> to vector<2x256xbf16>
    %c0_178 = arith.constant 0 : index
    %c0_179 = arith.constant 0 : index
    %240 = vector.load %arg25[%c0_178, %c0_179] : memref<256x128xbf16, #tpu.memory_space<vmem>>, vector<256x128xbf16>
    %cst_180 = arith.constant dense<0.000000e+00> : vector<2x128xf32>
    %241 = tpu.matmul %239, %240, %cst_180 {dimension_numbers = #tpu.dot_dimension_numbers<[1], [0], [0], [1], [0, 0, 1, 1], [], []>} : vector<2x256xbf16>, vector<256x128xbf16>, vector<2x128xf32> -> vector<2x128xf32>
    %c0_181 = arith.constant 0 : index
    %c0_182 = arith.constant 0 : index
    %242 = vector.load %arg26[%c0_181, %c0_182] : memref<1x128xf32, #tpu.memory_space<vmem>>, vector<1x128xf32>
    %243 = vector.broadcast %242 : vector<1x128xf32> to vector<2x128xf32>
    %244 = arith.addf %241, %243 : vector<2x128xf32>
    %c0_183 = arith.constant 0 : index
    %c0_184 = arith.constant 0 : index
    %245 = vector.load %arg27[%c0_183, %c0_184] : memref<2x128xf32, #tpu.memory_space<vmem>>, vector<2x128xf32>
    tpu.vector_store %arg27[%c0_183, %c0_184], %244 {strides = array<i32>} : memref<2x128xf32, #tpu.memory_space<vmem>>, vector<2x128xf32>,
    return
  }
}

</mosaic_0001>

<bundles_post_ra>
// kernel: forward.1
= control target key start
LH: loop header
LB: loop body
LE: loop exit
PB: predicated region body
PF: predicated region fallthrough
CT: control target
= control target key end

     0   :  { %s5096_s0 = inlined_call_operand.vmem [shape: bf16[256,4], index: 0, kind: input, shape index: {}]   ;;  %s5097_s1 = inlined_call_operand.vmem [shape: f32[2,8], index: 1, kind: input, shape index: {}]   ;;  %s5098_s2 = inlined_call_operand.vmem [shape: bf16[3,4,32], index: 2, kind: input, shape index: {}]   ;;  %s5099_s3 = inlined_call_operand.vmem [shape: f32[1,32], index: 3, kind: input, shape index: {}]   ;;  %s5100_s4 = inlined_call_operand.vmem [shape: f32[1,32], index: 4, kind: input, shape index: {}]   ;;  %s5101_s5 = inlined_call_operand.vmem [shape: f32[1,32], index: 5, kind: input, shape index: {}]   ;;  %s5102_s6 = inlined_call_operand.vmem [shape: bf16[3,32,64], index: 6, kind: input, shape index: {}]   ;;  %s5103_s7 = inlined_call_operand.vmem [shape: f32[1,64], index: 7, kind: input, shape index: {}]   ;;  %s5104_s8 = inlined_call_operand.vmem [shape: f32[1,64], index: 8, kind: input, shape index: {}]   ;;  %s5105_s9 = inlined_call_operand.vmem [shape: f32[1,64], index: 9, kind: input, shape index: {}]   ;;  %s5106_s10 = inlined_call_operand.hbm [shape: bf16[12,64,128], index: 10, kind: input, shape index: {}]   ;;  %s5107_s11 = inlined_call_operand.vmem [shape: f32[1,128], index: 11, kind: input, shape index: {}]   ;;  %s5108_s12 = inlined_call_operand.vmem [shape: f32[1,128], index: 12, kind: input, shape index: {}]   ;;  %s5109_s13 = inlined_call_operand.vmem [shape: f32[1,128], index: 13, kind: input, shape index: {}]   ;;  %s5110_s14 = inlined_call_operand.vmem [shape: f32[16,2], index: 14, kind: input, shape index: {}]   ;;  %s5111_s15 = inlined_call_operand.vmem [shape: f32[16,8], index: 15, kind: input, shape index: {}]   ;;  %s5112_s16 = inlined_call_operand.vmem [shape: f32[16,1], index: 16, kind: input, shape index: {}]   ;;  %s5113_s17 = inlined_call_operand.vmem [shape: bf16[128,64], index: 17, kind: input, shape index: {}]   ;;  %s5114_s18 = inlined_call_operand.vmem [shape: f32[1,64], index: 18, kind: input, shape index: {}]   ;;  %s5115_s19 = inlined_call_operand.vmem [shape: f32[1,64], index: 19, kind: input, shape index: {}]   ;;  %s5116_s20 = inlined_call_operand.vmem [shape: f32[1,64], index: 20, kind: input, shape index: {}]   ;;  %s5117_s21 = inlined_call_operand.vmem [shape: f32[1,64], index: 21, kind: input, shape index: {}]   ;;  %s5118_s22 = inlined_call_operand.vmem [shape: bf16[8,2,16], index: 22, kind: input, shape index: {}]   ;;  %s5119_s23 = inlined_call_operand.hbm [shape: bf16[8,64,256], index: 23, kind: input, shape index: {}]   ;;  %s5120_s24 = inlined_call_operand.vmem [shape: f32[1,256], index: 24, kind: input, shape index: {}]   ;;  %s5121_s25 = inlined_call_operand.vmem [shape: bf16[256,128], index: 25, kind: input, shape index: {}]   ;;  %s5122_s26 = inlined_call_operand.vmem [shape: f32[1,128], index: 26, kind: input, shape index: {}]   ;;  %s5123_s27 = inlined_call_operand.vmem [shape: f32[2,128], index: 27, kind: output, shape index: {}]  }
   0x1   :  { %5127 = sst [smem:[#allocation8_spill]] %s5096_s0 }
   0x2   :  { %5128 = sst [smem:[#allocation9_spill]] %s5097_s1 }
   0x3   :  { %5129 = sst [smem:[#allocation10_spill]] %s5098_s2 }
   0x4   :  { %5130 = sst [smem:[#allocation11_spill]] %s5099_s3 }
   0x5   :  { %5131 = sst [smem:[#allocation12_spill]] %s5100_s4 }
   0x6   :  { %5132 = sst [smem:[#allocation13_spill]] %s5101_s5 }
   0x7   :  { %5133 = sst [smem:[#allocation14_spill]] %s5102_s6 }
   0x8   :  { %5134 = sst [smem:[#allocation15_spill]] %s5103_s7 }
   0x9   :  { %5135 = sst [smem:[#allocation16_spill]] %s5104_s8 }
   0xa   :  { %5136 = sst [smem:[#allocation17_spill]] %s5105_s9 }
   0xb   :  { %5137 = sst [smem:[#allocation18_spill]] %s5106_s10 }
   0xc   :  { %5138 = sst [smem:[#allocation19_spill]] %s5107_s11 }
   0xd   :  { %32 = vsyncpa [#allocation3], 0  ;;  %s5139_s8 = sld [smem:[#allocation18_spill]] }
  0x13   :  { %s58_s30 = sshll.u32 %s5139_s8, 4  ;;  %s59_s30 = int_to_ptr.hbm [resolvable:$true] %s58_s30 }
  0x14   :  { %33 = vsyncpa [#allocation5], 0  ;;  %s4200_s9 = smov [#allocation2]   ;;  %s95_s10 = sshll.u32 %s5119_s23, 4  ;;  %s96_s10 = int_to_ptr.hbm [resolvable:$true] %s95_s10 }
  0x15   :  { %s60_s5 = sshll.u32 %s4200_s9, 4  ;;  %s4201_s29 = smov 64   ;;  %s61_s5 = int_to_ptr.vmem [resolvable:$true] %s60_s5 }
  0x16   :  { %s4202_s1 = smov 4   ;;  %s4203_s6 = smov [#allocation4]  }
  0x17   :  { %66 = dma.hbm_to_vmem [thread:$0]  %s59_s30, 6144, %s61_s5, [#allocation3], %s4201_s29, %s4201_s29, %s4202_s1  }
  0x18   :  { %s97_s11 = sshll.u32 %s4203_s6, 4  ;;  %s4204_s2 = smov 128   ;;  %s98_s11 = int_to_ptr.vmem [resolvable:$true] %s97_s11 }
  0x19   :  { %s4205_s3 = smov 8  }
  0x1a   :  { %103 = dma.hbm_to_vmem [thread:$0]  %s96_s10, 8192, %s98_s11, [#allocation5], %s4204_s2, %s4204_s2, %s4205_s3  }
  0x1b   :  { %4196 = dma.done.wait [#allocation3], 6144  }
  0x1c   :  { %4197 = vsyncadd [#allocation3], 4294961152 }
  0x1d   :  { %4198 = dma.done.wait [#allocation5], 8192  }
  0x1e   :  { %4199 = vsyncadd [#allocation5], 4294959104  ;;  %vm281_vm0 = vcmask 1041408   ;;  %s5140_s8 = sld [smem:[#allocation10_spill]]  ;;  %vm232_vm1 = vcmask 31744   ;;  %vm816_vm4 = vcmask 261120  }
  0x1f   :  { %s5141_s28 = sld [smem:[#allocation8_spill]] }
  0x20   :  { %s5142_s11 = sld [smem:[#allocation14_spill]] }
  0x21   :  { %s5143_s10 = sld [smem:[#allocation11_spill]] }
  0x22   :  { %s5144_s4 = sld [smem:[#allocation12_spill]] }
  0x23   :  { %s5145_s9 = sld [smem:[#allocation13_spill]] }
  0x24   :  { %v151_v0 = vld [vmem:[%s5140_s8] sm:$0x3]  ;;  %v3286_v1 = vld [vmem:[%s5140_s8 + $0x4] sm:$0x3]  ;;  %v3269_v5 = vld [vmem:[%s5140_s8 + $0x2] sm:$0x3] }
  0x25   :  { %v283_v2 = vsel %vm281_vm0, %v151_v0, 0  ;;  %v463_v3 = vsel %vm281_vm0, %v3286_v1, 0  ;;  %v3967_v4 = vld [vmem:[%s5141_s28] sm:$0xff]  ;;  %v373_v6 = vsel %vm281_vm0, %v3269_v5, 0  ;;  %v3968_v7 = vld [vmem:[%s5141_s28 + $0x8] sm:$0xff]  ;;  %v3969_v8 = vld [vmem:[%s5141_s28 + $0x10] sm:$0xff] }
  0x26   :  { %292 = vmatpush.bf16.msra.mxu0 %v283_v2  ;;  %472 = vmatpush.bf16.msra.mxu2 %v463_v3  ;;  %v3970_v9 = vld [vmem:[%s5141_s28 + $0x18] sm:$0xff]  ;;  %v3971_v10 = vld [vmem:[%s5141_s28 + $0x20] sm:$0xff]  ;;  %v3972_v11 = vld [vmem:[%s5141_s28 + $0x28] sm:$0xff]  ;;  %s5146_s23 = sld [smem:[#allocation15_spill]] }
  0x27   :  { %382 = vmatpush.bf16.msra.mxu1 %v373_v6  ;;  %v3973_v12 = vld [vmem:[%s5141_s28 + $0x30] sm:$0xff]  ;;  %v3974_v13 = vld [vmem:[%s5141_s28 + $0x38] sm:$0xff]  ;;  %v3975_v14 = vld [vmem:[%s5141_s28 + $0x40] sm:$0xff]  ;;  %s5147_s5 = sld [smem:[#allocation16_spill]] }
  0x28   :  { %v3988_v16 = vld [vmem:[%s5142_s11 + $0x28] sm:$0xff]  ;;  %v3983_v27 = vld [vmem:[%s5142_s11] sm:$0xff]  ;;  %v3977_v31 = vld [vmem:[%s5141_s28 + $0x50] sm:$0xff]  ;;  %s5148_s29 = sld [smem:[#allocation17_spill]] }
  0x29   :  { %3253 = vmatmul.msk.bf16.vlgmr.msra.gmra.mxu0 %vm232_vm1, %v3967_v4  ;;  %3287 = vmatmul.msk.bf16.vlgmr.msra.gmra.mxu2 %vm232_vm1, %v3967_v4  ;;  %v3976_v22 = vld [vmem:[%s5141_s28 + $0x48] sm:$0xff]  ;;  %v4443_v35 = vld [vmem:[%s5143_s10] ss:$0 sm:$0xff]  ;;  %v3986_v43 = vld [vmem:[%s5142_s11 + $0x18] sm:$0xff]  ;;  %s5149_s2 = sld [smem:[#allocation9_spill]] }
  0x2a   :  { %3270 = vmatmul.msk.bf16.vlgmr.msra.gmra.mxu1 %vm232_vm1, %v3967_v4  ;;  %1049 = vmatpush.bf16.msrb.mxu0 %v3988_v16  ;;  %v3984_v25 = vld [vmem:[%s5142_s11 + $0x8] sm:$0xff]  ;;  %v3978_v46 = vld [vmem:[%s5141_s28 + $0x58] sm:$0xff]  ;;  %v4459_v48 = vld [vmem:[%s5144_s4] ss:$0 sm:$0xff] }
  0x2b   :  { %865 = vmatpush.bf16.msra.mxu3 %v3984_v25  ;;  %v4468_v55 = vld [vmem:[%s5145_s9] ss:$0 sm:$0xff] }
  0x2c   :  { %v3979_v6 = vld [vmem:[%s5141_s28 + $0x60] sm:$0xff] }
  0x2f   :  { %866 = vmatpush.bf16.msra.mxu3 %v3983_v27 }
  0x33   :  { %957 = vmatpush.bf16.msrb.mxu3 %v3986_v43 }
  0x39   :  { %3254 = vmatmul.msk.bf16.gmra.mxu0 %vm232_vm1, %v3968_v7  ;;  %3288 = vmatmul.msk.bf16.gmra.mxu2 %vm232_vm1, %v3968_v7 }
  0x3a   :  { %3271 = vmatmul.msk.bf16.gmra.mxu1 %vm232_vm1, %v3968_v7 }
  0x49   :  { %3255 = vmatmul.msk.bf16.gmra.mxu0 %vm232_vm1, %v3969_v8  ;;  %3289 = vmatmul.msk.bf16.gmra.mxu2 %vm232_vm1, %v3969_v8 }
  0x4a   :  { %3272 = vmatmul.msk.bf16.gmra.mxu1 %vm232_vm1, %v3969_v8 }
  0x59   :  { %3256 = vmatmul.msk.bf16.gmra.mxu0 %vm232_vm1, %v3970_v9  ;;  %3290 = vmatmul.msk.bf16.gmra.mxu2 %vm232_vm1, %v3970_v9 }
  0x5a   :  { %3273 = vmatmul.msk.bf16.gmra.mxu1 %vm232_vm1, %v3970_v9 }
  0x69   :  { %3257 = vmatmul.msk.bf16.gmra.mxu0 %vm232_vm1, %v3971_v10  ;;  %3291 = vmatmul.msk.bf16.gmra.mxu2 %vm232_vm1, %v3971_v10 }
  0x6a   :  { %3274 = vmatmul.msk.bf16.gmra.mxu1 %vm232_vm1, %v3971_v10 }
  0x79   :  { %3258 = vmatmul.msk.bf16.gmra.mxu0 %vm232_vm1, %v3972_v11  ;;  %3292 = vmatmul.msk.bf16.gmra.mxu2 %vm232_vm1, %v3972_v11 }
  0x7a   :  { %3275 = vmatmul.msk.bf16.gmra.mxu1 %vm232_vm1, %v3972_v11 }
  0x89   :  { %3259 = vmatmul.msk.bf16.gmra.mxu0 %vm232_vm1, %v3973_v12  ;;  %3293 = vmatmul.msk.bf16.gmra.mxu2 %vm232_vm1, %v3973_v12 }
  0x8a   :  { %3276 = vmatmul.msk.bf16.gmra.mxu1 %vm232_vm1, %v3973_v12 }
  0x99   :  { %3260 = vmatmul.msk.bf16.gmra.mxu0 %vm232_vm1, %v3974_v13  ;;  %3294 = vmatmul.msk.bf16.gmra.mxu2 %vm232_vm1, %v3974_v13 }
  0x9a   :  { %3277 = vmatmul.msk.bf16.gmra.mxu1 %vm232_vm1, %v3974_v13 }
  0xa6   :  { %v294_v15 = vpop.f32.mrf.mxu0 }
  0xa7   :  { %v384_v17 = vpop.f32.mrf.mxu1 }
  0xa9   :  { %3261 = vmatmul.msk.bf16.gmra.mxu0 %vm232_vm1, %v3975_v14  ;;  %3295 = vmatmul.msk.bf16.gmra.mxu2 %vm232_vm1, %v3975_v14 }
  0xaa   :  { %3278 = vmatmul.msk.bf16.gmra.mxu1 %vm232_vm1, %v3975_v14 }
  0xac   :  { %v474_v18 = vpop.f32.mrf.mxu2 }
  0xae   :  { %v296_v19 = vpop.f32.mrf.mxu0 }
  0xaf   :  { %v385_v20 = vpop.f32.mrf.mxu1 }
  0xb4   :  { %v475_v21 = vpop.f32.mrf.mxu2 }
  0xb6   :  { %v299_v23 = vpop.f32.mrf.mxu0 }
  0xb7   :  { %v387_v24 = vpop.f32.mrf.mxu1 }
  0xb8   :  { %v550_v34 = vadd.f32 %v387_v24, %v294_v15 }
  0xb9   :  { %3262 = vmatmul.msk.bf16.gmra.mxu0 %vm232_vm1, %v3976_v22  ;;  %3296 = vmatmul.msk.bf16.gmra.mxu2 %vm232_vm1, %v3976_v22 }
  0xba   :  { %3279 = vmatmul.msk.bf16.gmra.mxu1 %vm232_vm1, %v3976_v22 }
  0xbc   :  { %v477_v26 = vpop.f32.mrf.mxu2 }
  0xbe   :  { %v301_v28 = vpop.f32.mrf.mxu0 }
  0xbf   :  { %v389_v29 = vpop.f32.mrf.mxu1 }
  0xc0   :  { %v551_v41 = vadd.f32 %v389_v29, %v296_v19 }
  0xc4   :  { %v478_v30 = vpop.f32.mrf.mxu2 }
  0xc6   :  { %v304_v32 = vpop.f32.mrf.mxu0 }
  0xc7   :  { %v392_v33 = vpop.f32.mrf.mxu1 }
  0xc8   :  { %v552_v52 = vadd.f32 %v392_v33, %v299_v23 }
  0xc9   :  { %3263 = vmatmul.msk.bf16.gmra.mxu0 %vm232_vm1, %v3977_v31  ;;  %3297 = vmatmul.msk.bf16.gmra.mxu2 %vm232_vm1, %v3977_v31 }
  0xca   :  { %3280 = vmatmul.msk.bf16.gmra.mxu1 %vm232_vm1, %v3977_v31 }
  0xcc   :  { %v480_v36 = vpop.f32.mrf.mxu2 }
  0xcd   :  { %v578_v37 = vadd.f32 %v550_v34, %v480_v36 }
  0xce   :  { %v4445_v38 = vpop.f32.mrf.mxu0 }
  0xcf   :  { %v610_v39 = vadd.f32 %v4443_v35, %v578_v37  ;;  %v394_v40 = vpop.f32.mrf.mxu1 }
  0xd0   :  { %v553_v2 = vadd.f32 %v394_v40, %v301_v28  ;;  %v3980_v28 = vld [vmem:[%s5141_s28 + $0x68] sm:$0xff] }
  0xd1   :  { %v666_v42 = vmul.f32 0.01, %v610_v39  ;;  %vm638_vm2 = vcmp.gt.f32.partialorder %v610_v39, 0.0 }
  0xd3   :  { %v694_v49 = vsel %vm638_vm2, %v610_v39, %v666_v42 }
  0xd4   :  { %v482_v44 = vpop.f32.mrf.mxu2  ;;  %v726_v54 = vmul.f32 %v4459_v48, %v694_v49 }
  0xd5   :  { %v579_v45 = vadd.f32 %v551_v41, %v482_v44 }
  0xd6   :  { %v4454_v47 = vpop.f32.mrf.mxu0  ;;  %v758_v61 = vadd.f32 %v4468_v55, %v726_v54 }
  0xd7   :  { %v611_v50 = vadd.f32 %v4443_v35, %v579_v45  ;;  %v397_v51 = vpop.f32.mrf.mxu1 }
  0xd8   :  { %v554_v11 = vadd.f32 %v397_v51, %v304_v32  ;;  %v3987_v51 = vld [vmem:[%s5142_s11 + $0x20] sm:$0xff] }
  0xd9   :  { %vm639_vm3 = vcmp.gt.f32.partialorder %v611_v50, 0.0  ;;  %v667_v53 = vmul.f32 0.01, %v611_v50  ;;  %3264 = vmatmul.msk.bf16.gmra.mxu0 %vm232_vm1, %v3978_v46  ;;  %3298 = vmatmul.msk.bf16.gmra.mxu2 %vm232_vm1, %v3978_v46 }
  0xda   :  { %3281 = vmatmul.msk.bf16.gmra.mxu1 %vm232_vm1, %v3978_v46  ;;  %1050 = vmatpush.bf16.msrb.mxu0 %v3987_v51 }
  0xdb   :  { %v695_v56 = vsel %vm639_vm3, %v611_v50, %v667_v53  ;;  %v3981_v53 = vld [vmem:[%s5141_s28 + $0x70] sm:$0xff] }
  0xdc   :  { %v485_v57 = vpop.f32.mrf.mxu2  ;;  %v727_v58 = vmul.f32 %v4459_v48, %v695_v56 }
  0xdd   :  { %v580_v59 = vadd.f32 %v552_v52, %v485_v57 }
  0xde   :  { %v4472_v60 = vpop.f32.mrf.mxu0  ;;  %v759_v62 = vadd.f32 %v4468_v55, %v727_v58 }
  0xdf   :  { %v612_v63 = vadd.f32 %v4443_v35, %v580_v59  ;;  %v399_v0 = vpop.f32.mrf.mxu1 }
  0xe0   :  { %v4477_v1 = vpack.c.bf16 %v759_v62, %v758_v61  ;;  %v555_v24 = vadd.f32 %v399_v0, %v4445_v38 }
  0xe1   :  { %v668_v3 = vmul.f32 0.01, %v612_v63  ;;  %vm640_vm5 = vcmp.gt.f32.partialorder %v612_v63, 0.0 }
  0xe2   :  { %3311 = vmatmul.msk.bf16.vlgmr.msra.gmra.mxu3 %vm816_vm4, %v4477_v1 }
  0xe3   :  { %v696_v8 = vsel %vm640_vm5, %v612_v63, %v668_v3 }
  0xe4   :  { %v487_v4 = vpop.f32.mrf.mxu2  ;;  %v728_v13 = vmul.f32 %v4459_v48, %v696_v8 }
  0xe5   :  { %v581_v5 = vadd.f32 %v553_v2, %v487_v4 }
  0xe6   :  { %v314_v7 = vpop.f32.mrf.mxu0  ;;  %v760_v19 = vadd.f32 %v4468_v55, %v728_v13  ;;  %v3982_v13 = vld [vmem:[%s5141_s28 + $0x78] sm:$0xff] }
  0xe7   :  { %v613_v9 = vadd.f32 %v4443_v35, %v581_v5  ;;  %v402_v10 = vpop.f32.mrf.mxu1 }
  0xe8   :  { %v556_v33 = vadd.f32 %v402_v10, %v4454_v47 }
  0xe9   :  { %vm641_vm6 = vcmp.gt.f32.partialorder %v613_v9, 0.0  ;;  %v669_v12 = vmul.f32 0.01, %v613_v9  ;;  %3265 = vmatmul.msk.bf16.gmra.mxu0 %vm232_vm1, %v3979_v6  ;;  %3299 = vmatmul.msk.bf16.gmra.mxu2 %vm232_vm1, %v3979_v6 }
  0xea   :  { %3282 = vmatmul.msk.bf16.gmra.mxu1 %vm232_vm1, %v3979_v6 }
  0xeb   :  { %v697_v14 = vsel %vm641_vm6, %v613_v9, %v669_v12 }
  0xec   :  { %v490_v15 = vpop.f32.mrf.mxu2  ;;  %v729_v16 = vmul.f32 %v4459_v48, %v697_v14 }
  0xed   :  { %v582_v17 = vadd.f32 %v554_v11, %v490_v15 }
  0xee   :  { %v4490_v18 = vpop.f32.mrf.mxu0  ;;  %v761_v20 = vadd.f32 %v4468_v55, %v729_v16 }
  0xef   :  { %v614_v21 = vadd.f32 %v4443_v35, %v582_v17  ;;  %v404_v22 = vpop.f32.mrf.mxu1 }
  0xf0   :  { %v4495_v23 = vpack.c.bf16 %v761_v20, %v760_v19  ;;  %v557_v47 = vadd.f32 %v404_v22, %v4472_v60 }
  0xf1   :  { %v670_v25 = vmul.f32 0.01, %v614_v21  ;;  %vm642_vm7 = vcmp.gt.f32.partialorder %v614_v21, 0.0 }
  0xf2   :  { %3312 = vmatmul.msk.bf16.gmra.mxu3 %vm816_vm4, %v4495_v23 }
  0xf3   :  { %v698_v30 = vsel %vm642_vm7, %v614_v21, %v670_v25 }
  0xf4   :  { %v492_v26 = vpop.f32.mrf.mxu2  ;;  %v730_v36 = vmul.f32 %v4459_v48, %v698_v30 }
  0xf5   :  { %v583_v27 = vadd.f32 %v555_v24, %v492_v26 }
  0xf6   :  { %v319_v29 = vpop.f32.mrf.mxu0  ;;  %v762_v42 = vadd.f32 %v4468_v55, %v730_v36 }
  0xf7   :  { %v615_v31 = vadd.f32 %v4443_v35, %v583_v27  ;;  %v407_v32 = vpop.f32.mrf.mxu1 }
  0xf8   :  { %v558_v59 = vadd.f32 %v407_v32, %v314_v7 }
  0xf9   :  { %vm643_vm8 = vcmp.gt.f32.partialorder %v615_v31, 0.0  ;;  %v671_v34 = vmul.f32 0.01, %v615_v31  ;;  %3266 = vmatmul.msk.bf16.gmra.mxu0 %vm232_vm1, %v3980_v28  ;;  %3300 = vmatmul.msk.bf16.gmra.mxu2 %vm232_vm1, %v3980_v28 }
  0xfa   :  { %3283 = vmatmul.msk.bf16.gmra.mxu1 %vm232_vm1, %v3980_v28 }
  0xfb   :  { %v699_v37 = vsel %vm643_vm8, %v615_v31, %v671_v34 }
  0xfc   :  { %v495_v38 = vpop.f32.mrf.mxu2  ;;  %v731_v39 = vmul.f32 %v4459_v48, %v699_v37 }
  0xfd   :  { %v584_v40 = vadd.f32 %v556_v33, %v495_v38 }
  0xfe   :  { %v4510_v41 = vpop.f32.mrf.mxu0  ;;  %v763_v43 = vadd.f32 %v4468_v55, %v731_v39 }
  0xff   :  { %v616_v44 = vadd.f32 %v4443_v35, %v584_v40  ;;  %v409_v45 = vpop.f32.mrf.mxu1 }
 0x100   :  { %v4515_v46 = vpack.c.bf16 %v763_v43, %v762_v42  ;;  %v559_v9 = vadd.f32 %v409_v45, %v4490_v18 }
 0x101   :  { %v672_v49 = vmul.f32 0.01, %v616_v44  ;;  %vm644_vm9 = vcmp.gt.f32.partialorder %v616_v44, 0.0 }
 0x102   :  { %3313 = vmatmul.msk.bf16.gmra.mxu3 %vm816_vm4, %v4515_v46 }
 0x103   :  { %v700_v56 = vsel %vm644_vm9, %v616_v44, %v672_v49 }
 0x104   :  { %v497_v50 = vpop.f32.mrf.mxu2  ;;  %v732_v61 = vmul.f32 %v4459_v48, %v700_v56 }
 0x105   :  { %v585_v52 = vadd.f32 %v557_v47, %v497_v50 }
 0x106   :  { %v324_v54 = vpop.f32.mrf.mxu0  ;;  %v764_v4 = vadd.f32 %v4468_v55, %v732_v61 }
 0x107   :  { %v617_v57 = vadd.f32 %v4443_v35, %v585_v52  ;;  %v412_v58 = vpop.f32.mrf.mxu1 }
 0x108   :  { %v560_v19 = vadd.f32 %v412_v58, %v319_v29 }
 0x109   :  { %vm645_vm10 = vcmp.gt.f32.partialorder %v617_v57, 0.0  ;;  %v673_v60 = vmul.f32 0.01, %v617_v57  ;;  %3267 = vmatmul.msk.bf16.gmra.mxu0 %vm232_vm1, %v3981_v53  ;;  %3301 = vmatmul.msk.bf16.gmra.mxu2 %vm232_vm1, %v3981_v53 }
 0x10a   :  { %3284 = vmatmul.msk.bf16.gmra.mxu1 %vm232_vm1, %v3981_v53 }
 0x10b   :  { %v701_v62 = vsel %vm645_vm10, %v617_v57, %v673_v60 }
 0x10c   :  { %v500_v63 = vpop.f32.mrf.mxu2  ;;  %v733_v0 = vmul.f32 %v4459_v48, %v701_v62 }
 0x10d   :  { %v586_v2 = vadd.f32 %v558_v59, %v500_v63 }
 0x10e   :  { %v326_v3 = vpop.f32.mrf.mxu0  ;;  %v765_v5 = vadd.f32 %v4468_v55, %v733_v0 }
 0x10f   :  { %v618_v6 = vadd.f32 %v4443_v35, %v586_v2  ;;  %v414_v7 = vpop.f32.mrf.mxu1 }
 0x110   :  { %v4535_v8 = vpack.c.bf16 %v765_v5, %v764_v4  ;;  %v561_v32 = vadd.f32 %v414_v7, %v4510_v41 }
 0x111   :  { %v674_v10 = vmul.f32 0.01, %v618_v6  ;;  %vm646_vm11 = vcmp.gt.f32.partialorder %v618_v6, 0.0 }
 0x112   :  { %3314 = vmatmul.msk.bf16.gmra.mxu3 %vm816_vm4, %v4535_v8 }
 0x113   :  { %v702_v15 = vsel %vm646_vm11, %v618_v6, %v674_v10 }
 0x114   :  { %v502_v11 = vpop.f32.mrf.mxu2  ;;  %v734_v18 = vmul.f32 %v4459_v48, %v702_v15 }
 0x115   :  { %v587_v12 = vadd.f32 %v559_v9, %v502_v11 }
 0x116   :  { %v329_v14 = vpop.f32.mrf.mxu0  ;;  %v766_v27 = vadd.f32 %v4468_v55, %v734_v18 }
 0x117   :  { %v619_v16 = vadd.f32 %v4443_v35, %v587_v12  ;;  %v417_v17 = vpop.f32.mrf.mxu1 }
 0x118   :  { %v562_v42 = vadd.f32 %v417_v17, %v324_v54 }
 0x119   :  { %vm647_vm12 = vcmp.gt.f32.partialorder %v619_v16, 0.0  ;;  %v675_v20 = vmul.f32 0.01, %v619_v16  ;;  %3268 = vmatmul.msk.bf16.gmra.mxu0 %vm232_vm1, %v3982_v13  ;;  %3302 = vmatmul.msk.bf16.gmra.mxu2 %vm232_vm1, %v3982_v13 }
 0x11a   :  { %3285 = vmatmul.msk.bf16.gmra.mxu1 %vm232_vm1, %v3982_v13 }
 0x11b   :  { %v703_v21 = vsel %vm647_vm12, %v619_v16, %v675_v20 }
 0x11c   :  { %v505_v22 = vpop.f32.mrf.mxu2  ;;  %v735_v24 = vmul.f32 %v4459_v48, %v703_v21 }
 0x11d   :  { %v588_v25 = vadd.f32 %v560_v19, %v505_v22  ;;  %v3985_v19 = vld [vmem:[%s5142_s11 + $0x10] sm:$0xff] }
 0x11e   :  { %v331_v26 = vpop.f32.mrf.mxu0  ;;  %v767_v28 = vadd.f32 %v4468_v55, %v735_v24  ;;  %958 = vmatpush.bf16.msrb.mxu3 %v3985_v19 }
 0x11f   :  { %v620_v29 = vadd.f32 %v4443_v35, %v588_v25  ;;  %v419_v30 = vpop.f32.mrf.mxu1 }
 0x120   :  { %v4552_v31 = vpack.c.bf16 %v767_v28, %v766_v27  ;;  %v563_v57 = vadd.f32 %v419_v30, %v326_v3 }
 0x121   :  { %v676_v33 = vmul.f32 0.01, %v620_v29  ;;  %vm648_vm13 = vcmp.gt.f32.partialorder %v620_v29, 0.0 }
 0x122   :  { %3315 = vmatmul.msk.bf16.gmra.mxu3 %vm816_vm4, %v4552_v31 }
 0x123   :  { %v704_v38 = vsel %vm648_vm13, %v620_v29, %v676_v33 }
 0x124   :  { %v507_v34 = vpop.f32.mrf.mxu2  ;;  %v736_v44 = vmul.f32 %v4459_v48, %v704_v38 }
 0x125   :  { %v589_v36 = vadd.f32 %v561_v32, %v507_v34 }
 0x126   :  { %v334_v37 = vpop.f32.mrf.mxu0  ;;  %v768_v51 = vadd.f32 %v4468_v55, %v736_v44 }
 0x127   :  { %v621_v39 = vadd.f32 %v4443_v35, %v589_v36  ;;  %v422_v40 = vpop.f32.mrf.mxu1 }
 0x128   :  { %v564_v2 = vadd.f32 %v422_v40, %v329_v14 }
 0x129   :  { %vm649_vm14 = vcmp.gt.f32.partialorder %v621_v39, 0.0  ;;  %v677_v43 = vmul.f32 0.01, %v621_v39  ;;  %3363 = vmatmul.msk.bf16.vlgmr.msrb.gmra.mxu0 %vm816_vm4, %v4477_v1 }
 0x12b   :  { %v705_v45 = vsel %vm649_vm14, %v621_v39, %v677_v43 }
 0x12c   :  { %v510_v47 = vpop.f32.mrf.mxu2  ;;  %v737_v41 = vmul.f32 %v4459_v48, %v705_v45 }
 0x12d   :  { %v590_v49 = vadd.f32 %v562_v42, %v510_v47 }
 0x12e   :  { %v336_v50 = vpop.f32.mrf.mxu0  ;;  %v769_v52 = vadd.f32 %v4468_v55, %v737_v41 }
 0x12f   :  { %v622_v53 = vadd.f32 %v4443_v35, %v590_v49  ;;  %v424_v54 = vpop.f32.mrf.mxu1 }
 0x130   :  { %v4565_v56 = vpack.c.bf16 %v769_v52, %v768_v51  ;;  %v565_v16 = vadd.f32 %v424_v54, %v331_v26 }
 0x131   :  { %v678_v58 = vmul.f32 0.01, %v622_v53  ;;  %vm650_vm15 = vcmp.gt.f32.partialorder %v622_v53, 0.0 }
 0x132   :  { %3316 = vmatmul.msk.bf16.gmra.mxu3 %vm816_vm4, %v4565_v56 }
 0x133   :  { %v706_v62 = vsel %vm650_vm15, %v622_v53, %v678_v58 }
 0x134   :  { %v512_v59 = vpop.f32.mrf.mxu2  ;;  %v738_v5 = vmul.f32 %v4459_v48, %v706_v62 }
 0x135   :  { %v591_v60 = vadd.f32 %v563_v57, %v512_v59 }
 0x136   :  { %v339_v61 = vpop.f32.mrf.mxu0  ;;  %v770_v11 = vadd.f32 %v4468_v55, %v738_v5 }
 0x137   :  { %v623_v63 = vadd.f32 %v4443_v35, %v591_v60  ;;  %v427_v0 = vpop.f32.mrf.mxu1 }
 0x138   :  { %v566_v27 = vadd.f32 %v427_v0, %v334_v37 }
 0x139   :  { %vm651_vm1 = vcmp.gt.f32.partialorder %v623_v63, 0.0  ;;  %v679_v4 = vmul.f32 0.01, %v623_v63  ;;  %3364 = vmatmul.msk.bf16.gmra.mxu0 %vm816_vm4, %v4495_v23 }
 0x13b   :  { %v707_v6 = vsel %vm651_vm1, %v623_v63, %v679_v4 }
 0x13c   :  { %v515_v7 = vpop.f32.mrf.mxu2  ;;  %v739_v3 = vmul.f32 %v4459_v48, %v707_v6 }
 0x13d   :  { %v592_v9 = vadd.f32 %v564_v2, %v515_v7 }
 0x13e   :  { %v341_v10 = vpop.f32.mrf.mxu0  ;;  %v771_v12 = vadd.f32 %v4468_v55, %v739_v3 }
 0x13f   :  { %v624_v13 = vadd.f32 %v4443_v35, %v592_v9  ;;  %v429_v14 = vpop.f32.mrf.mxu1 }
 0x140   :  { %v4577_v15 = vpack.c.bf16 %v771_v12, %v770_v11  ;;  %v567_v42 = vadd.f32 %v429_v14, %v336_v50 }
 0x141   :  { %v680_v17 = vmul.f32 0.01, %v624_v13  ;;  %vm652_vm2 = vcmp.gt.f32.partialorder %v624_v13, 0.0 }
 0x142   :  { %3317 = vmatmul.msk.bf16.gmra.mxu3 %vm816_vm4, %v4577_v15 }
 0x143   :  { %v708_v22 = vsel %vm652_vm2, %v624_v13, %v680_v17 }
 0x144   :  { %v517_v20 = vpop.f32.mrf.mxu2  ;;  %v740_v26 = vmul.f32 %v4459_v48, %v708_v22 }
 0x145   :  { %v593_v18 = vadd.f32 %v565_v16, %v517_v20 }
 0x146   :  { %v344_v21 = vpop.f32.mrf.mxu0  ;;  %v772_v36 = vadd.f32 %v4468_v55, %v740_v26 }
 0x147   :  { %v625_v24 = vadd.f32 %v4443_v35, %v593_v18  ;;  %v432_v25 = vpop.f32.mrf.mxu1 }
 0x148   :  { %v568_v52 = vadd.f32 %v432_v25, %v339_v61 }
 0x149   :  { %vm653_vm3 = vcmp.gt.f32.partialorder %v625_v24, 0.0  ;;  %v681_v28 = vmul.f32 0.01, %v625_v24  ;;  %3365 = vmatmul.msk.bf16.gmra.mxu0 %vm816_vm4, %v4515_v46 }
 0x14b   :  { %v709_v29 = vsel %vm653_vm3, %v625_v24, %v681_v28 }
 0x14c   :  { %v520_v30 = vpop.f32.mrf.mxu2  ;;  %v741_v32 = vmul.f32 %v4459_v48, %v709_v29 }
 0x14d   :  { %v594_v33 = vadd.f32 %v566_v27, %v520_v30 }
 0x14e   :  { %v346_v34 = vpop.f32.mrf.mxu0  ;;  %v773_v38 = vadd.f32 %v4468_v55, %v741_v32 }
 0x14f   :  { %v626_v39 = vadd.f32 %v4443_v35, %v594_v33  ;;  %v434_v37 = vpop.f32.mrf.mxu1 }
 0x150   :  { %v4592_v40 = vpack.c.bf16 %v773_v38, %v772_v36  ;;  %v569_v4 = vadd.f32 %v434_v37, %v341_v10 }
 0x151   :  { %v682_v43 = vmul.f32 0.01, %v626_v39  ;;  %vm654_vm5 = vcmp.gt.f32.partialorder %v626_v39, 0.0 }
 0x152   :  { %3318 = vmatmul.msk.bf16.gmra.mxu3 %vm816_vm4, %v4592_v40 }
 0x153   :  { %v710_v41 = vsel %vm654_vm5, %v626_v39, %v682_v43  ;;  %vm1392_vm5 = vcmask 523264  }
 0x154   :  { %v522_v44 = vpop.f32.mrf.mxu2  ;;  %v742_v54 = vmul.f32 %v4459_v48, %v710_v41 }
 0x155   :  { %v595_v45 = vadd.f32 %v567_v42, %v522_v44 }
 0x156   :  { %v349_v47 = vpop.f32.mrf.mxu0  ;;  %v774_v62 = vadd.f32 %v4468_v55, %v742_v54 }
 0x157   :  { %v627_v49 = vadd.f32 %v4443_v35, %v595_v45  ;;  %v437_v51 = vpop.f32.mrf.mxu1 }
 0x158   :  { %v570_v14 = vadd.f32 %v437_v51, %v344_v21 }
 0x159   :  { %vm655_vm6 = vcmp.gt.f32.partialorder %v627_v49, 0.0  ;;  %v683_v53 = vmul.f32 0.01, %v627_v49  ;;  %3366 = vmatmul.msk.bf16.gmra.mxu0 %vm816_vm4, %v4535_v8 }
 0x15b   :  { %v711_v57 = vsel %vm655_vm6, %v627_v49, %v683_v53 }
 0x15c   :  { %v525_v58 = vpop.f32.mrf.mxu2  ;;  %v743_v50 = vmul.f32 %v4459_v48, %v711_v57 }
 0x15d   :  { %v596_v59 = vadd.f32 %v568_v52, %v525_v58 }
 0x15e   :  { %v351_v60 = vpop.f32.mrf.mxu0  ;;  %v775_v63 = vadd.f32 %v4468_v55, %v743_v50 }
 0x15f   :  { %v628_v0 = vadd.f32 %v4443_v35, %v596_v59  ;;  %v439_v61 = vpop.f32.mrf.mxu1 }
 0x160   :  { %v4604_v2 = vpack.c.bf16 %v775_v63, %v774_v62  ;;  %v571_v29 = vadd.f32 %v439_v61, %v346_v34 }
 0x161   :  { %v684_v5 = vmul.f32 0.01, %v628_v0  ;;  %vm656_vm7 = vcmp.gt.f32.partialorder %v628_v0, 0.0 }
 0x162   :  { %3319 = vmatmul.msk.bf16.gmra.mxu3 %vm816_vm4, %v4604_v2 }
 0x163   :  { %v712_v11 = vsel %vm656_vm7, %v628_v0, %v684_v5 }
 0x164   :  { %v527_v6 = vpop.f32.mrf.mxu2  ;;  %v744_v17 = vmul.f32 %v4459_v48, %v712_v11 }
 0x165   :  { %v597_v7 = vadd.f32 %v569_v4, %v527_v6  ;;  %v4608_v3 = vpop.f32.mrf.mxu3 }
 0x166   :  { %v354_v9 = vpop.f32.mrf.mxu0  ;;  %v776_v25 = vadd.f32 %v4468_v55, %v744_v17 }
 0x167   :  { %v629_v12 = vadd.f32 %v4443_v35, %v597_v7  ;;  %v442_v13 = vpop.f32.mrf.mxu1 }
 0x168   :  { %v572_v43 = vadd.f32 %v442_v13, %v349_v47 }
 0x169   :  { %vm657_vm8 = vcmp.gt.f32.partialorder %v629_v12, 0.0  ;;  %v685_v16 = vmul.f32 0.01, %v629_v12  ;;  %3367 = vmatmul.msk.bf16.gmra.mxu0 %vm816_vm4, %v4552_v31 }
 0x16b   :  { %v713_v10 = vsel %vm657_vm8, %v629_v12, %v685_v16 }
 0x16c   :  { %v530_v19 = vpop.f32.mrf.mxu2  ;;  %v745_v20 = vmul.f32 %v4459_v48, %v713_v10 }
 0x16d   :  { %v598_v18 = vadd.f32 %v570_v14, %v530_v19  ;;  %v4615_v22 = vpop.f32.mrf.mxu3 }
 0x16e   :  { %v356_v24 = vpop.f32.mrf.mxu0  ;;  %v777_v27 = vadd.f32 %v4468_v55, %v745_v20 }
 0x16f   :  { %v630_v21 = vadd.f32 %v4443_v35, %v598_v18  ;;  %v444_v28 = vpop.f32.mrf.mxu1 }
 0x170   :  { %v4620_v26 = vpack.c.bf16 %v777_v27, %v776_v25  ;;  %v573_v59 = vadd.f32 %v444_v28, %v351_v60 }
 0x171   :  { %v686_v30 = vmul.f32 0.01, %v630_v21  ;;  %vm658_vm9 = vcmp.gt.f32.partialorder %v630_v21, 0.0 }
 0x172   :  { %3320 = vmatmul.msk.bf16.gmra.mxu3 %vm816_vm4, %v4620_v26 }
 0x173   :  { %v714_v39 = vsel %vm658_vm9, %v630_v21, %v686_v30 }
 0x174   :  { %v532_v32 = vpop.f32.mrf.mxu2  ;;  %v746_v45 = vmul.f32 %v4459_v48, %v714_v39 }
 0x175   :  { %v599_v33 = vadd.f32 %v571_v29, %v532_v32  ;;  %v4624_v36 = vpop.f32.mrf.mxu3 }
 0x176   :  { %v359_v38 = vpop.f32.mrf.mxu0  ;;  %v778_v54 = vadd.f32 %v4468_v55, %v746_v45 }
 0x177   :  { %v631_v37 = vadd.f32 %v4443_v35, %v599_v33  ;;  %v447_v42 = vpop.f32.mrf.mxu1 }
 0x178   :  { %v574_v11 = vadd.f32 %v447_v42, %v354_v9 }
 0x179   :  { %vm659_vm10 = vcmp.gt.f32.partialorder %v631_v37, 0.0  ;;  %v687_v44 = vmul.f32 0.01, %v631_v37  ;;  %3368 = vmatmul.msk.bf16.gmra.mxu0 %vm816_vm4, %v4565_v56 }
 0x17b   :  { %v715_v34 = vsel %vm659_vm10, %v631_v37, %v687_v44 }
 0x17c   :  { %v535_v41 = vpop.f32.mrf.mxu2  ;;  %v747_v49 = vmul.f32 %v4459_v48, %v715_v34 }
 0x17d   :  { %v600_v51 = vadd.f32 %v572_v43, %v535_v41  ;;  %v4631_v52 = vpop.f32.mrf.mxu3 }
 0x17e   :  { %v361_v53 = vpop.f32.mrf.mxu0  ;;  %v779_v57 = vadd.f32 %v4468_v55, %v747_v49 }
 0x17f   :  { %v632_v47 = vadd.f32 %v4443_v35, %v600_v51  ;;  %v449_v58 = vpop.f32.mrf.mxu1 }
 0x180   :  { %v4636_v50 = vpack.c.bf16 %v779_v57, %v778_v54  ;;  %v575_v21 = vadd.f32 %v449_v58, %v356_v24 }
 0x181   :  { %v688_v62 = vmul.f32 0.01, %v632_v47  ;;  %vm660_vm11 = vcmp.gt.f32.partialorder %v632_v47, 0.0 }
 0x182   :  { %3321 = vmatmul.msk.bf16.gmra.mxu3 %vm816_vm4, %v4636_v50 }
 0x183   :  { %v716_v5 = vsel %vm660_vm11, %v632_v47, %v688_v62 }
 0x184   :  { %v537_v63 = vpop.f32.mrf.mxu2  ;;  %v748_v13 = vmul.f32 %v4459_v48, %v716_v5 }
 0x185   :  { %v601_v0 = vadd.f32 %v573_v59, %v537_v63  ;;  %v4640_v61 = vpop.f32.mrf.mxu3 }
 0x186   :  { %v364_v4 = vpop.f32.mrf.mxu0  ;;  %v780_v20 = vadd.f32 %v4468_v55, %v748_v13 }
 0x187   :  { %v633_v6 = vadd.f32 %v4443_v35, %v601_v0  ;;  %v452_v7 = vpop.f32.mrf.mxu1 }
 0x188   :  { %v576_v43 = vadd.f32 %v452_v7, %v359_v38 }
 0x189   :  { %vm661_vm12 = vcmp.gt.f32.partialorder %v633_v6, 0.0  ;;  %v689_v12 = vmul.f32 0.01, %v633_v6  ;;  %3369 = vmatmul.msk.bf16.gmra.mxu0 %vm816_vm4, %v4577_v15 }
 0x18b   :  { %v717_v60 = vsel %vm661_vm12, %v633_v6, %v689_v12 }
 0x18c   :  { %v540_v14 = vpop.f32.mrf.mxu2  ;;  %v749_v16 = vmul.f32 %v4459_v48, %v717_v60 }
 0x18d   :  { %v602_v17 = vadd.f32 %v574_v11, %v540_v14  ;;  %v4647_v10 = vpop.f32.mrf.mxu3 }
 0x18e   :  { %v365_v19 = vpop.f32.mrf.mxu0  ;;  %v781_v18 = vadd.f32 %v4468_v55, %v749_v16 }
 0x18f   :  { %v634_v9 = vadd.f32 %v4443_v35, %v602_v17  ;;  %v454_v25 = vpop.f32.mrf.mxu1 }
 0x190   :  { %v4652_v27 = vpack.c.bf16 %v781_v18, %v780_v20  ;;  %v577_v62 = vadd.f32 %v454_v25, %v361_v53  ;;  %v4000_v25 = vld [vmem:[#allocation2 + $0x58] sm:$0xff] }
 0x191   :  { %v690_v28 = vmul.f32 0.01, %v634_v9  ;;  %vm662_vm13 = vcmp.gt.f32.partialorder %v634_v9, 0.0  ;;  %1501 = vmatpush.bf16.msrb.mxu1 %v4000_v25 }
 0x192   :  { %3322 = vmatmul.msk.bf16.gmra.mxu3 %vm816_vm4, %v4652_v27 }
 0x193   :  { %v718_v39 = vsel %vm662_vm13, %v634_v9, %v690_v28 }
 0x194   :  { %v542_v29 = vpop.f32.mrf.mxu2  ;;  %v750_v45 = vmul.f32 %v4459_v48, %v718_v39  ;;  %v3999_v39 = vld [vmem:[#allocation2 + $0x50] sm:$0xff] }
 0x195   :  { %v603_v30 = vadd.f32 %v575_v21, %v542_v29  ;;  %v4656_v32 = vpop.f32.mrf.mxu3  ;;  %1502 = vmatpush.bf16.msrb.mxu1 %v3999_v39 }
 0x196   :  { %v367_v33 = vpop.f32.mrf.mxu0  ;;  %v782_v57 = vadd.f32 %v4468_v55, %v750_v45 }
 0x197   :  { %v635_v37 = vadd.f32 %v4443_v35, %v603_v30  ;;  %v457_v42 = vpop.f32.mrf.mxu1 }
 0x198   :  { %v3992_v42 = vld [vmem:[#allocation2 + $0x18] sm:$0xff] }
 0x199   :  { %vm663_vm14 = vcmp.gt.f32.partialorder %v635_v37, 0.0  ;;  %v691_v44 = vmul.f32 0.01, %v635_v37  ;;  %3370 = vmatmul.msk.bf16.gmra.mxu0 %vm816_vm4, %v4592_v40  ;;  %1446 = vmatpush.bf16.msrb.mxu2 %v3992_v42 }
 0x19b   :  { %v719_v24 = vsel %vm663_vm14, %v635_v37, %v691_v44 }
 0x19c   :  { %v751_v34 = vmul.f32 %v4459_v48, %v719_v24  ;;  %v545_v41 = vpop.f32.mrf.mxu2 }
 0x19d   :  { %v604_v49 = vadd.f32 %v576_v43, %v545_v41  ;;  %v4663_v51 = vpop.f32.mrf.mxu3 }
 0x19e   :  { %v368_v54 = vpop.f32.mrf.mxu0  ;;  %v783_v47 = vadd.f32 %v4468_v55, %v751_v34 }
 0x19f   :  { %v636_v38 = vadd.f32 %v4443_v35, %v604_v49  ;;  %v458_v58 = vpop.f32.mrf.mxu1 }
 0x1a0   :  { %v4668_v59 = vpack.c.bf16 %v783_v47, %v782_v57  ;;  %v3998_v47 = vld [vmem:[#allocation2 + $0x48] sm:$0xff] }
 0x1a1   :  { %v692_v63 = vmul.f32 0.01, %v636_v38  ;;  %vm664_vm15 = vcmp.gt.f32.partialorder %v636_v38, 0.0  ;;  %1503 = vmatpush.bf16.msrb.mxu1 %v3998_v47 }
 0x1a2   :  { %3323 = vmatmul.msk.bf16.gmra.mxu3 %vm816_vm4, %v4668_v59 }
 0x1a3   :  { %v720_v7 = vsel %vm664_vm15, %v636_v38, %v692_v63  ;;  %v3989_v38 = vld [vmem:[#allocation2] sm:$0xff] }
 0x1a4   :  { %v547_v0 = vpop.f32.mrf.mxu2  ;;  %v752_v13 = vmul.f32 %v4459_v48, %v720_v7 }
 0x1a5   :  { %v605_v4 = vadd.f32 %v577_v62, %v547_v0  ;;  %v4672_v5 = vpop.f32.mrf.mxu3 }
 0x1a6   :  { %v1052_v6 = vpop.f32.mrf.mxu0  ;;  %v784_v17 = vadd.f32 %v4468_v55, %v752_v13 }
 0x1a7   :  { %v637_v11 = vadd.f32 %v4443_v35, %v605_v4 }
 0x1a9   :  { %vm665_vm1 = vcmp.gt.f32.partialorder %v637_v11, 0.0  ;;  %v693_v12 = vmul.f32 0.01, %v637_v11  ;;  %3371 = vmatmul.msk.bf16.gmra.mxu0 %vm816_vm4, %v4604_v2 }
 0x1ab   :  { %v721_v60 = vsel %vm665_vm1, %v637_v11, %v693_v12  ;;  %v4759_v11 = vld [vmem:[%s5147_s5] ss:$0 sm:$0xff] }
 0x1ac   :  { %v753_v53 = vmul.f32 %v4459_v48, %v721_v60 }
 0x1ad   :  { %v4679_v14 = vpop.f32.mrf.mxu3 }
 0x1ae   :  { %v1053_v16 = vpop.f32.mrf.mxu0  ;;  %v785_v19 = vadd.f32 %v4468_v55, %v753_v53  ;;  %v4766_v53 = vld [vmem:[%s5148_s29] ss:$0 sm:$0xff] }
 0x1b0   :  { %v4683_v20 = vpack.c.bf16 %v785_v19, %v784_v17 }
 0x1b2   :  { %3324 = vmatmul.msk.bf16.gmra.mxu3 %vm816_vm4, %v4683_v20 }
 0x1b5   :  { %v4687_v35 = vpop.f32.mrf.mxu3 }
 0x1b6   :  { %v1055_v18 = vpop.f32.mrf.mxu0 }
 0x1b9   :  { %3372 = vmatmul.msk.bf16.gmra.mxu0 %vm816_vm4, %v4620_v26 }
 0x1bd   :  { %v4691_v9 = vpop.f32.mrf.mxu3 }
 0x1be   :  { %v1056_v48 = vpop.f32.mrf.mxu0 }
 0x1c2   :  { %3337 = vmatmul.msk.bf16.vlgmr.msrb.gmra.mxu3 %vm816_vm4, %v4477_v1 }
 0x1c5   :  { %v4695_v55 = vpop.f32.mrf.mxu3 }
 0x1c6   :  { %v1058_v45 = vpop.f32.mrf.mxu0 }
 0x1c9   :  { %3373 = vmatmul.msk.bf16.gmra.mxu0 %vm816_vm4, %v4636_v50 }
 0x1cd   :  { %v4699_v21 = vpop.f32.mrf.mxu3 }
 0x1d2   :  { %3338 = vmatmul.msk.bf16.gmra.mxu3 %vm816_vm4, %v4495_v23 }
 0x1d5   :  { %v4703_v28 = vpop.f32.mrf.mxu3 }
 0x1d9   :  { %3374 = vmatmul.msk.bf16.gmra.mxu0 %vm816_vm4, %v4652_v27 }
 0x1dd   :  { %v4707_v29 = vpop.f32.mrf.mxu3 }
 0x1e2   :  { %3339 = vmatmul.msk.bf16.gmra.mxu3 %vm816_vm4, %v4515_v46 }
 0x1e5   :  { %v4711_v1 = vpop.f32.mrf.mxu3 }
 0x1e9   :  { %3375 = vmatmul.msk.bf16.gmra.mxu0 %vm816_vm4, %v4668_v59 }
 0x1ed   :  { %v4715_v30 = vpop.f32.mrf.mxu3 }
 0x1f2   :  { %3340 = vmatmul.msk.bf16.gmra.mxu3 %vm816_vm4, %v4535_v8 }
 0x1f5   :  { %v4719_v23 = vpop.f32.mrf.mxu3 }
 0x1f9   :  { %3376 = vmatmul.msk.bf16.gmra.mxu0 %vm816_vm4, %v4683_v20 }
 0x1fd   :  { %v4723_v33 = vpop.f32.mrf.mxu3 }
 0x202   :  { %3341 = vmatmul.msk.bf16.gmra.mxu3 %vm816_vm4, %v4552_v31  ;;  %v1060_v31 = vpop.f32.mrf.mxu0 }
 0x205   :  { %v4727_v46 = vpop.f32.mrf.mxu3 }
 0x20a   :  { %v4741_v41 = vpop.f32.mrf.mxu0 }
 0x20d   :  { %v4729_v37 = vpop.f32.mrf.mxu3 }
 0x212   :  { %3342 = vmatmul.msk.bf16.gmra.mxu3 %vm816_vm4, %v4565_v56  ;;  %v3991_v56 = vld [vmem:[#allocation2 + $0x10] sm:$0xff]  ;;  %v4745_v57 = vpop.f32.mrf.mxu0 }
 0x213   :  { %1447 = vmatpush.bf16.msrb.mxu2 %v3991_v56  ;;  %v4004_v56 = vld [vmem:[#allocation2 + $0x78] sm:$0xff] }
 0x215   :  { %v4733_v8 = vpop.f32.mrf.mxu3 }
 0x21d   :  { %v4735_v43 = vpop.f32.mrf.mxu3 }
 0x222   :  { %3343 = vmatmul.msk.bf16.gmra.mxu3 %vm816_vm4, %v4577_v15  ;;  %v3990_v15 = vld [vmem:[#allocation2 + $0x8] sm:$0xff] }
 0x223   :  { %1448 = vmatpush.bf16.msrb.mxu2 %v3990_v15  ;;  %v4003_v15 = vld [vmem:[#allocation2 + $0x70] sm:$0xff] }
 0x225   :  { %v928_v44 = vpop.f32.mrf.mxu3 }
 0x227   :  { %1449 = vmatpush.bf16.msrb.mxu2 %v3989_v38  ;;  %v3995_v38 = vld [vmem:[#allocation2 + $0x30] sm:$0xff] }
 0x22b   :  { %1558 = vmatpush.bf16.msra.mxu2 %v4004_v56 }
 0x22d   :  { %v929_v24 = vpop.f32.mrf.mxu3 }
 0x22f   :  { %1559 = vmatpush.bf16.msra.mxu2 %v4003_v15 }
 0x232   :  { %3344 = vmatmul.msk.bf16.gmra.mxu3 %vm816_vm4, %v4592_v40  ;;  %v1068_v40 = vpop.f32.mrf.mxu0 }
 0x235   :  { %v931_v34 = vpop.f32.mrf.mxu3 }
 0x23a   :  { %v1070_v6 = vpop.f32.mrf.mxu0 }
 0x23d   :  { %v932_v49 = vpop.f32.mrf.mxu3 }
 0x242   :  { %3345 = vmatmul.msk.bf16.gmra.mxu3 %vm816_vm4, %v4604_v2  ;;  %v4753_v2 = vld [vmem:[%s5146_s23] ss:$0 sm:$0xff]  ;;  %v4771_v19 = vpop.f32.mrf.mxu0  ;;  %s5150_s23 = sld [smem:[#allocation19_spill]] }
 0x245   :  { %v960_v54 = vpop.f32.mrf.mxu3 }
 0x246   :  { %v3996_v54 = vld [vmem:[#allocation2 + $0x38] sm:$0xff] }
 0x247   :  { %1400 = vmatpush.bf16.msra.mxu3 %v3996_v54 }
 0x24b   :  { %1401 = vmatpush.bf16.msra.mxu3 %v3995_v38 }
 0x24d   :  { %v961_v58 = vpop.f32.mrf.mxu3 }
 0x252   :  { %3346 = vmatmul.msk.bf16.gmra.mxu3 %vm816_vm4, %v4620_v26 }
 0x255   :  { %v963_v62 = vpop.f32.mrf.mxu3 }
 0x256   :  { %v1118_v63 = vadd.f32 %v963_v62, %v4608_v3 }
 0x258   :  { %v1142_v0 = vadd.f32 %v1118_v63, %v1058_v45  ;;  %v3997_v45 = vld [vmem:[#allocation2 + $0x40] sm:$0xff]  ;;  %v4002_v63 = vld [vmem:[#allocation2 + $0x68] sm:$0xff] }
 0x259   :  { %1504 = vmatpush.bf16.msrb.mxu1 %v3997_v45  ;;  %1560 = vmatpush.bf16.msra.mxu2 %v4002_v63 }
 0x25a   :  { %v1170_v4 = vadd.f32 %v4753_v2, %v1142_v0 }
 0x25c   :  { %vm1194_vm2 = vcmp.gt.f32.partialorder %v1170_v4, 0.0  ;;  %v1218_v7 = vmul.f32 0.01, %v1170_v4 }
 0x25d   :  { %v965_v26 = vpop.f32.mrf.mxu3 }
 0x25e   :  { %v1242_v12 = vsel %vm1194_vm2, %v1170_v4, %v1218_v7  ;;  %v1119_v3 = vadd.f32 %v965_v26, %v4615_v22  ;;  %v3994_v4 = vld [vmem:[#allocation2 + $0x28] sm:$0xff]  ;;  %v4001_v26 = vld [vmem:[#allocation2 + $0x60] sm:$0xff] }
 0x25f   :  { %v1270_v60 = vmul.f32 %v4759_v11, %v1242_v12  ;;  %1402 = vmatpush.bf16.msra.mxu3 %v3994_v4  ;;  %1561 = vmatpush.bf16.msra.mxu2 %v4001_v26 }
 0x260   :  { %v1143_v13 = vadd.f32 %v1119_v3, %v1060_v31 }
 0x261   :  { %v1298_v18 = vadd.f32 %v4766_v53, %v1270_v60 }
 0x262   :  { %v1171_v16 = vadd.f32 %v4753_v2, %v1143_v13  ;;  %3347 = vmatmul.msk.bf16.gmra.mxu3 %vm816_vm4, %v4636_v50  ;;  %v4776_v50 = vpop.f32.mrf.mxu0  ;;  %v3993_v13 = vld [vmem:[#allocation2 + $0x20] sm:$0xff] }
 0x263   :  { %v1322_v39 = vpack.c.bf16 %v1298_v18, %v1298_v18  ;;  %1403 = vmatpush.bf16.msra.mxu3 %v3993_v13  ;;  %v4012_v13 = vld [vmem:[#allocation2 + $0xb8] sm:$0xff] }
 0x264   :  { %vm1195_vm3 = vcmp.gt.f32.partialorder %v1171_v16, 0.0  ;;  %v1219_v17 = vmul.f32 0.01, %v1171_v16 }
 0x265   :  { %v968_v22 = vpop.f32.mrf.mxu3  ;;  %v1412_v24 = vunpack.c.l.b16 %v1322_v39 }
 0x266   :  { %v1243_v48 = vsel %vm1195_vm3, %v1171_v16, %v1219_v17  ;;  %v4008_v17 = vld [vmem:[#allocation2 + $0x98] sm:$0xff] }
 0x267   :  { %v1271_v25 = vmul.f32 %v4759_v11, %v1243_v48  ;;  %1615 = vmatpush.bf16.msra.mxu1 %v4008_v17  ;;  %v4011_v17 = vld [vmem:[#allocation2 + $0xb0] sm:$0xff] }
 0x269   :  { %v1299_v42 = vadd.f32 %v4766_v53, %v1271_v25 }
 0x26a   :  { %v4782_v0 = vpop.f32.mrf.mxu0 }
 0x26b   :  { %v1323_v44 = vpack.c.bf16 %v1299_v42, %v1299_v42 }
 0x26d   :  { %v970_v31 = vpop.f32.mrf.mxu3  ;;  %v1413_v34 = vunpack.c.l.b16 %v1323_v44 }
 0x26e   :  { %v1121_v12 = vadd.f32 %v970_v31, %v4631_v52  ;;  %v4006_v31 = vld [vmem:[#allocation2 + $0x88] sm:$0xff] }
 0x26f   :  { %v1414_v49 = vpack.c.b16 %v1413_v34, %v1412_v24 }
 0x270   :  { %v1145_v18 = vadd.f32 %v1121_v12, %v4745_v57 }
 0x271   :  { %3410 = vmatmul.msk.bf16.vlgmr.msrb.gmra.mxu2 %vm1392_vm5, %v1414_v49 }
 0x272   :  { %3348 = vmatmul.msk.bf16.gmra.mxu3 %vm816_vm4, %v4652_v27  ;;  %v4793_v52 = vpop.f32.mrf.mxu0  ;;  %1672 = vmatpush.bf16.msrb.mxu2 %v4012_v13  ;;  %v4014_v13 = vld [vmem:[#allocation2 + $0xc8] sm:$0xff] }
 0x275   :  { %v973_v47 = vpop.f32.mrf.mxu3 }
 0x276   :  { %v1122_v58 = vadd.f32 %v973_v47, %v4640_v61  ;;  %v4005_v47 = vld [vmem:[#allocation2 + $0x80] sm:$0xff]  ;;  %1673 = vmatpush.bf16.msrb.mxu2 %v4011_v17 }
 0x278   :  { %v1146_v62 = vadd.f32 %v1122_v58, %v1068_v40  ;;  %v1120_v40 = vadd.f32 %v968_v22, %v4624_v36  ;;  %v4007_v36 = vld [vmem:[#allocation2 + $0x90] sm:$0xff] }
 0x279   :  { %1616 = vmatpush.bf16.msra.mxu1 %v4007_v36 }
 0x27a   :  { %v1174_v7 = vadd.f32 %v4753_v2, %v1146_v62  ;;  %v4804_v38 = vpop.f32.mrf.mxu0 }
 0x27c   :  { %vm1198_vm6 = vcmp.gt.f32.partialorder %v1174_v7, 0.0  ;;  %v1222_v27 = vmul.f32 0.01, %v1174_v7 }
 0x27d   :  { %v975_v3 = vpop.f32.mrf.mxu3  ;;  %1617 = vmatpush.bf16.msra.mxu1 %v4006_v31 }
 0x27e   :  { %v1246_v60 = vsel %vm1198_vm6, %v1174_v7, %v1222_v27  ;;  %v1123_v61 = vadd.f32 %v975_v3, %v4647_v10  ;;  %v1144_v10 = vadd.f32 %v1120_v40, %v4741_v41 }
 0x27f   :  { %v1274_v48 = vmul.f32 %v4759_v11, %v1246_v60 }
 0x280   :  { %v1147_v16 = vadd.f32 %v1123_v61, %v1070_v6  ;;  %v1173_v6 = vadd.f32 %v4753_v2, %v1145_v18  ;;  %v1172_v45 = vadd.f32 %v4753_v2, %v1144_v10 }
 0x281   :  { %v1302_v22 = vadd.f32 %v4766_v53, %v1274_v48  ;;  %1618 = vmatpush.bf16.msra.mxu1 %v4005_v47 }
 0x282   :  { %v1175_v25 = vadd.f32 %v4753_v2, %v1147_v16  ;;  %3349 = vmatmul.msk.bf16.gmra.mxu3 %vm816_vm4, %v4668_v59  ;;  %v1221_v41 = vmul.f32 0.01, %v1173_v6  ;;  %vm1197_vm8 = vcmp.gt.f32.partialorder %v1173_v6, 0.0  ;;  %v1220_v54 = vmul.f32 0.01, %v1172_v45 }
 0x283   :  { %v1326_v34 = vpack.c.bf16 %v1302_v22, %v1302_v22  ;;  %vm1196_vm9 = vcmp.gt.f32.partialorder %v1172_v45, 0.0  ;;  %v4010_v22 = vld [vmem:[#allocation2 + $0xa8] sm:$0xff] }
 0x284   :  { %vm1199_vm7 = vcmp.gt.f32.partialorder %v1175_v25, 0.0  ;;  %v1223_v39 = vmul.f32 0.01, %v1175_v25  ;;  %v1245_v58 = vsel %vm1197_vm8, %v1173_v6, %v1221_v41  ;;  %v1244_v27 = vsel %vm1196_vm9, %v1172_v45, %v1220_v54  ;;  %1674 = vmatpush.bf16.msrb.mxu2 %v4010_v22 }
 0x285   :  { %v978_v57 = vpop.f32.mrf.mxu3  ;;  %v1467_v62 = vunpack.c.l.b16 %v1326_v34  ;;  %v1273_v12 = vmul.f32 %v4759_v11, %v1245_v58  ;;  %v1272_v61 = vmul.f32 %v4759_v11, %v1244_v27  ;;  %v4016_v58 = vld [vmem:[#allocation2 + $0xd8] sm:$0xff] }
 0x286   :  { %v1247_v42 = vsel %vm1199_vm7, %v1175_v25, %v1223_v39  ;;  %v1124_v44 = vadd.f32 %v978_v57, %v4656_v32  ;;  %v1085_v39 = vpop.f32.mrf.mxu0 }
 0x287   :  { %v1275_v59 = vmul.f32 %v4759_v11, %v1247_v42  ;;  %v1300_v48 = vadd.f32 %v4766_v53, %v1272_v61 }
 0x288   :  { %v1148_v24 = vadd.f32 %v1124_v44, %v4771_v19 }
 0x289   :  { %v1303_v49 = vadd.f32 %v4766_v53, %v1275_v59  ;;  %v1324_v44 = vpack.c.bf16 %v1300_v48, %v1300_v48 }
 0x28a   :  { %v1176_v56 = vadd.f32 %v4753_v2, %v1148_v24 }
 0x28b   :  { %v1327_v15 = vpack.c.bf16 %v1303_v49, %v1303_v49 }
 0x28c   :  { %vm1200_vm10 = vcmp.gt.f32.partialorder %v1176_v56, 0.0  ;;  %v1224_v32 = vmul.f32 0.01, %v1176_v56 }
 0x28d   :  { %v980_v19 = vpop.f32.mrf.mxu3  ;;  %v1468_v63 = vunpack.c.l.b16 %v1327_v15 }
 0x28e   :  { %v1248_v4 = vsel %vm1200_vm10, %v1176_v56, %v1224_v32  ;;  %v1125_v7 = vadd.f32 %v980_v19, %v4663_v51  ;;  %v1301_v51 = vadd.f32 %v4766_v53, %v1273_v12  ;;  %v1365_v56 = vunpack.c.l.b16 %v1324_v44 }
 0x28f   :  { %v1469_v26 = vpack.c.b16 %v1468_v63, %v1467_v62  ;;  %v1276_v60 = vmul.f32 %v4759_v11, %v1248_v4  ;;  %v1088_v62 = vpop.f32.mrf.mxu0 }
 0x290   :  { %v1149_v3 = vadd.f32 %v1125_v7, %v4776_v50  ;;  %v1325_v6 = vpack.c.bf16 %v1301_v51, %v1301_v51  ;;  %v4015_v7 = vld [vmem:[#allocation2 + $0xd0] sm:$0xff] }
 0x291   :  { %3427 = vmatmul.msk.bf16.vlgmr.msrb.gmra.mxu1 %vm1392_vm5, %v1469_v26  ;;  %v1304_v50 = vadd.f32 %v4766_v53, %v1276_v60 }
 0x292   :  { %v1177_v40 = vadd.f32 %v4753_v2, %v1149_v3  ;;  %3350 = vmatmul.msk.bf16.gmra.mxu3 %vm816_vm4, %v4683_v20  ;;  %v1366_v24 = vunpack.c.l.b16 %v1325_v6  ;;  %1729 = vmatpush.bf16.msrb.mxu1 %v4016_v58  ;;  %v4020_v6 = vld [vmem:[#allocation2 + $0xf8] sm:$0xff] }
 0x293   :  { %v1328_v57 = vpack.c.bf16 %v1304_v50, %v1304_v50  ;;  %v4013_v50 = vld [vmem:[#allocation2 + $0xc0] sm:$0xff] }
 0x294   :  { %vm1201_vm11 = vcmp.gt.f32.partialorder %v1177_v40, 0.0  ;;  %v1225_v16 = vmul.f32 0.01, %v1177_v40  ;;  %v1367_v32 = vpack.c.b16 %v1366_v24, %v1365_v56 }
 0x295   :  { %v983_v18 = vpop.f32.mrf.mxu3  ;;  %v1524_v41 = vunpack.c.l.b16 %v1328_v57 }
 0x296   :  { %v1249_v25 = vsel %vm1201_vm11, %v1177_v40, %v1225_v16  ;;  %v1126_v10 = vadd.f32 %v983_v18, %v4672_v5  ;;  %v4009_v5 = vld [vmem:[#allocation2 + $0xa0] sm:$0xff]  ;;  %1730 = vmatpush.bf16.msrb.mxu1 %v4015_v7 }
 0x297   :  { %v1277_v36 = vmul.f32 %v4759_v11, %v1249_v25  ;;  %1675 = vmatpush.bf16.msrb.mxu2 %v4009_v5  ;;  %v1090_v51 = vpop.f32.mrf.mxu0  ;;  %v4018_v5 = vld [vmem:[#allocation2 + $0xe8] sm:$0xff] }
 0x298   :  { %v1150_v20 = vadd.f32 %v1126_v10, %v4782_v0 }
 0x299   :  { %v1305_v42 = vadd.f32 %v4766_v53, %v1277_v36 }
 0x29a   :  { %v1178_v45 = vadd.f32 %v4753_v2, %v1150_v20  ;;  %1731 = vmatpush.bf16.msrb.mxu1 %v4014_v13 }
 0x29b   :  { %v1329_v59 = vpack.c.bf16 %v1305_v42, %v1305_v42  ;;  %v4019_v42 = vld [vmem:[#allocation2 + $0xf0] sm:$0xff] }
 0x29c   :  { %vm1202_vm4 = vcmp.gt.f32.partialorder %v1178_v45, 0.0  ;;  %v1226_v31 = vmul.f32 0.01, %v1178_v45 }
 0x29d   :  { %v1525_v34 = vunpack.c.l.b16 %v1329_v59  ;;  %v985_v49 = vpop.f32.mrf.mxu3 }
 0x29e   :  { %v1250_v54 = vsel %vm1202_vm4, %v1178_v45, %v1226_v31  ;;  %v1127_v0 = vadd.f32 %v985_v49, %v4679_v14  ;;  %1732 = vmatpush.bf16.msrb.mxu1 %v4013_v50 }
 0x29f   :  { %v1526_v15 = vpack.c.b16 %v1525_v34, %v1524_v41  ;;  %v1278_v19 = vmul.f32 %v4759_v11, %v1250_v54  ;;  %v1093_v44 = vpop.f32.mrf.mxu0 }
 0x2a0   :  { %v1151_v47 = vadd.f32 %v1127_v0, %v4793_v52  ;;  %v4017_v0 = vld [vmem:[#allocation2 + $0xe0] sm:$0xff] }
 0x2a1   :  { %3444 = vmatmul.msk.bf16.vlgmr.msra.gmra.mxu2 %vm1392_vm5, %v1526_v15  ;;  %v1306_v14 = vadd.f32 %v4766_v53, %v1278_v19 }
 0x2a2   :  { %v1179_v63 = vadd.f32 %v4753_v2, %v1151_v47  ;;  %3393 = vmatmul.msk.bf16.vlgmr.msra.gmra.mxu3 %vm1392_vm5, %v1367_v32  ;;  %1786 = vmatpush.bf16.msra.mxu2 %v4020_v6 }
 0x2a3   :  { %v1330_v60 = vpack.c.bf16 %v1306_v14, %v1306_v14 }
 0x2a4   :  { %vm1203_vm12 = vcmp.gt.f32.partialorder %v1179_v63, 0.0  ;;  %v1227_v4 = vmul.f32 0.01, %v1179_v63 }
 0x2a5   :  { %v988_v27 = vpop.f32.mrf.mxu3  ;;  %v1581_v18 = vunpack.c.l.b16 %v1330_v60 }
 0x2a6   :  { %v1251_v26 = vsel %vm1203_vm12, %v1179_v63, %v1227_v4  ;;  %v1128_v52 = vadd.f32 %v988_v27, %v4687_v35  ;;  %1787 = vmatpush.bf16.msra.mxu2 %v4019_v42  ;;  %v4024_v4 = vld [vmem:[#allocation2 + $0x118] sm:$0xff]  ;;  %vm2054_vm12 = vcmask 15360  }
 0x2a7   :  { %v1279_v12 = vmul.f32 %v4759_v11, %v1251_v26  ;;  %v1095_v19 = vpop.f32.mrf.mxu0  ;;  %v4023_v26 = vld [vmem:[#allocation2 + $0x110] sm:$0xff] }
 0x2a8   :  { %v1152_v3 = vadd.f32 %v1128_v52, %v4804_v38 }
 0x2a9   :  { %v1307_v61 = vadd.f32 %v4766_v53, %v1279_v12 }
 0x2aa   :  { %v1180_v40 = vadd.f32 %v4753_v2, %v1152_v3  ;;  %1788 = vmatpush.bf16.msra.mxu2 %v4018_v5  ;;  %v4026_v5 = vld [vmem:[#allocation2 + $0x128] sm:$0xff] }
 0x2ab   :  { %v1331_v16 = vpack.c.bf16 %v1307_v61, %v1307_v61  ;;  %v4022_v61 = vld [vmem:[#allocation2 + $0x108] sm:$0xff] }
 0x2ac   :  { %vm1204_vm13 = vcmp.gt.f32.partialorder %v1180_v40, 0.0  ;;  %v1228_v17 = vmul.f32 0.01, %v1180_v40 }
 0x2ad   :  { %v1582_v48 = vunpack.c.l.b16 %v1331_v16  ;;  %v990_v35 = vpop.f32.mrf.mxu3 }
 0x2ae   :  { %v1252_v25 = vsel %vm1204_vm13, %v1180_v40, %v1228_v17  ;;  %v1129_v10 = vadd.f32 %v990_v35, %v4691_v9  ;;  %1789 = vmatpush.bf16.msra.mxu2 %v4017_v0  ;;  %v4025_v0 = vld [vmem:[#allocation2 + $0x120] sm:$0xff]  ;;  %vm2091_vm13 = vcmask 64512  }
 0x2af   :  { %v1583_v38 = vpack.c.b16 %v1582_v48, %v1581_v18  ;;  %v1280_v20 = vmul.f32 %v4759_v11, %v1252_v25  ;;  %v1098_v40 = vpop.f32.mrf.mxu0  ;;  %v4021_v48 = vld [vmem:[#allocation2 + $0x100] sm:$0xff] }
 0x2b0   :  { %v1153_v36 = vadd.f32 %v1129_v10, %v1085_v39 }
 0x2b1   :  { %3461 = vmatmul.msk.bf16.vlgmr.msra.gmra.mxu1 %vm1392_vm5, %v1583_v38  ;;  %v1308_v45 = vadd.f32 %v4766_v53, %v1280_v20  ;;  %v4028_v20 = vld [vmem:[#allocation2 + $0x138] sm:$0xff] }
 0x2b2   :  { %v1181_v22 = vadd.f32 %v4753_v2, %v1153_v36  ;;  %1843 = vmatpush.bf16.msra.mxu1 %v4024_v4 }
 0x2b3   :  { %v1332_v41 = vpack.c.bf16 %v1308_v45, %v1308_v45  ;;  %v4027_v45 = vld [vmem:[#allocation2 + $0x130] sm:$0xff] }
 0x2b4   :  { %vm1205_vm14 = vcmp.gt.f32.partialorder %v1181_v22, 0.0  ;;  %v1229_v57 = vmul.f32 0.01, %v1181_v22 }
 0x2b5   :  { %v993_v59 = vpop.f32.mrf.mxu3  ;;  %v1638_v15 = vunpack.c.l.b16 %v1332_v41 }
 0x2b6   :  { %v1253_v24 = vsel %vm1205_vm14, %v1181_v22, %v1229_v57  ;;  %v1130_v9 = vadd.f32 %v993_v59, %v4695_v55  ;;  %1844 = vmatpush.bf16.msra.mxu1 %v4023_v26 }
 0x2b7   :  { %v1281_v39 = vmul.f32 %v4759_v11, %v1253_v24  ;;  %v1100_v42 = vpop.f32.mrf.mxu0 }
 0x2b8   :  { %v1154_v31 = vadd.f32 %v1130_v9, %v1088_v62 }
 0x2b9   :  { %v1309_v34 = vadd.f32 %v4766_v53, %v1281_v39 }
 0x2ba   :  { %v1182_v49 = vadd.f32 %v4753_v2, %v1154_v31  ;;  %1845 = vmatpush.bf16.msra.mxu1 %v4022_v61 }
 0x2bb   :  { %v1333_v56 = vpack.c.bf16 %v1309_v34, %v1309_v34 }
 0x2bc   :  { %vm1206_vm15 = vcmp.gt.f32.partialorder %v1182_v49, 0.0  ;;  %v1230_v54 = vmul.f32 0.01, %v1182_v49 }
 0x2bd   :  { %v1639_v32 = vunpack.c.l.b16 %v1333_v56  ;;  %v995_v47 = vpop.f32.mrf.mxu3 }
 0x2be   :  { %v1254_v58 = vsel %vm1206_vm15, %v1182_v49, %v1230_v54  ;;  %v1131_v55 = vadd.f32 %v995_v47, %v4699_v21  ;;  %1846 = vmatpush.bf16.msra.mxu1 %v4021_v48 }
 0x2bf   :  { %v1640_v62 = vpack.c.b16 %v1639_v32, %v1638_v15  ;;  %v1282_v7 = vmul.f32 %v4759_v11, %v1254_v58  ;;  %v1103_v15 = vpop.f32.mrf.mxu0 }
 0x2c0   :  { %v1155_v63 = vadd.f32 %v1131_v55, %v1090_v51 }
 0x2c1   :  { %3478 = vmatmul.msk.bf16.vlgmr.msrb.gmra.mxu2 %vm1392_vm5, %v1640_v62  ;;  %v1310_v52 = vadd.f32 %v4766_v53, %v1282_v7 }
 0x2c2   :  { %v1183_v14 = vadd.f32 %v4753_v2, %v1155_v63  ;;  %1900 = vmatpush.bf16.msrb.mxu2 %v4028_v20  ;;  %v4032_v63 = vld [vmem:[#allocation2 + $0x158] sm:$0xff] }
 0x2c3   :  { %v1334_v51 = vpack.c.bf16 %v1310_v52, %v1310_v52 }
 0x2c4   :  { %vm1207_vm1 = vcmp.gt.f32.partialorder %v1183_v14, 0.0  ;;  %v1231_v27 = vmul.f32 0.01, %v1183_v14 }
 0x2c5   :  { %v998_v12 = vpop.f32.mrf.mxu3  ;;  %v1695_v35 = vunpack.c.l.b16 %v1334_v51 }
 0x2c6   :  { %v1255_v3 = vsel %vm1207_vm1, %v1183_v14, %v1231_v27  ;;  %v1132_v21 = vadd.f32 %v998_v12, %v4703_v28  ;;  %1901 = vmatpush.bf16.msrb.mxu2 %v4027_v45  ;;  %v4031_v27 = vld [vmem:[#allocation2 + $0x150] sm:$0xff] }
 0x2c7   :  { %v1283_v13 = vmul.f32 %v4759_v11, %v1255_v3  ;;  %v1105_v3 = vpop.f32.mrf.mxu0 }
 0x2c8   :  { %v1156_v60 = vadd.f32 %v1132_v21, %v1093_v44 }
 0x2c9   :  { %v1311_v16 = vadd.f32 %v4766_v53, %v1283_v13 }
 0x2ca   :  { %v1184_v17 = vadd.f32 %v4753_v2, %v1156_v60  ;;  %1902 = vmatpush.bf16.msrb.mxu2 %v4026_v5  ;;  %v4030_v60 = vld [vmem:[#allocation2 + $0x148] sm:$0xff] }
 0x2cb   :  { %v1335_v50 = vpack.c.bf16 %v1311_v16, %v1311_v16 }
 0x2cc   :  { %vm1208_vm2 = vcmp.gt.f32.partialorder %v1184_v17, 0.0  ;;  %v1232_v18 = vmul.f32 0.01, %v1184_v17 }
 0x2cd   :  { %v1696_v25 = vunpack.c.l.b16 %v1335_v50  ;;  %v1000_v10 = vpop.f32.mrf.mxu3  ;;  %v4029_v50 = vld [vmem:[#allocation2 + $0x140] sm:$0xff] }
 0x2ce   :  { %v1256_v28 = vsel %vm1208_vm2, %v1184_v17, %v1232_v18  ;;  %v1133_v38 = vadd.f32 %v1000_v10, %v4707_v29  ;;  %1903 = vmatpush.bf16.msrb.mxu2 %v4025_v0 }
 0x2cf   :  { %v1697_v36 = vpack.c.b16 %v1696_v25, %v1695_v35  ;;  %v1284_v22 = vmul.f32 %v4759_v11, %v1256_v28 }
 0x2d0   :  { %v1157_v6 = vadd.f32 %v1133_v38, %v1095_v19  ;;  %v4036_v38 = vld [vmem:[#allocation2 + $0x178] sm:$0xff] }
 0x2d1   :  { %3495 = vmatmul.msk.bf16.vlgmr.msrb.gmra.mxu1 %vm1392_vm5, %v1697_v36  ;;  %v1312_v59 = vadd.f32 %v4766_v53, %v1284_v22  ;;  %v1108_v36 = vpop.f32.mrf.mxu0 }
 0x2d2   :  { %v1185_v57 = vadd.f32 %v4753_v2, %v1157_v6  ;;  %1957 = vmatpush.bf16.msrb.mxu1 %v4032_v63 }
 0x2d3   :  { %v1336_v41 = vpack.c.bf16 %v1312_v59, %v1312_v59 }
 0x2d4   :  { %vm1209_vm3 = vcmp.gt.f32.partialorder %v1185_v57, 0.0  ;;  %v1233_v44 = vmul.f32 0.01, %v1185_v57 }
 0x2d5   :  { %v1003_v24 = vpop.f32.mrf.mxu3  ;;  %v1752_v32 = vunpack.c.l.b16 %v1336_v41 }
 0x2d6   :  { %v1257_v9 = vsel %vm1209_vm3, %v1185_v57, %v1233_v44  ;;  %v1134_v29 = vadd.f32 %v1003_v24, %v4711_v1  ;;  %1958 = vmatpush.bf16.msrb.mxu1 %v4031_v27  ;;  %v4035_v57 = vld [vmem:[#allocation2 + $0x170] sm:$0xff]  ;;  %vm2222_vm3 = vcmask 130048  }
 0x2d7   :  { %v1285_v39 = vmul.f32 %v4759_v11, %v1257_v9  ;;  %v4034_v9 = vld [vmem:[#allocation2 + $0x168] sm:$0xff] }
 0x2d8   :  { %v1158_v31 = vadd.f32 %v1134_v29, %v1098_v40 }
 0x2d9   :  { %v1313_v34 = vadd.f32 %v4766_v53, %v1285_v39  ;;  %v1110_v5 = vpop.f32.mrf.mxu0 }
 0x2da   :  { %v1186_v49 = vadd.f32 %v4753_v2, %v1158_v31  ;;  %1959 = vmatpush.bf16.msrb.mxu1 %v4030_v60 }
 0x2db   :  { %v1337_v56 = vpack.c.bf16 %v1313_v34, %v1313_v34 }
 0x2dc   :  { %vm1210_vm6 = vcmp.gt.f32.partialorder %v1186_v49, 0.0  ;;  %v1234_v54 = vmul.f32 0.01, %v1186_v49 }
 0x2dd   :  { %v1753_v47 = vunpack.c.l.b16 %v1337_v56  ;;  %v1005_v58 = vpop.f32.mrf.mxu3 }
 0x2de   :  { %v1258_v1 = vsel %vm1210_vm6, %v1186_v49, %v1234_v54  ;;  %v1135_v55 = vadd.f32 %v1005_v58, %v4715_v30  ;;  %1960 = vmatpush.bf16.msrb.mxu1 %v4029_v50  ;;  %v4033_v49 = vld [vmem:[#allocation2 + $0x160] sm:$0xff] }
 0x2df   :  { %v1754_v19 = vpack.c.b16 %v1753_v47, %v1752_v32  ;;  %v1286_v4 = vmul.f32 %v4759_v11, %v1258_v1  ;;  %v2053_v47 = vld [vmem:[%s5149_s2] sm:$0x3] }
 0x2e0   :  { %v1159_v62 = vadd.f32 %v1135_v55, %v1100_v42 }
 0x2e1   :  { %3512 = vmatmul.msk.bf16.vlgmr.msra.gmra.mxu2 %vm1392_vm5, %v1754_v19  ;;  %v1314_v26 = vadd.f32 %v4766_v53, %v1286_v4 }
 0x2e2   :  { %v1187_v7 = vadd.f32 %v4753_v2, %v1159_v62  ;;  %2014 = vmatpush.bf16.msra.mxu2 %v4036_v38  ;;  %v1113_v62 = vpop.f32.mrf.mxu0 }
 0x2e3   :  { %v1338_v61 = vpack.c.bf16 %v1314_v26, %v1314_v26 }
 0x2e4   :  { %vm1211_vm7 = vcmp.gt.f32.partialorder %v1187_v7, 0.0  ;;  %v1235_v14 = vmul.f32 0.01, %v1187_v7 }
 0x2e5   :  { %v1008_v52 = vpop.f32.mrf.mxu3  ;;  %v1809_v18 = vunpack.c.l.b16 %v1338_v61 }
 0x2e6   :  { %v1259_v12 = vsel %vm1211_vm7, %v1187_v7, %v1235_v14  ;;  %v1136_v30 = vadd.f32 %v1008_v52, %v4719_v23  ;;  %2015 = vmatpush.bf16.msra.mxu2 %v4035_v57 }
 0x2e7   :  { %v1287_v21 = vmul.f32 %v4759_v11, %v1259_v12 }
 0x2e8   :  { %v1160_v13 = vadd.f32 %v1136_v30, %v1103_v15 }
 0x2e9   :  { %v1315_v40 = vadd.f32 %v4766_v53, %v1287_v21 }
 0x2ea   :  { %v1188_v51 = vadd.f32 %v4753_v2, %v1160_v13  ;;  %2016 = vmatpush.bf16.msra.mxu2 %v4034_v9 }
 0x2eb   :  { %v1339_v16 = vpack.c.bf16 %v1315_v40, %v1315_v40 }
 0x2ec   :  { %vm1212_vm8 = vcmp.gt.f32.partialorder %v1188_v51, 0.0  ;;  %v1236_v17 = vmul.f32 0.01, %v1188_v51 }
 0x2ed   :  { %v1810_v48 = vunpack.c.l.b16 %v1339_v16  ;;  %v1010_v35 = vpop.f32.mrf.mxu3 }
 0x2ee   :  { %v1260_v23 = vsel %vm1212_vm8, %v1188_v51, %v1236_v17  ;;  %v1137_v25 = vadd.f32 %v1010_v35, %v4723_v33  ;;  %2017 = vmatpush.bf16.msra.mxu2 %v4033_v49  ;;  %v1115_v51 = vpop.f32.mrf.mxu0  ;;  %v4044_v49 = vld [vmem:[%s5113_s17 + $0x38] sm:$0xff] }
 0x2ef   :  { %v1811_v10 = vpack.c.b16 %v1810_v48, %v1809_v18  ;;  %v1288_v6 = vmul.f32 %v4759_v11, %v1260_v23 }
 0x2f0   :  { %v1161_v28 = vadd.f32 %v1137_v25, %v1105_v3 }
 0x2f1   :  { %3529 = vmatmul.msk.bf16.vlgmr.msra.gmra.mxu1 %vm1392_vm5, %v1811_v10  ;;  %v1316_v42 = vadd.f32 %v4766_v53, %v1288_v6 }
 0x2f2   :  { %v1189_v20 = vadd.f32 %v4753_v2, %v1161_v28  ;;  %3581 = vmatpush.msk.msra.mxu1 %vm281_vm0, %v2053_v47 }
 0x2f3   :  { %v1340_v29 = vpack.c.bf16 %v1316_v42, %v1316_v42 }
 0x2f4   :  { %vm1213_vm9 = vcmp.gt.f32.partialorder %v1189_v20, 0.0  ;;  %v1237_v22 = vmul.f32 0.01, %v1189_v20  ;;  %v1451_v28 = vpop.f32.mrf.mxu2 }
 0x2f5   :  { %v1013_v44 = vpop.f32.mrf.mxu3  ;;  %v1866_v56 = vunpack.c.l.b16 %v1340_v29 }
 0x2f6   :  { %v1261_v45 = vsel %vm1213_vm9, %v1189_v20, %v1237_v22  ;;  %v1138_v33 = vadd.f32 %v1013_v44, %v4727_v46 }
 0x2f7   :  { %v1289_v59 = vmul.f32 %v4759_v11, %v1261_v45 }
 0x2f8   :  { %v1162_v24 = vadd.f32 %v1138_v33, %v1108_v36 }
 0x2f9   :  { %v1317_v39 = vadd.f32 %v4766_v53, %v1289_v59 }
 0x2fa   :  { %v1190_v31 = vadd.f32 %v4753_v2, %v1162_v24 }
 0x2fb   :  { %v1341_v41 = vpack.c.bf16 %v1317_v39, %v1317_v39 }
 0x2fc   :  { %vm1214_vm10 = vcmp.gt.f32.partialorder %v1190_v31, 0.0  ;;  %v1238_v34 = vmul.f32 0.01, %v1190_v31  ;;  %v1453_v42 = vpop.f32.mrf.mxu2 }
 0x2fd   :  { %v1867_v54 = vunpack.c.l.b16 %v1341_v41  ;;  %v1015_v0 = vpop.f32.mrf.mxu3 }
 0x2fe   :  { %v1262_v46 = vsel %vm1214_vm10, %v1190_v31, %v1238_v34  ;;  %v1139_v15 = vadd.f32 %v1015_v0, %v4729_v37  ;;  %v4043_v0 = vld [vmem:[%s5113_s17 + $0x30] sm:$0xff] }
 0x2ff   :  { %v1868_v32 = vpack.c.b16 %v1867_v54, %v1866_v56  ;;  %v1290_v1 = vmul.f32 %v4759_v11, %v1262_v46 }
 0x300   :  { %v1163_v58 = vadd.f32 %v1139_v15, %v1110_v5  ;;  %v4042_v15 = vld [vmem:[%s5113_s17 + $0x28] sm:$0xff] }
 0x301   :  { %3546 = vmatmul.msk.bf16.vlgmr.msrb.gmra.mxu2 %vm1392_vm5, %v1868_v32  ;;  %v1318_v37 = vadd.f32 %v4766_v53, %v1290_v1  ;;  %v4041_v32 = vld [vmem:[%s5113_s17 + $0x20] sm:$0xff] }
 0x302   :  { %v1191_v55 = vadd.f32 %v4753_v2, %v1163_v58  ;;  %2182 = vmatpush.bf16.msrb.mxu2 %v4044_v49  ;;  %v4040_v58 = vld [vmem:[%s5113_s17 + $0x18] sm:$0xff]  ;;  %v2099_v49 = vld [vmem:[%s5112_s16 + $0x8] sm:$0xff] }
 0x303   :  { %v1342_v26 = vpack.c.bf16 %v1318_v37, %v1318_v37 }
 0x304   :  { %vm1215_vm11 = vcmp.gt.f32.partialorder %v1191_v55, 0.0  ;;  %v1239_v19 = vmul.f32 0.01, %v1191_v55 }
 0x305   :  { %v1018_v63 = vpop.f32.mrf.mxu3  ;;  %v1923_v21 = vunpack.c.l.b16 %v1342_v26 }
 0x306   :  { %v1263_v4 = vsel %vm1215_vm11, %v1191_v55, %v1239_v19  ;;  %v1140_v7 = vadd.f32 %v1018_v63, %v4733_v8  ;;  %2183 = vmatpush.bf16.msrb.mxu2 %v4043_v0  ;;  %v4039_v55 = vld [vmem:[%s5113_s17 + $0x10] sm:$0xff]  ;;  %v4143_v0 = vld [vmem:[%s5114_s18] ss:$0 sm:$0xff] }
 0x307   :  { %v1291_v14 = vmul.f32 %v4759_v11, %v1263_v4 }
 0x308   :  { %v1164_v27 = vadd.f32 %v1140_v7, %v1113_v62  ;;  %v4038_v62 = vld [vmem:[%s5113_s17 + $0x8] sm:$0xff]  ;;  %v4037_v7 = vld [vmem:[%s5113_s17] sm:$0xff] }
 0x309   :  { %v1319_v52 = vadd.f32 %v4766_v53, %v1291_v14 }
 0x30a   :  { %v1192_v12 = vadd.f32 %v4753_v2, %v1164_v27  ;;  %2184 = vmatpush.bf16.msrb.mxu2 %v4042_v15 }
 0x30b   :  { %v1343_v30 = vpack.c.bf16 %v1319_v52, %v1319_v52 }
 0x30c   :  { %vm1216_vm0 = vcmp.gt.f32.partialorder %v1192_v12, 0.0  ;;  %v1240_v3 = vmul.f32 0.01, %v1192_v12 }
 0x30d   :  { %v1924_v13 = vunpack.c.l.b16 %v1343_v30  ;;  %v1020_v60 = vpop.f32.mrf.mxu3  ;;  %v2087_v30 = vld [vmem:[%s5111_s15] sm:$0xff] }
 0x30e   :  { %v1264_v61 = vsel %vm1216_vm0, %v1192_v12, %v1240_v3  ;;  %v1141_v40 = vadd.f32 %v1020_v60, %v4735_v43  ;;  %v1506_v36 = vpop.f32.mrf.mxu1  ;;  %2185 = vmatpush.bf16.msrb.mxu2 %v4041_v32  ;;  %v4144_v32 = vld [vmem:[%s5115_s19] ss:$0 sm:$0xff] }
 0x30f   :  { %v1925_v16 = vpack.c.b16 %v1924_v13, %v1923_v21  ;;  %v1292_v17 = vmul.f32 %v4759_v11, %v1264_v61 }
 0x310   :  { %v1165_v8 = vadd.f32 %v1141_v40, %v1115_v51 }
 0x311   :  { %3563 = vmatmul.msk.bf16.vlgmr.msrb.gmra.mxu1 %vm1392_vm5, %v1925_v16  ;;  %v1320_v48 = vadd.f32 %v4766_v53, %v1292_v17 }
 0x312   :  { %v1193_v50 = vadd.f32 %v4753_v2, %v1165_v8  ;;  %v2051_v2 = vld [vmem:[%s5110_s14] sm:$0xff]  ;;  %2186 = vmatpush.bf16.msrb.mxu2 %v4040_v58 }
 0x313   :  { %v1344_v10 = vpack.c.bf16 %v1320_v48, %v1320_v48 }
 0x314   :  { %vm1217_vm4 = vcmp.gt.f32.partialorder %v1193_v50, 0.0  ;;  %v1241_v18 = vmul.f32 0.01, %v1193_v50 }
 0x315   :  { %v1023_v35 = vpop.f32.mrf.mxu3  ;;  %v1980_v6 = vunpack.c.l.b16 %v1344_v10 }
 0x316   :  { %v1265_v23 = vsel %vm1217_vm4, %v1193_v50, %v1241_v18  ;;  %v1508_v44 = vpop.f32.mrf.mxu1  ;;  %2187 = vmatpush.bf16.msrb.mxu2 %v4039_v55  ;;  %v4140_v18 = vld [vmem:[%s5150_s23] ss:$0 sm:$0xff]  ;;  %v2088_v35 = vld [vmem:[%s5111_s15 + $0x8] sm:$0xff] }
 0x317   :  { %v1293_v25 = vmul.f32 %v4759_v11, %v1265_v23 }
 0x319   :  { %v1321_v43 = vadd.f32 %v4766_v53, %v1293_v25  ;;  %v2052_v53 = vld [vmem:[%s5110_s14 + $0x8] sm:$0xff] }
 0x31a   :  { %2188 = vmatpush.bf16.msrb.mxu2 %v4038_v62 }
 0x31b   :  { %v1345_v38 = vpack.c.bf16 %v1321_v43, %v1321_v43 }
 0x31d   :  { %v1981_v20 = vunpack.c.l.b16 %v1345_v38  ;;  %v1024_v22 = vpop.f32.mrf.mxu3 }
 0x31e   :  { %2189 = vmatpush.bf16.msrb.mxu2 %v4037_v7  ;;  %v4060_v7 = vld [vmem:[#allocation4 + $0x74] sm:$0xf0] }
 0x31f   :  { %v1982_v57 = vpack.c.b16 %v1981_v20, %v1980_v6 }
 0x321   :  { %3580 = vmatmul.msk.bf16.vlgmr.msra.gmra.mxu2 %vm1392_vm5, %v1982_v57  ;;  %3582 = vmatmul.msk.f32.vlgmr.msra.gmra.mxu1 %vm2054_vm12, %v2051_v2 }
 0x324   :  { %v1563_v59 = vpop.f32.mrf.mxu2 }
 0x325   :  { %v1405_v11 = vpop.f32.mrf.mxu3 }
 0x326   :  { %v1452_v45 = vadd.f32 %v1451_v28, %v1405_v11 }
 0x328   :  { %v1511_v33 = vadd.f32 %v1506_v36, %v1452_v45 }
 0x329   :  { %3583 = vmatmul.msk.f32.gmra.mxu1 %vm2054_vm12, %v2052_v53 }
 0x32a   :  { %v1568_v24 = vadd.f32 %v1563_v59, %v1511_v33  ;;  %v4142_v33 = vld [vmem:[%s5109_s13] ss:$0 sm:$0xff] }
 0x32c   :  { %v1565_v31 = vpop.f32.mrf.mxu2 }
 0x32d   :  { %v1407_v37 = vpop.f32.mrf.mxu3 }
 0x32e   :  { %v1620_v9 = vpop.f32.mrf.mxu1  ;;  %v1454_v4 = vadd.f32 %v1453_v42, %v1407_v37  ;;  %v4141_v42 = vld [vmem:[%s5108_s12] ss:$0 sm:$0xff] }
 0x32f   :  { %v1625_v29 = vadd.f32 %v1620_v9, %v1568_v24 }
 0x330   :  { %v1512_v27 = vadd.f32 %v1508_v44, %v1454_v4  ;;  %v3645_v4 = vld [vmem:[#allocation4 + $0x70] sm:$0xf] }
 0x332   :  { %v1569_v3 = vadd.f32 %v1565_v31, %v1512_v27  ;;  %v4206_v31 = vmov 0   ;;  %v3646_v27 = vor.u32 %v4060_v7, %v3645_v4  ;;  %v4068_v4 = vld [vmem:[#allocation4 + $0xb4] sm:$0xf0] }
 0x333   :  { %4132 = vset.pattern.permute.xlu1 %v4206_v31  ;;  %4133 = vset.pattern.permute.xlu0 %v4206_v31 }
 0x334   :  { %2323 = vmatpush.bf16.msra.mxu2 %v3646_v27 }
 0x336   :  { %v1622_v39 = vpop.f32.mrf.mxu1 }
 0x337   :  { %v1626_v60 = vadd.f32 %v1622_v39, %v1569_v3 }
 0x344   :  { %v1677_v41 = vpop.f32.mrf.mxu2 }
 0x345   :  { %v1682_v26 = vadd.f32 %v1677_v41, %v1625_v29 }
 0x34c   :  { %v1679_v56 = vpop.f32.mrf.mxu2 }
 0x34d   :  { %v1683_v51 = vadd.f32 %v1679_v56, %v1626_v60 }
 0x34e   :  { %v1734_v5 = vpop.f32.mrf.mxu1 }
 0x34f   :  { %v1739_v52 = vadd.f32 %v1734_v5, %v1682_v26  ;;  %v2098_v5 = vld [vmem:[%s5112_s16] sm:$0xff] }
 0x350   :  { %v3637_v26 = vld [vmem:[#allocation4 + $0x60] sm:$0xf] }
 0x356   :  { %v1736_v34 = vpop.f32.mrf.mxu1 }
 0x357   :  { %v1740_v17 = vadd.f32 %v1736_v34, %v1683_v51 }
 0x364   :  { %v1791_v46 = vpop.f32.mrf.mxu2 }
 0x365   :  { %v1796_v21 = vadd.f32 %v1791_v46, %v1739_v52  ;;  %v4058_v52 = vld [vmem:[#allocation4 + $0x64] sm:$0xf0] }
 0x366   :  { %v3638_v3 = vor.u32 %v4058_v52, %v3637_v26  ;;  %v3707_v26 = vld [vmem:[#allocation4 + $0xa0] sm:$0xf]  ;;  %v4066_v52 = vld [vmem:[#allocation4 + $0xa4] sm:$0xf0] }
 0x368   :  { %2324 = vmatpush.bf16.msra.mxu2 %v3638_v3  ;;  %v4064_v3 = vld [vmem:[#allocation4 + $0x94] sm:$0xf0] }
 0x36c   :  { %v1793_v1 = vpop.f32.mrf.mxu2 }
 0x36d   :  { %v1797_v23 = vadd.f32 %v1793_v1, %v1740_v17  ;;  %v3647_v17 = vld [vmem:[#allocation4 + $0x78] sm:$0xf0] }
 0x36e   :  { %v1848_v54 = vpop.f32.mrf.mxu1 }
 0x36f   :  { %v1853_v61 = vadd.f32 %v1848_v54, %v1796_v21 }
 0x376   :  { %v1850_v47 = vpop.f32.mrf.mxu1 }
 0x377   :  { %v1854_v43 = vadd.f32 %v1850_v47, %v1797_v23  ;;  %v4057_v23 = vld [vmem:[#allocation4 + $0x64] sm:$0xf] }
 0x384   :  { %v1905_v63 = vpop.f32.mrf.mxu2 }
 0x385   :  { %v1910_v16 = vadd.f32 %v1905_v63, %v1853_v61 }
 0x38c   :  { %v1907_v12 = vpop.f32.mrf.mxu2 }
 0x38d   :  { %v1911_v36 = vadd.f32 %v1907_v12, %v1854_v43  ;;  %v3629_v43 = vld [vmem:[#allocation4 + $0x50] sm:$0xf] }
 0x38e   :  { %v1962_v19 = vpop.f32.mrf.mxu1 }
 0x38f   :  { %v1967_v50 = vadd.f32 %v1962_v19, %v1910_v16 }
 0x396   :  { %v1964_v14 = vpop.f32.mrf.mxu1 }
 0x397   :  { %v1968_v20 = vadd.f32 %v1964_v14, %v1911_v36  ;;  %v4145_v14 = vld [vmem:[%s5116_s20] ss:$0 sm:$0xff]  ;;  %v4055_v36 = vld [vmem:[#allocation4 + $0x54] sm:$0xf] }
 0x39e   :  { %v2081_v13 = vpop.f32.mrf.mxu1 }
 0x39f   :  { %v2089_v40 = vmul.f32 %v2087_v30, %v2081_v13  ;;  %v4146_v13 = vld [vmem:[%s5117_s21] ss:$0 sm:$0xff] }
 0x3a1   :  { %v2092_v8 = vsel %vm2091_vm13, %v2089_v40, 0.0 }
 0x3a2   :  { %2093 = vadd.xlane.f32.xlu0 %v2092_v8  ;;  %v4059_v8 = vld [vmem:[#allocation4 + $0x74] sm:$0xf] }
 0x3a4   :  { %v2019_v48 = vpop.f32.mrf.mxu2 }
 0x3a5   :  { %v2024_v25 = vadd.f32 %v2019_v48, %v1967_v50  ;;  %v3650_v48 = vor.u32 %v4059_v8, %v3647_v17  ;;  %v4067_v8 = vld [vmem:[#allocation4 + $0xb4] sm:$0xf]  ;;  %v3717_v17 = vld [vmem:[#allocation4 + $0xb8] sm:$0xf0] }
 0x3a6   :  { %v2084_v10 = vpop.f32.mrf.mxu1 }
 0x3a7   :  { %v2030_v28 = vadd.f32 %v4140_v18, %v2024_v25  ;;  %v2090_v38 = vmul.f32 %v2088_v35, %v2084_v10  ;;  %v3617_v35 = vld [vmem:[%s5118_s22 + $0x1] sm:$0x1]  ;;  %v3639_v25 = vld [vmem:[#allocation4 + $0x68] sm:$0xf0] }
 0x3a8   :  { %v3642_v10 = vor.u32 %v4057_v23, %v3639_v25  ;;  %v4063_v25 = vld [vmem:[#allocation4 + $0x94] sm:$0xf] }
 0x3a9   :  { %v2095_v6 = vsel %vm2091_vm13, %v2090_v38, 0.0  ;;  %v2034_v22 = vmul.f32 0.01, %v2030_v28  ;;  %vm2032_vm14 = vcmp.gt.f32.partialorder %v2030_v28, 0.0 }
 0x3aa   :  { %2096 = vadd.xlane.f32.xlu0 %v2095_v6  ;;  %v3631_v6 = vld [vmem:[#allocation4 + $0x58] sm:$0xf0] }
 0x3ab   :  { %v2036_v11 = vsel %vm2032_vm14, %v2030_v28, %v2034_v22  ;;  %v4056_v28 = vld [vmem:[#allocation4 + $0x54] sm:$0xf0]  ;;  %v3634_v22 = vor.u32 %v4055_v36, %v3631_v6  ;;  %v3693_v36 = vld [vmem:[#allocation4 + $0x88] sm:$0xf0] }
 0x3ac   :  { %v2021_v2 = vpop.f32.mrf.mxu2  ;;  %v2042_v53 = vmul.f32 %v4141_v42, %v2036_v11  ;;  %v3630_v38 = vor.u32 %v4056_v28, %v3629_v43 }
 0x3ad   :  { %v2025_v57 = vadd.f32 %v2021_v2, %v1968_v20  ;;  %v3621_v20 = vld [vmem:[#allocation4 + $0x40] sm:$0xf]  ;;  %v4054_v2 = vld [vmem:[#allocation4 + $0x44] sm:$0xf0] }
 0x3ae   :  { %v2048_v9 = vadd.f32 %v4142_v33, %v2042_v53  ;;  %2325 = vmatpush.bf16.msra.mxu2 %v3630_v38  ;;  %v3622_v11 = vor.u32 %v4054_v2, %v3621_v20  ;;  %v3623_v53 = vld [vmem:[#allocation4 + $0x48] sm:$0xf0]  ;;  %v4061_v38 = vld [vmem:[#allocation4 + $0x84] sm:$0xf] }
 0x3af   :  { %v2031_v44 = vadd.f32 %v4140_v18, %v2025_v57  ;;  %v2221_v18 = vld [vmem:[%s5118_s22] sm:$0x1]  ;;  %v3679_v57 = vld [vmem:[#allocation4 + $0x30] sm:$0xf]  ;;  %v3696_v6 = vor.u32 %v4061_v38, %v3693_v36  ;;  %v4078_v36 = vld [vmem:[#allocation4 + $0x104] sm:$0xf0] }
 0x3b0   :  { %v3763_v38 = vld [vmem:[#allocation4 + $0x100] sm:$0xf] }
 0x3b1   :  { %vm2033_vm15 = vcmp.gt.f32.partialorder %v2031_v44, 0.0  ;;  %v2035_v45 = vmul.f32 0.01, %v2031_v44 }
 0x3b2   :  { %2326 = vmatpush.bf16.msra.mxu2 %v3622_v11 }
 0x3b3   :  { %v2037_v59 = vsel %vm2033_vm15, %v2031_v44, %v2035_v45  ;;  %v4053_v45 = vld [vmem:[#allocation4 + $0x44] sm:$0xf] }
 0x3b4   :  { %v2043_v24 = vmul.f32 %v4141_v42, %v2037_v59  ;;  %v4052_v42 = vld [vmem:[#allocation4 + $0x34] sm:$0xf0]  ;;  %v4051_v59 = vld [vmem:[#allocation4 + $0x34] sm:$0xf] }
 0x3b5   :  { %v3680_v44 = vor.u32 %v4052_v42, %v3679_v57 }
 0x3b6   :  { %v2049_v29 = vadd.f32 %v4142_v33, %v2043_v24  ;;  %v3626_v33 = vor.u32 %v4053_v45, %v3623_v53  ;;  %v3681_v24 = vld [vmem:[#allocation4 + $0x38] sm:$0xf0] }
 0x3b8   :  { %v2050_v39 = vpack.c.bf16 %v2049_v29, %v2048_v9  ;;  %v3684_v9 = vor.u32 %v4051_v59, %v3681_v24  ;;  %v3671_v29 = vld [vmem:[#allocation4 + $0x20] sm:$0xf]  ;;  %v3795_v24 = vld [vmem:[%s5118_s22 + $0x5] sm:$0x1] }
 0x3ba   :  { %2190 = vmatmul.bf16.vlgmr.msrb.gmra.mxu2 %v2050_v39  ;;  %v4050_v39 = vld [vmem:[#allocation4 + $0x24] sm:$0xf0] }
 0x3bb   :  { %2392 = vmatpush.bf16.msrb.mxu2 %v3680_v44  ;;  %v3672_v31 = vor.u32 %v4050_v39, %v3671_v29  ;;  %v3753_v29 = vld [vmem:[#allocation4 + $0xf8] sm:$0xf0] }
 0x3bf   :  { %2393 = vmatpush.bf16.msrb.mxu2 %v3672_v31  ;;  %v3751_v31 = vld [vmem:[#allocation4 + $0xf0] sm:$0xf] }
 0x415   :  { %v2094_v41 = vpop.xlane.xlu0 %2093 }
 0x416   :  { %v2100_v34 = vadd.f32 %v2098_v5, %v2094_v41  ;;  %v4049_v5 = vld [vmem:[#allocation4 + $0x24] sm:$0xf]  ;;  %v3673_v41 = vld [vmem:[#allocation4 + $0x28] sm:$0xf0] }
 0x418   :  { %2121 = vperm.xlu1 %4132, %v2100_v34   ;;  %v3663_v34 = vld [vmem:[#allocation4 + $0x10] sm:$0xf] }
 0x41d   :  { %v2097_v56 = vpop.xlane.xlu0 %2096 }
 0x41e   :  { %v2101_v54 = vadd.f32 %v2099_v49, %v2097_v56  ;;  %v3676_v49 = vor.u32 %v4049_v5, %v3673_v41  ;;  %v4048_v56 = vld [vmem:[#allocation4 + $0x14] sm:$0xf0]  ;;  %v4073_v41 = vld [vmem:[#allocation4 + $0xe4] sm:$0xf] }
 0x41f   :  { %v4076_v5 = vld [vmem:[#allocation4 + $0xf4] sm:$0xf0] }
 0x420   :  { %2126 = vperm.xlu1 %4132, %v2101_v54   ;;  %v3664_v54 = vor.u32 %v4048_v56, %v3663_v34  ;;  %v3752_v34 = vor.u32 %v4076_v5, %v3751_v31  ;;  %v4086_v31 = vld [vmem:[#allocation4 + $0x144] sm:$0xf0] }
 0x422   :  { %2394 = vmatpush.bf16.msrb.mxu2 %v3664_v54 }
 0x43d   :  { %v2191_v46 = vpop.f32.mrf.mxu2 }
 0x445   :  { %v2193_v37 = vpop.f32.mrf.mxu2 }
 0x48a   :  { %v2122_v15 = vpop.permute.xlu1 %2121 }
 0x48b   :  { %v2132_v47 = vmul.f32 %v4143_v0, %v2122_v15 }
 0x48d   :  { %v2192_v58 = vadd.f32 %v2191_v46, %v2132_v47  ;;  %v3665_v46 = vld [vmem:[#allocation4 + $0x18] sm:$0xf0]  ;;  %v4046_v47 = vld [vmem:[#allocation4 + $0x4] sm:$0xf0] }
 0x48f   :  { %v2200_v1 = vadd.f32 %v4144_v32, %v2192_v58 }
 0x491   :  { %v2204_v19 = vmul.f32 0.01, %v2200_v1  ;;  %vm2202_vm1 = vcmp.gt.f32.partialorder %v2200_v1, 0.0 }
 0x492   :  { %v2127_v55 = vpop.permute.xlu1 %2126 }
 0x493   :  { %v2133_v62 = vmul.f32 %v4143_v0, %v2127_v55  ;;  %v2206_v12 = vsel %vm2202_vm1, %v2200_v1, %v2204_v19  ;;  %v4047_v0 = vld [vmem:[#allocation4 + $0x14] sm:$0xf]  ;;  %v4045_v1 = vld [vmem:[#allocation4 + $0x4] sm:$0xf]  ;;  %v3657_v55 = vld [vmem:[#allocation4 + $0x8] sm:$0xf0] }
 0x494   :  { %v2212_v60 = vmul.f32 %v4145_v14, %v2206_v12  ;;  %v3668_v15 = vor.u32 %v4047_v0, %v3665_v46  ;;  %v3660_v19 = vor.u32 %v4045_v1, %v3657_v55  ;;  %v3708_v12 = vor.u32 %v4066_v52, %v3707_v26  ;;  %v3723_v0 = vld [vmem:[%s5118_s22 + $0x3] sm:$0x1]  ;;  %v3759_v46 = vld [vmem:[%s5118_s22 + $0x4] sm:$0x1]  ;;  %v3737_v1 = vld [vmem:[#allocation4 + $0xd8] sm:$0xf0] }
 0x495   :  { %v2194_v63 = vadd.f32 %v2193_v37, %v2133_v62  ;;  %v3727_v52 = vld [vmem:[#allocation4 + $0xc0] sm:$0xf] }
 0x496   :  { %v2218_v51 = vadd.f32 %v4146_v13, %v2212_v60  ;;  %v3691_v60 = vld [vmem:[#allocation4 + $0x80] sm:$0xf] }
 0x497   :  { %v2201_v30 = vadd.f32 %v4144_v32, %v2194_v63  ;;  %v3655_v32 = vld [vmem:[#allocation4] sm:$0xf]  ;;  %v3715_v63 = vld [vmem:[#allocation4 + $0xb0] sm:$0xf] }
 0x498   :  { %v3656_v58 = vor.u32 %v4046_v47, %v3655_v32  ;;  %v4074_v32 = vld [vmem:[#allocation4 + $0xe4] sm:$0xf0] }
 0x499   :  { %vm2203_vm2 = vcmp.gt.f32.partialorder %v2201_v30, 0.0  ;;  %v2205_v21 = vmul.f32 0.01, %v2201_v30 }
 0x49a   :  { %2395 = vmatpush.bf16.msrb.mxu2 %v3656_v58  ;;  %v4071_v58 = vld [vmem:[#allocation4 + $0xd4] sm:$0xf] }
 0x49b   :  { %v2207_v61 = vsel %vm2203_vm2, %v2201_v30, %v2205_v21  ;;  %v3699_v30 = vld [vmem:[#allocation4 + $0x90] sm:$0xf]  ;;  %v3740_v55 = vor.u32 %v4071_v58, %v3737_v1  ;;  %v4089_v58 = vld [vmem:[#allocation4 + $0x164] sm:$0xf]  ;;  %v3817_v1 = vld [vmem:[#allocation4 + $0x168] sm:$0xf0] }
 0x49c   :  { %v2213_v40 = vmul.f32 %v4145_v14, %v2207_v61  ;;  %v3716_v14 = vor.u32 %v4068_v4, %v3715_v63  ;;  %v4062_v61 = vld [vmem:[#allocation4 + $0x84] sm:$0xf0]  ;;  %v3729_v4 = vld [vmem:[#allocation4 + $0xc8] sm:$0xf0] }
 0x49e   :  { %v2219_v16 = vadd.f32 %v4146_v13, %v2213_v40  ;;  %v3700_v13 = vor.u32 %v4064_v3, %v3699_v30  ;;  %v3692_v40 = vor.u32 %v4062_v61, %v3691_v60  ;;  %v3787_v3 = vld [vmem:[#allocation4 + $0x130] sm:$0xf]  ;;  %v4081_v60 = vld [vmem:[#allocation4 + $0x124] sm:$0xf]  ;;  %v3781_v61 = vld [vmem:[#allocation4 + $0x128] sm:$0xf0] }
 0x4a0   :  { %v4966_v50 = vpack.c.bf16 %v2219_v16, %v2218_v51  ;;  %v3687_v16 = vld [vmem:[%s5118_s22 + $0x2] sm:$0x1] }
 0x4a2   :  { %2233 = vmatpush.bf16.msrb.mxu1 %v4966_v50  ;;  %2723 = vmatpush.bf16.msra.mxu0 %v4966_v50 }
 0x4a5   :  { %3616 = vmatmul.msk.bf16.vlgmr.msrb.gmra.mxu1 %vm2222_vm3, %v2221_v18  ;;  %v3720_v18 = vor.u32 %v4067_v8, %v3717_v17  ;;  %3796 = vmatmul.msk.bf16.vlgmr.msra.gmra.mxu0 %vm2222_vm3, %v3795_v24  ;;  %v4079_v8 = vld [vmem:[#allocation4 + $0x114] sm:$0xf]  ;;  %v3773_v17 = vld [vmem:[#allocation4 + $0x118] sm:$0xf0]  ;;  %v4088_v24 = vld [vmem:[#allocation4 + $0x154] sm:$0xf0] }
 0x4a6   :  { %2260 = vmatpush.bf16.msra.mxu1 %v4966_v50 }
 0x4aa   :  { %2336 = vmatpush.bf16.msrb.mxu1 %v3650_v48  ;;  %v4065_v48 = vld [vmem:[#allocation4 + $0xa4] sm:$0xf] }
 0x4ae   :  { %2337 = vmatpush.bf16.msrb.mxu1 %v3642_v10  ;;  %v3701_v10 = vld [vmem:[#allocation4 + $0x98] sm:$0xf0] }
 0x4af   :  { %v3704_v43 = vor.u32 %v4063_v25, %v3701_v10  ;;  %v4077_v10 = vld [vmem:[#allocation4 + $0x104] sm:$0xf] }
 0x4b2   :  { %2338 = vmatpush.bf16.msrb.mxu1 %v3634_v22 }
 0x4b5   :  { %3618 = vmatmul.msk.bf16.vlgmr.msra.gmra.mxu1 %vm2222_vm3, %v3617_v35  ;;  %v3709_v35 = vld [vmem:[#allocation4 + $0xa8] sm:$0xf0] }
 0x4b6   :  { %2339 = vmatpush.bf16.msrb.mxu1 %v3626_v33  ;;  %v3712_v23 = vor.u32 %v4065_v48, %v3709_v35  ;;  %v3776_v48 = vor.u32 %v4079_v8, %v3773_v17  ;;  %v3771_v35 = vld [vmem:[#allocation4 + $0x110] sm:$0xf]  ;;  %v3853_v17 = vld [vmem:[#allocation4 + $0x1a8] sm:$0xf0] }
 0x4ba   :  { %2405 = vmatpush.bf16.msra.mxu1 %v3684_v9  ;;  %v4075_v9 = vld [vmem:[#allocation4 + $0xf4] sm:$0xf] }
 0x4bb   :  { %v3756_v39 = vor.u32 %v4075_v9, %v3753_v29 }
 0x4bd   :  { %2601 = vmatpush.bf16.msrb.mxu3 %v3756_v39  ;;  %v3799_v39 = vld [vmem:[#allocation4 + $0x140] sm:$0xf] }
 0x4be   :  { %2406 = vmatpush.bf16.msra.mxu1 %v3676_v49  ;;  %v3745_v49 = vld [vmem:[#allocation4 + $0xe8] sm:$0xf0]  ;;  %v3800_v5 = vor.u32 %v4086_v31, %v3799_v39  ;;  %v3897_v39 = vld [vmem:[#allocation4 + $0x1f8] sm:$0xf0] }
 0x4bf   :  { %v3748_v56 = vor.u32 %v4073_v41, %v3745_v49 }
 0x4c1   :  { %2602 = vmatpush.bf16.msrb.mxu3 %v3748_v56 }
 0x4c2   :  { %2407 = vmatpush.bf16.msra.mxu1 %v3668_v15  ;;  %v3743_v15 = vld [vmem:[#allocation4 + $0xe0] sm:$0xf] }
 0x4c3   :  { %v3744_v47 = vor.u32 %v4074_v32, %v3743_v15 }
 0x4c5   :  { %2603 = vmatpush.bf16.msrb.mxu3 %v3740_v55  ;;  %v4087_v55 = vld [vmem:[#allocation4 + $0x154] sm:$0xf] }
 0x4c6   :  { %2408 = vmatpush.bf16.msra.mxu1 %v3660_v19  ;;  %v3735_v19 = vld [vmem:[#allocation4 + $0xd0] sm:$0xf] }
 0x522   :  { %v2235_v62 = vpop.f32.mrf.mxu1  ;;  %v2725_v29 = vpop.f32.mrf.mxu0 }
 0x523   :  { %v2239_v51 = vpack.c.bf16 %v2235_v62, %v2235_v62  ;;  %v4072_v62 = vld [vmem:[#allocation4 + $0xd4] sm:$0xf0]  ;;  %v2729_v56 = vpack.c.bf16 %v2725_v29, %v2725_v29 }
 0x524   :  { %v3736_v63 = vor.u32 %v4072_v62, %v3735_v19  ;;  %v3809_v19 = vld [vmem:[#allocation4 + $0x158] sm:$0xf0] }
 0x52a   :  { %v2237_v37 = vpop.f32.mrf.mxu1 }
 0x52b   :  { %v4069_v37 = vld [vmem:[#allocation4 + $0xc4] sm:$0xf] }
 0x532   :  { %v2262_v7 = vpop.f32.mrf.mxu1 }
 0x533   :  { %v2266_v27 = vpack.c.bf16 %v2262_v7, %v2262_v7  ;;  %v3732_v7 = vor.u32 %v4069_v37, %v3729_v4  ;;  %v3812_v37 = vor.u32 %v4087_v55, %v3809_v19  ;;  %v3801_v4 = vld [vmem:[#allocation4 + $0x148] sm:$0xf0]  ;;  %v4101_v55 = vld [vmem:[#allocation4 + $0x1c4] sm:$0xf] }
 0x535   :  { %3651 = vmatmul.msk.bf16.vlgmr.msra.gmra.mxu2 %vm1392_vm5, %v2266_v27  ;;  %3652 = vmatmul.msk.bf16.vlgmr.msrb.gmra.mxu1 %vm1392_vm5, %v2266_v27  ;;  %v3789_v27 = vld [vmem:[#allocation4 + $0x138] sm:$0xf0] }
 0x536   :  { %2426 = vmatpush.bf16.msra.mxu2 %v4966_v50  ;;  %2489 = vmatpush.bf16.msrb.mxu1 %v3716_v14  ;;  %v4083_v14 = vld [vmem:[#allocation4 + $0x134] sm:$0xf] }
 0x537   :  { %v3792_v26 = vor.u32 %v4083_v14, %v3789_v27  ;;  %2604 = vmatpush.bf16.msrb.mxu3 %v3732_v7 }
 0x53a   :  { %2490 = vmatpush.bf16.msrb.mxu1 %v3708_v12  ;;  %v2264_v21 = vpop.f32.mrf.mxu1  ;;  %v4070_v12 = vld [vmem:[#allocation4 + $0xc4] sm:$0xf0] }
 0x53b   :  { %2700 = vmatpush.bf16.msra.mxu3 %v3792_v26  ;;  %v3728_v30 = vor.u32 %v4070_v12, %v3727_v52  ;;  %v4084_v21 = vld [vmem:[#allocation4 + $0x134] sm:$0xf0]  ;;  %v3831_v52 = vld [vmem:[%s5118_s22 + $0x6] sm:$0x1]  ;;  %v3867_v12 = vld [vmem:[%s5118_s22 + $0x7] sm:$0x1] }
 0x53e   :  { %2491 = vmatpush.bf16.msrb.mxu1 %v3700_v13  ;;  %v3788_v13 = vor.u32 %v4084_v21, %v3787_v3  ;;  %v4100_v3 = vld [vmem:[#allocation4 + $0x1b4] sm:$0xf0]  ;;  %v4099_v21 = vld [vmem:[#allocation4 + $0x1b4] sm:$0xf] }
 0x542   :  { %2492 = vmatpush.bf16.msrb.mxu1 %v3692_v40  ;;  %v3779_v40 = vld [vmem:[#allocation4 + $0x120] sm:$0xf] }
 0x545   :  { %3685 = vmatmul.msk.bf16.vlgmr.msrb.gmra.mxu2 %vm1392_vm5, %v2239_v51  ;;  %3686 = vmatmul.msk.bf16.vlgmr.msra.gmra.mxu1 %vm1392_vm5, %v2239_v51  ;;  %v3784_v51 = vor.u32 %v4081_v60, %v3781_v61  ;;  %v3861_v60 = vld [vmem:[#allocation4 + $0x1b8] sm:$0xf0] }
 0x546   :  { %2525 = vmatpush.bf16.msra.mxu1 %v4966_v50  ;;  %2502 = vmatpush.bf16.msrb.mxu2 %v3720_v18  ;;  %v3864_v61 = vor.u32 %v4099_v21, %v3861_v60 }
 0x547   :  { %2701 = vmatpush.bf16.msra.mxu3 %v3784_v51  ;;  %v4098_v51 = vld [vmem:[#allocation4 + $0x1a4] sm:$0xf0] }
 0x54a   :  { %2503 = vmatpush.bf16.msrb.mxu2 %v3712_v23  ;;  %v4080_v23 = vld [vmem:[#allocation4 + $0x114] sm:$0xf0] }
 0x54b   :  { %2702 = vmatpush.bf16.msra.mxu3 %v3776_v48  ;;  %v3772_v25 = vor.u32 %v4080_v23, %v3771_v35  ;;  %v3843_v48 = vld [vmem:[#allocation4 + $0x190] sm:$0xf]  ;;  %v4096_v35 = vld [vmem:[#allocation4 + $0x194] sm:$0xf0]  ;;  %v4095_v23 = vld [vmem:[#allocation4 + $0x194] sm:$0xf] }
 0x54e   :  { %2504 = vmatpush.bf16.msrb.mxu2 %v3704_v43  ;;  %v3765_v43 = vld [vmem:[#allocation4 + $0x108] sm:$0xf0] }
 0x552   :  { %2505 = vmatpush.bf16.msrb.mxu2 %v3696_v6  ;;  %v3764_v6 = vor.u32 %v4078_v36, %v3763_v38  ;;  %v3835_v38 = vld [vmem:[#allocation4 + $0x180] sm:$0xf]  ;;  %v4094_v36 = vld [vmem:[#allocation4 + $0x184] sm:$0xf0] }
 0x555   :  { %3688 = vmatmul.msk.bf16.vlgmr.msra.gmra.mxu2 %vm2222_vm3, %v3687_v16  ;;  %v4082_v16 = vld [vmem:[#allocation4 + $0x124] sm:$0xf0] }
 0x556   :  { %2588 = vmatpush.bf16.msra.mxu2 %v3752_v34  ;;  %v3780_v18 = vor.u32 %v4082_v16, %v3779_v40  ;;  %v3851_v40 = vld [vmem:[#allocation4 + $0x1a0] sm:$0xf]  ;;  %v4097_v16 = vld [vmem:[#allocation4 + $0x1a4] sm:$0xf] }
 0x557   :  { %v3852_v8 = vor.u32 %v4098_v51, %v3851_v40 }
 0x55a   :  { %2589 = vmatpush.bf16.msra.mxu2 %v3744_v47 }
 0x55e   :  { %2590 = vmatpush.bf16.msra.mxu2 %v3736_v63  ;;  %v4085_v63 = vld [vmem:[#allocation4 + $0x144] sm:$0xf] }
 0x55f   :  { %v3804_v7 = vor.u32 %v4085_v63, %v3801_v4 }
 0x562   :  { %2591 = vmatpush.bf16.msra.mxu2 %v3728_v30  ;;  %v3859_v30 = vld [vmem:[#allocation4 + $0x1b0] sm:$0xf] }
 0x5b2   :  { %v2341_v28 = vpop.f32.mrf.mxu1 }
 0x5b8   :  { %v2328_v20 = vpop.f32.mrf.mxu2 }
 0x5ba   :  { %v2343_v22 = vpop.f32.mrf.mxu1 }
 0x5bb   :  { %v4092_v22 = vld [vmem:[#allocation4 + $0x174] sm:$0xf0] }
 0x5c0   :  { %v2330_v2 = vpop.f32.mrf.mxu2 }
 0x5c2   :  { %v2410_v57 = vpop.f32.mrf.mxu1 }
 0x5c3   :  { %v4989_v42 = vadd.f32 %v2410_v57, %v2341_v28  ;;  %v3768_v28 = vor.u32 %v4077_v10, %v3765_v43  ;;  %v3815_v57 = vld [vmem:[#allocation4 + $0x160] sm:$0xf]  ;;  %v3845_v10 = vld [vmem:[#allocation4 + $0x198] sm:$0xf0] }
 0x5c4   :  { %v3848_v43 = vor.u32 %v4095_v23, %v3845_v10  ;;  %v4120_v23 = vld [vmem:[%s5121_s25 + $0x58] sm:$0xff]  ;;  %v4119_v10 = vld [vmem:[%s5121_s25 + $0x50] sm:$0xff] }
 0x5c5   :  { %2703 = vmatpush.bf16.msra.mxu3 %v3768_v28 }
 0x5c8   :  { %v2397_v11 = vpop.f32.mrf.mxu2 }
 0x5c9   :  { %v4991_v44 = vadd.f32 %v2397_v11, %v2328_v20  ;;  %v3823_v20 = vld [vmem:[#allocation4 + $0x170] sm:$0xf]  ;;  %v4090_v11 = vld [vmem:[#allocation4 + $0x164] sm:$0xf0] }
 0x5ca   :  { %v2412_v45 = vpop.f32.mrf.mxu1  ;;  %v3824_v2 = vor.u32 %v4092_v22, %v3823_v20  ;;  %v3836_v20 = vor.u32 %v4094_v36, %v3835_v38  ;;  %v3837_v22 = vld [vmem:[#allocation4 + $0x188] sm:$0xf0]  ;;  %v4111_v38 = vld [vmem:[%s5121_s25 + $0x10] sm:$0xff]  ;;  %v4117_v36 = vld [vmem:[%s5121_s25 + $0x40] sm:$0xff] }
 0x5cb   :  { %v3816_v45 = vor.u32 %v4090_v11, %v3815_v57 }
 0x5d0   :  { %v2399_v53 = vpop.f32.mrf.mxu2 }
 0x5d8   :  { %v2428_v33 = vpop.f32.mrf.mxu2 }
 0x5d9   :  { %v2432_v59 = vpack.c.bf16 %v2428_v33, %v2428_v33 }
 0x5db   :  { %3721 = vmatmul.msk.bf16.vlgmr.msrb.gmra.mxu1 %vm1392_vm5, %v2432_v59  ;;  %3722 = vmatmul.msk.bf16.vlgmr.msrb.gmra.mxu2 %vm1392_vm5, %v2432_v59  ;;  %v3807_v59 = vld [vmem:[#allocation4 + $0x150] sm:$0xf] }
 0x5dc   :  { %2624 = vmatpush.bf16.msrb.mxu1 %v4966_v50  ;;  %2687 = vmatpush.bf16.msrb.mxu2 %v3788_v13  ;;  %v3808_v9 = vor.u32 %v4088_v24, %v3807_v59  ;;  %v3895_v59 = vld [vmem:[#allocation4 + $0x1f0] sm:$0xf]  ;;  %v4108_v24 = vld [vmem:[#allocation4 + $0x1f4] sm:$0xf0] }
 0x5dd   :  { %v3896_v29 = vor.u32 %v4108_v24, %v3895_v59 }
 0x5e0   :  { %v2430_v54 = vpop.f32.mrf.mxu2  ;;  %2688 = vmatpush.bf16.msrb.mxu2 %v3780_v18  ;;  %v3856_v18 = vor.u32 %v4097_v16, %v3853_v17  ;;  %v4122_v17 = vld [vmem:[%s5121_s25 + $0x68] sm:$0xff] }
 0x5e1   :  { %v4091_v54 = vld [vmem:[#allocation4 + $0x174] sm:$0xf] }
 0x5e4   :  { %2689 = vmatpush.bf16.msrb.mxu2 %v3772_v25  ;;  %v3844_v25 = vor.u32 %v4096_v35, %v3843_v48  ;;  %v4121_v48 = vld [vmem:[%s5121_s25 + $0x60] sm:$0xff]  ;;  %v4114_v35 = vld [vmem:[%s5121_s25 + $0x28] sm:$0xff] }
 0x5e8   :  { %2690 = vmatpush.bf16.msrb.mxu2 %v3764_v6  ;;  %v4093_v6 = vld [vmem:[#allocation4 + $0x184] sm:$0xf] }
 0x5e9   :  { %v3840_v11 = vor.u32 %v4093_v6, %v3837_v22  ;;  %v4110_v6 = vld [vmem:[%s5121_s25 + $0x8] sm:$0xff] }
 0x5eb   :  { %3724 = vmatmul.msk.bf16.vlgmr.msra.gmra.mxu1 %vm2222_vm3, %v3723_v0  ;;  %v3825_v0 = vld [vmem:[#allocation4 + $0x178] sm:$0xf0] }
 0x5ec   :  { %2786 = vmatpush.bf16.msra.mxu1 %v3824_v2  ;;  %v3828_v32 = vor.u32 %v4091_v54, %v3825_v0 }
 0x5f0   :  { %2787 = vmatpush.bf16.msra.mxu1 %v3816_v45 }
 0x5f4   :  { %2788 = vmatpush.bf16.msra.mxu1 %v3808_v9  ;;  %v4107_v9 = vld [vmem:[#allocation4 + $0x1f4] sm:$0xf] }
 0x5f5   :  { %v3900_v31 = vor.u32 %v4107_v9, %v3897_v39 }
 0x5f8   :  { %2789 = vmatpush.bf16.msra.mxu1 %v3800_v5  ;;  %v3887_v5 = vld [vmem:[#allocation4 + $0x1e0] sm:$0xf] }
 0x5fb   :  { %3760 = vmatmul.msk.bf16.vlgmr.msrb.gmra.mxu1 %vm2222_vm3, %v3759_v46 }
 0x5fc   :  { %2898 = vmatpush.bf16.msrb.mxu1 %v3864_v61 }
 0x600   :  { %2899 = vmatpush.bf16.msrb.mxu1 %v3856_v18  ;;  %v4115_v18 = vld [vmem:[%s5121_s25 + $0x30] sm:$0xff] }
 0x604   :  { %2900 = vmatpush.bf16.msrb.mxu1 %v3848_v43  ;;  %v4112_v43 = vld [vmem:[%s5121_s25 + $0x18] sm:$0xff] }
 0x608   :  { %2901 = vmatpush.bf16.msrb.mxu1 %v3840_v11 }
 0x60b   :  { %3829 = vmatmul.msk.bf16.vlgmr.msra.gmra.mxu1 %vm1392_vm5, %v2729_v56 }
 0x658   :  { %v2494_v53 = vpop.f32.mrf.mxu1 }
 0x659   :  { %v5009_v33 = vadd.f32 %v2494_v53, %v4991_v44  ;;  %v2727_v44 = vpop.f32.mrf.mxu0 }
 0x65a   :  { %v3889_v44 = vld [vmem:[#allocation4 + $0x1e8] sm:$0xf0] }
 0x65e   :  { %v2507_v41 = vpop.f32.mrf.mxu2 }
 0x65f   :  { %v5012_v34 = vadd.f32 %v2507_v41, %v4989_v42  ;;  %v3820_v42 = vor.u32 %v4089_v58, %v3817_v1  ;;  %v4106_v41 = vld [vmem:[#allocation4 + $0x1e4] sm:$0xf0]  ;;  %v3871_v1 = vld [vmem:[#allocation4 + $0x1c0] sm:$0xf] }
 0x660   :  { %v2496_v49 = vpop.f32.mrf.mxu1 }
 0x661   :  { %v4105_v49 = vld [vmem:[#allocation4 + $0x1e4] sm:$0xf] }
 0x666   :  { %v2509_v46 = vpop.f32.mrf.mxu2 }
 0x667   :  { %v3879_v46 = vld [vmem:[#allocation4 + $0x1d0] sm:$0xf] }
 0x668   :  { %v2527_v15 = vpop.f32.mrf.mxu1 }
 0x669   :  { %v2531_v47 = vpack.c.bf16 %v2527_v15, %v2527_v15  ;;  %v4103_v15 = vld [vmem:[#allocation4 + $0x1d4] sm:$0xf] }
 0x66b   :  { %3757 = vmatmul.msk.bf16.vlgmr.msra.gmra.mxu2 %vm1392_vm5, %v2531_v47  ;;  %3758 = vmatmul.msk.bf16.vlgmr.msrb.gmra.mxu3 %vm1392_vm5, %v2531_v47  ;;  %v3881_v47 = vld [vmem:[#allocation4 + $0x1d8] sm:$0xf0] }
 0x66c   :  { %2822 = vmatpush.bf16.msrb.mxu3 %v4966_v50  ;;  %2799 = vmatpush.bf16.msra.mxu2 %v3828_v32  ;;  %v3884_v58 = vor.u32 %v4103_v15, %v3881_v47 }
 0x670   :  { %v2529_v62 = vpop.f32.mrf.mxu1  ;;  %2800 = vmatpush.bf16.msra.mxu2 %v3820_v42  ;;  %v4102_v42 = vld [vmem:[#allocation4 + $0x1c4] sm:$0xf0] }
 0x671   :  { %v3872_v19 = vor.u32 %v4102_v42, %v3871_v1  ;;  %v3873_v62 = vld [vmem:[#allocation4 + $0x1c8] sm:$0xf0] }
 0x672   :  { %v3876_v4 = vor.u32 %v4101_v55, %v3873_v62 }
 0x674   :  { %2801 = vmatpush.bf16.msra.mxu2 %v3812_v37 }
 0x678   :  { %v2626_v14 = vpop.f32.mrf.mxu1  ;;  %2802 = vmatpush.bf16.msra.mxu2 %v3804_v7 }
 0x679   :  { %v2630_v27 = vpack.c.bf16 %v2626_v14, %v2626_v14 }
 0x67b   :  { %3793 = vmatmul.msk.bf16.vlgmr.msrb.gmra.mxu2 %vm1392_vm5, %v2630_v27  ;;  %3794 = vmatmul.msk.bf16.vlgmr.msra.gmra.mxu3 %vm1392_vm5, %v2630_v27 }
 0x67c   :  { %2921 = vmatpush.bf16.msrb.mxu2 %v4966_v50  ;;  %v3860_v50 = vor.u32 %v4100_v3, %v3859_v30  ;;  %2984 = vmatpush.bf16.msra.mxu3 %v3896_v29  ;;  %v4123_v30 = vld [vmem:[%s5121_s25 + $0x70] sm:$0xff] }
 0x67e   :  { %2885 = vmatpush.bf16.msrb.mxu0 %v3860_v50 }
 0x680   :  { %v2628_v26 = vpop.f32.mrf.mxu1 }
 0x682   :  { %2886 = vmatpush.bf16.msrb.mxu0 %v3852_v8  ;;  %v4116_v8 = vld [vmem:[%s5121_s25 + $0x38] sm:$0xff] }
 0x683   :  { %3156 = vmatpush.bf16.msra.mxu1 %v4116_v8 }
 0x686   :  { %2887 = vmatpush.bf16.msrb.mxu0 %v3844_v25  ;;  %v4113_v25 = vld [vmem:[%s5121_s25 + $0x20] sm:$0xff] }
 0x687   :  { %3157 = vmatpush.bf16.msra.mxu1 %v4115_v18 }
 0x688   :  { %v5030_v13 = vpop.f32.mrf.mxu1 }
 0x68a   :  { %2888 = vmatpush.bf16.msrb.mxu0 %v3836_v20  ;;  %v4109_v20 = vld [vmem:[%s5121_s25] sm:$0xff] }
 0x68b   :  { %3830 = vmatmul.msk.bf16.vlgmr.msra.gmra.mxu2 %vm1392_vm5, %v2729_v56  ;;  %3832 = vmatmul.msk.bf16.vlgmr.msrb.gmra.mxu3 %vm2222_vm3, %v3831_v52  ;;  %v3888_v56 = vor.u32 %v4106_v41, %v3887_v5 }
 0x68c   :  { %3158 = vmatpush.bf16.msra.mxu1 %v4114_v35 }
 0x68d   :  { %2985 = vmatpush.bf16.msra.mxu3 %v3888_v56 }
 0x68e   :  { %2997 = vmatpush.bf16.msra.mxu0 %v3900_v31 }
 0x690   :  { %v2793_v28 = vpop.f32.mrf.mxu1  ;;  %3159 = vmatpush.bf16.msra.mxu1 %v4113_v25 }
 0x691   :  { %v4118_v28 = vld [vmem:[%s5121_s25 + $0x48] sm:$0xff] }
 0x694   :  { %3160 = vmatpush.bf16.msra.mxu1 %v4112_v43 }
 0x698   :  { %3161 = vmatpush.bf16.msra.mxu1 %v4111_v38 }
 0x69b   :  { %3868 = vmatmul.msk.bf16.vlgmr.msrb.gmra.mxu2 %vm2222_vm3, %v3867_v12  ;;  %v4124_v12 = vld [vmem:[%s5121_s25 + $0x78] sm:$0xff] }
 0x69c   :  { %3169 = vmatpush.bf16.msra.mxu2 %v4124_v12  ;;  %3162 = vmatpush.bf16.msra.mxu1 %v4110_v6 }
 0x6a0   :  { %3170 = vmatpush.bf16.msra.mxu2 %v4123_v30  ;;  %3163 = vmatpush.bf16.msra.mxu1 %v4109_v20 }
 0x6a4   :  { %3171 = vmatpush.bf16.msra.mxu2 %v4122_v17 }
 0x6a8   :  { %3172 = vmatpush.bf16.msra.mxu2 %v4121_v48 }
 0x6ac   :  { %3173 = vmatpush.bf16.msra.mxu2 %v4120_v23 }
 0x6b0   :  { %3174 = vmatpush.bf16.msra.mxu2 %v4119_v10 }
 0x6b4   :  { %3175 = vmatpush.bf16.msra.mxu2 %v4118_v28 }
 0x6b8   :  { %3176 = vmatpush.bf16.msra.mxu2 %v4117_v36 }
 0x6ee   :  { %v2593_v2 = vpop.f32.mrf.mxu2  ;;  %v2606_v57 = vpop.f32.mrf.mxu3 }
 0x6ef   :  { %v2610_v45 = vadd.f32 %v2593_v2, %v5009_v33  ;;  %v2611_v53 = vadd.f32 %v2606_v57, %v5012_v34  ;;  %v3892_v33 = vor.u32 %v4105_v49, %v3889_v44  ;;  %v4104_v34 = vld [vmem:[#allocation4 + $0x1d4] sm:$0xf0] }
 0x6f0   :  { %v3880_v32 = vor.u32 %v4104_v34, %v3879_v46 }
 0x6f1   :  { %2998 = vmatpush.bf16.msra.mxu0 %v3892_v33 }
 0x6f2   :  { %2986 = vmatpush.bf16.msra.mxu3 %v3880_v32  ;;  %v4147_v32 = vld [vmem:[%s5122_s26] ss:$0 sm:$0xff] }
 0x6f5   :  { %2999 = vmatpush.bf16.msra.mxu0 %v3884_v58 }
 0x6f6   :  { %v2595_v54 = vpop.f32.mrf.mxu2  ;;  %v2608_v0 = vpop.f32.mrf.mxu3  ;;  %2987 = vmatpush.bf16.msra.mxu3 %v3872_v19 }
 0x6f9   :  { %3000 = vmatpush.bf16.msra.mxu0 %v3876_v4 }
 0x6fe   :  { %v2692_v37 = vpop.f32.mrf.mxu2  ;;  %v2705_v63 = vpop.f32.mrf.mxu3 }
 0x6ff   :  { %v2709_v7 = vadd.f32 %v2692_v37, %v2610_v45  ;;  %v2710_v14 = vadd.f32 %v2705_v63, %v2611_v53  ;;  %v3008_v45 = vld [vmem:[%s5120_s24] sm:$0x3] }
 0x700   :  { %v3011_v59 = vperm.slane %v3008_v45, 1  ;;  %v3010_v5 = vperm.slane %v3008_v45, 0 }
 0x701   :  { %v2808_v27 = vadd.f32 %v5030_v13, %v2709_v7 }
 0x706   :  { %v2694_v26 = vpop.f32.mrf.mxu2  ;;  %v2707_v52 = vpop.f32.mrf.mxu3 }
 0x70e   :  { %v2804_v3 = vpop.f32.mrf.mxu2  ;;  %v2824_v21 = vpop.f32.mrf.mxu3 }
 0x70f   :  { %v2809_v50 = vadd.f32 %v2804_v3, %v2710_v14  ;;  %v2828_v60 = vpack.c.bf16 %v2824_v21, %v2824_v21 }
 0x711   :  { %3865 = vmatmul.msk.bf16.vlgmr.msrb.gmra.mxu0 %vm1392_vm5, %v2828_v60  ;;  %3866 = vmatmul.msk.bf16.vlgmr.msrb.gmra.mxu1 %vm1392_vm5, %v2828_v60 }
 0x716   :  { %v2806_v13 = vpop.f32.mrf.mxu2  ;;  %v2826_v61 = vpop.f32.mrf.mxu3 }
 0x71e   :  { %v2923_v40 = vpop.f32.mrf.mxu2 }
 0x71f   :  { %v2927_v51 = vpack.c.bf16 %v2923_v40, %v2923_v40 }
 0x721   :  { %3901 = vmatmul.msk.bf16.vlgmr.msra.gmra.mxu3 %vm1392_vm5, %v2927_v51  ;;  %3902 = vmatmul.msk.bf16.vlgmr.msra.gmra.mxu0 %vm1392_vm5, %v2927_v51 }
 0x726   :  { %v2925_v16 = vpop.f32.mrf.mxu2 }
 0x78e   :  { %v2890_v22 = vpop.f32.mrf.mxu0  ;;  %v2903_v2 = vpop.f32.mrf.mxu1 }
 0x78f   :  { %v2908_v53 = vadd.f32 %v2903_v2, %v2809_v50  ;;  %v2907_v39 = vadd.f32 %v2890_v22, %v2808_v27 }
 0x796   :  { %v2892_v57 = vpop.f32.mrf.mxu0  ;;  %v2905_v11 = vpop.f32.mrf.mxu1 }
 0x79e   :  { %v3002_v24 = vpop.f32.mrf.mxu0 }
 0x79f   :  { %v3007_v9 = vadd.f32 %v3002_v24, %v2908_v53 }
 0x7a1   :  { %v3015_v29 = vadd.f32 %v3011_v59, %v3007_v9 }
 0x7a3   :  { %vm3017_vm5 = vcmp.gt.f32.partialorder %v3015_v29, 0.0  ;;  %v3019_v31 = vmul.f32 0.01, %v3015_v29 }
 0x7a4   :  { %v2989_v41 = vpop.f32.mrf.mxu3 }
 0x7a5   :  { %v3021_v49 = vsel %vm3017_vm5, %v3015_v29, %v3019_v31  ;;  %v3006_v56 = vadd.f32 %v2989_v41, %v2907_v39 }
 0x7a6   :  { %v3023_v44 = vpack.c.bf16 %v3021_v49, %v3021_v49  ;;  %v3004_v54 = vpop.f32.mrf.mxu0 }
 0x7a7   :  { %v3014_v0 = vadd.f32 %v3010_v5, %v3006_v56 }
 0x7a8   :  { %3177 = vmatmul.bf16.vlgmr.msra.gmra.mxu2 %v3023_v44 }
 0x7a9   :  { %vm3016_vm6 = vcmp.gt.f32.partialorder %v3014_v0, 0.0  ;;  %v3018_v33 = vmul.f32 0.01, %v3014_v0 }
 0x7ab   :  { %v3020_v46 = vsel %vm3016_vm6, %v3014_v0, %v3018_v33 }
 0x7ac   :  { %v3022_v34 = vpack.c.bf16 %v3020_v46, %v3020_v46  ;;  %v2991_v15 = vpop.f32.mrf.mxu3 }
 0x7ae   :  { %3164 = vmatmul.bf16.vlgmr.msra.gmra.mxu1 %v3022_v34 }
 0x82b   :  { %v3165_v47 = vpop.f32.mrf.mxu1  ;;  %v3178_v58 = vpop.f32.mrf.mxu2 }
 0x82c   :  { %v3166_v1 = vadd.f32 %v4147_v32, %v3165_v47 }
 0x82e   :  { %v3179_v42 = vadd.f32 %v3178_v58, %v3166_v1 }
 0x830   :  { %3182 = vst [vmem:[%s5123_s27] sm:$0x3] %v3179_v42 }
 0x833   :  { %v3167_v55 = vpop.f32.mrf.mxu1  ;;  %v3180_v19 = vpop.f32.mrf.mxu2 }
 0x834   :  { %3187 = vsyncpa [#allocation3], 1 }
 0x835   :  { %3188 = vsyncpa [#allocation5], 1 }

</bundles_post_ra>
